<compile_context>
chip_gen: v6e
topology: v6e:2x2x1
jax: 0.10.0
libtpu: 0.0.40
codegen_flags: <defaults>
</compile_context>

<pallas_src>
import math

import jax
import jax.numpy as jnp
from jax.experimental import pallas as pl
from jax.experimental.pallas import tpu as pltpu

LN_EPS = 1e-5
NEG_INF = -1e9
VMEM_SPEC = pl.BlockSpec(memory_space=pltpu.MemorySpace.VMEM)


# ---------------------------------------------------------------------------
# kernel
# ---------------------------------------------------------------------------
def _layernorm(z, gamma, beta):
    mean = jnp.mean(z, axis=-1, keepdims=True)
    c = z - mean
    var = jnp.mean(c * c, axis=-1, keepdims=True)
    return c * jax.lax.rsqrt(var + LN_EPS) * gamma + beta


def _make_forward_kernel(*, B, S, E, nhead, nlayers, num_experts):
    hd = E // nhead
    T = B * S
    attn_scale = 1.0 / math.sqrt(hd)
    in_scale = math.sqrt(E)

    def mha(x2, mask, wqkv, bqkv, wo, bo):
        """x2: [T,E] tokens; mask: [S,S] additive or None.  Returns [T,E]."""
        # Fused QKV projection: one wide [T,E]@[E,3E] matmul.
        qkv = (jnp.dot(x2, wqkv, preferred_element_type=jnp.float32) + bqkv)
        qkv = qkv.reshape(B, S, 3 * E)
        heads = []
        for h in range(nhead):                                   # static unroll
            qh = qkv[..., h * hd:(h + 1) * hd]                   # [B,S,hd]
            kh = qkv[..., E + h * hd:E + (h + 1) * hd]
            vh = qkv[..., 2 * E + h * hd:2 * E + (h + 1) * hd]
            s = jnp.einsum('bqd,bkd->bqk', qh, kh,
                           preferred_element_type=jnp.float32) * attn_scale
            if mask is not None:
                s = s + mask
            m = jnp.max(s, axis=-1, keepdims=True)
            e = jnp.exp(s - m)
            p = e / jnp.sum(e, axis=-1, keepdims=True)
            heads.append(jnp.einsum('bqk,bkd->bqd', p, vh,
                                    preferred_element_type=jnp.float32))
        # Concatenate heads -> single output projection (no accumulate chain).
        attn = jnp.concatenate(heads, axis=-1).reshape(T, E)
        return jnp.dot(attn, wo, preferred_element_type=jnp.float32) + bo

    def kernel(x_ref, pe_ref, mask_ref, *rest):
        nlw = 12 * nlayers
        layer_refs = rest[:nlw]
        (w1g_ref, b1g_ref, w2s_ref, b2s_ref,
         sa_wqkv_ref, sa_bqkv_ref, sa_wo_ref, sa_bo_ref,
         wd_ref, bd_ref, o_ref) = rest[nlw:]

        mask = mask_ref[...]                                     # [S,S]
        # src*sqrt(E) + positional encoding (pe broadcast along batch in-kernel).
        # TODO(synk): nn.Dropout layers are eval-mode identity.
        x2 = (x_ref[...] * in_scale + pe_ref[...]).reshape(T, E)

        # ---- TransformerEncoder: nlayers x (MHA+res+LN1, FFN+res+LN2) ----
        for l in range(nlayers):
            (wqkv_r, bqkv_r, wo_r, bo_r, g1_r, be1_r,
             w1_r, b1_r, w2_r, b2_r, g2_r, be2_r) = layer_refs[12 * l:12 * (l + 1)]
            y = mha(x2, mask, wqkv_r[...], bqkv_r[...], wo_r[...], bo_r[...])
            x2 = _layernorm(x2 + y, g1_r[...], be1_r[...])
            hmid = jnp.maximum(
                jnp.dot(x2, w1_r[...], preferred_element_type=jnp.float32)
                + b1_r[...], 0.0)
            ff = jnp.dot(hmid, w2_r[...], preferred_element_type=jnp.float32) + b2_r[...]
            x2 = _layernorm(x2 + ff, g2_r[...], be2_r[...])

        # ---- GatedExpertNetwork (gate folded into the fused expert-w1 matmul) ----
        hg = jnp.dot(x2, w1g_ref[...], preferred_element_type=jnp.float32) + b1g_ref[...]
        h = jnp.maximum(hg[:, :num_experts * E], 0.0)            # [T, NE*E]
        logits = hg[:, num_experts * E:]                         # [T, NE]
        m = jnp.max(logits, axis=-1, keepdims=True)
        eg = jnp.exp(logits - m)
        gate = eg / jnp.sum(eg, axis=-1, keepdims=True)          # [T, NE]
        gate_wide = jnp.concatenate(
            [jnp.broadcast_to(gate[:, e:e + 1], (T, E)) for e in range(num_experts)],
            axis=-1)                                             # [T, NE*E]
        moe = jnp.dot(h * gate_wide, w2s_ref[...],
                      preferred_element_type=jnp.float32)        # one wide matmul
        gbias = gate[:, 0:1] * b2s_ref[0:1, :]
        for e in range(1, num_experts):
            gbias = gbias + gate[:, e:e + 1] * b2s_ref[e:e + 1, :]
        x2 = moe + gbias

        # ---- standalone nn.MultiheadAttention(x, x, x): no mask, no res/LN ----
        x2 = mha(x2, None, sa_wqkv_ref[...], sa_bqkv_ref[...],
                 sa_wo_ref[...], sa_bo_ref[...])

        # ---- fused, lane-padded (128-wide) decoder heads ----
        o_ref[...] = (jnp.dot(x2, wd_ref[...], preferred_element_type=jnp.float32)
                      + bd_ref[...])

    return kernel


# ---------------------------------------------------------------------------
# wrapper: single fused pallas_call for the whole forward pass
# ---------------------------------------------------------------------------
def enhanced_transformer_forward(src, src_mask, params, *, nhead):
    """src: [S, B, E] (seq-first, PyTorch layout); src_mask: [S, S] additive."""
    S, B, E = src.shape
    ge = params['gated_expert']
    dec = params['decoders']
    nlayers = len(params['layers'])

    x = jnp.transpose(src, (1, 0, 2))                            # batch-first

    args = [x, params['pe'][:S], src_mask]
    for lp in params['layers']:
        a, f = lp['attn'], lp['ffn']
        args += [a['wqkv'], a['bqkv'], a['wo'], a['bo'],
                 lp['ln1']['gamma'], lp['ln1']['beta'],
                 f['w1'], f['b1'], f['w2'], f['b2'],
                 lp['ln2']['gamma'], lp['ln2']['beta']]
    args += [ge['w1g'], ge['b1g'], ge['w2s'], ge['b2s']]
    sa = params['self_attn']
    args += [sa['wqkv'], sa['bqkv'], sa['wo'], sa['bo']]
    args += [dec['w'], dec['b']]

    kernel = _make_forward_kernel(B=B, S=S, E=E, nhead=nhead,
                                  nlayers=nlayers, num_experts=ge['num_experts'])

    out = pl.pallas_call(
        kernel,
        out_shape=jax.ShapeDtypeStruct((B * S, dec['d_pad']), jnp.float32),
        in_specs=[VMEM_SPEC] * len(args),
        out_specs=VMEM_SPEC,
        compiler_params=pltpu.CompilerParams(vmem_limit_bytes=32 * 1024 * 1024),
    )(*args)

    y = out[:, :dec['d_total']].reshape(B, S, dec['d_total'])
    y = jnp.transpose(y, (1, 0, 2))                              # [S, B, D_total]

    outs, off = [], 0
    for d in dec['dims']:
        outs.append(y[..., off:off + d])
        off += d
    out_poi, out_time, out_lat, out_lon, out_week, out_cat, out_categroy = outs
    # torch forward returns (poi, time, lat, lon, cat, categroy, week)
    return out_poi, out_time, out_lat, out_lon, out_cat, out_categroy, out_week


# ---------------------------------------------------------------------------
# parameter construction (deterministic, kernel-ready fused layouts)
# ---------------------------------------------------------------------------
def init_params(key, *, num_poi, num_cat, embed_size, nhead, nhid, nlayers,
                num_experts=2, max_len=500):
    E = embed_size
    kit = iter(jax.random.split(key, 256))

    def uniform(shape, bound):
        return jax.random.uniform(next(kit), shape, jnp.float32, -bound, bound)

    def linear(in_dim, out_dim):
        bound = 1.0 / math.sqrt(in_dim)
        return uniform((in_dim, out_dim), bound), uniform((1, out_dim), bound)

    # sinusoidal positional-encoding buffer [max_len, E]
    position = jnp.arange(max_len, dtype=jnp.float32)[:, None]
    div_term = jnp.exp(jnp.arange(0, E, 2, dtype=jnp.float32)
                       * (-math.log(10000.0) / E))
    pe = jnp.zeros((max_len, E), jnp.float32)
    pe = pe.at[:, 0::2].set(jnp.sin(position * div_term))
    pe = pe.at[:, 1::2].set(jnp.cos(position * div_term))

    def mha_params():
        bound = 1.0 / math.sqrt(E)
        return dict(wqkv=uniform((E, 3 * E), bound), bqkv=uniform((1, 3 * E), bound),
                    wo=uniform((E, E), bound), bo=uniform((1, E), bound))

    def ln_params():
        return dict(gamma=jnp.ones((1, E), jnp.float32),
                    beta=jnp.zeros((1, E), jnp.float32))

    layers = []
    for _ in range(nlayers):
        w1, b1 = linear(E, nhid)
        w2, b2 = linear(nhid, E)
        layers.append(dict(attn=mha_params(), ln1=ln_params(),
                           ffn=dict(w1=w1, b1=b1, w2=w2, b2=b2), ln2=ln_params()))

    # gated expert network: experts' first linears + gate columns fused into one
    # [E, NE*E + NE] matrix; second linears stacked into [NE*E, E].
    bound = 1.0 / math.sqrt(E)
    ew1, eb1, ew2, eb2 = [], [], [], []
    for _ in range(num_experts):
        w1, b1 = linear(E, E)
        w2, b2 = linear(E, E)
        ew1.append(w1); eb1.append(b1); ew2.append(w2); eb2.append(b2)
    wg = uniform((E, num_experts), bound)
    bg = uniform((1, num_experts), bound)
    gated_expert = dict(num_experts=num_experts,
                        w1g=jnp.concatenate(ew1 + [wg], axis=1),
                        b1g=jnp.concatenate(eb1 + [bg], axis=1),
                        w2s=jnp.concatenate(ew2, axis=0),
                        b2s=jnp.concatenate(eb2, axis=0))

    # decoder heads (fused + lane-padded): order poi, time, lat, lon, week, cat, categroy
    head_dims = (num_poi, 1, 1, 1, 7, num_cat, 11)
    ws, bs = [], []
    for i, d in enumerate(head_dims):
        if i == 0:  # init_weights(): poi weight ~ U(-0.1, 0.1), poi bias = 0
            w = uniform((E, d), 0.1)
            b = jnp.zeros((1, d), jnp.float32)
        else:
            w, b = linear(E, d)
        ws.append(w); bs.append(b)
    d_total = sum(head_dims)
    d_pad = max(128, ((d_total + 127) // 128) * 128)
    w_cat = jnp.concatenate(ws, axis=1)
    b_cat = jnp.concatenate(bs, axis=1)
    decoders = dict(w=jnp.pad(w_cat, ((0, 0), (0, d_pad - d_total))),
                    b=jnp.pad(b_cat, ((0, 0), (0, d_pad - d_total))),
                    dims=head_dims, d_total=d_total, d_pad=d_pad)

    return dict(pe=pe, layers=layers, gated_expert=gated_expert,
                self_attn=mha_params(), decoders=decoders)


# ---------------------------------------------------------------------------
# pure-JAX reference (same parameter layout, same math)
# ---------------------------------------------------------------------------
def _reference_forward(src, src_mask, params, *, nhead):
    S, B, E = src.shape
    hd = E // nhead
    x = jnp.transpose(src, (1, 0, 2)) * math.sqrt(E) + params['pe'][:S][None]

    def mha(x, mask, p):
        qkv = x @ p['wqkv'] + p['bqkv']
        heads = []
        for h in range(nhead):
            qh = qkv[..., h * hd:(h + 1) * hd]
            kh = qkv[..., E + h * hd:E + (h + 1) * hd]
            vh = qkv[..., 2 * E + h * hd:2 * E + (h + 1) * hd]
            s = jnp.einsum('bqd,bkd->bqk', qh, kh) / math.sqrt(hd)
            if mask is not None:
                s = s + mask
            w = jax.nn.softmax(s, axis=-1)
            heads.append(jnp.einsum('bqk,bkd->bqd', w, vh))
        return jnp.concatenate(heads, axis=-1) @ p['wo'] + p['bo']

    def ln(z, g, b):
        mean = jnp.mean(z, axis=-1, keepdims=True)
        var = jnp.mean((z - mean) ** 2, axis=-1, keepdims=True)
        return (z - mean) / jnp.sqrt(var + LN_EPS) * g + b

    for lp in params['layers']:
        x = ln(x + mha(x, src_mask, lp['attn']), lp['ln1']['gamma'], lp['ln1']['beta'])
        ff = lp['ffn']
        h = jax.nn.relu(x @ ff['w1'] + ff['b1'])
        x = ln(x + h @ ff['w2'] + ff['b2'], lp['ln2']['gamma'], lp['ln2']['beta'])

    ge = params['gated_expert']
    NE = ge['num_experts']
    hg = x @ ge['w1g'] + ge['b1g']
    gate = jax.nn.softmax(hg[..., NE * E:], axis=-1)
    h = jax.nn.relu(hg[..., :NE * E])
    out = jnp.zeros_like(x)
    for e in range(NE):
        y_e = h[..., e * E:(e + 1) * E] @ ge['w2s'][e * E:(e + 1) * E] + ge['b2s'][e:e + 1]
        out = out + gate[..., e:e + 1] * y_e
    x = out

    x = mha(x, None, params['self_attn'])

    dec = params['decoders']
    y = x @ dec['w'][:, :dec['d_total']] + dec['b'][:, :dec['d_total']]
    y = jnp.transpose(y, (1, 0, 2))
    res, off = [], 0
    for d in dec['dims']:
        res.append(y[..., off:off + d])
        off += d
    out_poi, out_time, out_lat, out_lon, out_week, out_cat, out_categroy = res
    return out_poi, out_time, out_lat, out_lon, out_cat, out_categroy, out_week


def causal_mask(S):
    i = jnp.arange(S)[:, None]
    j = jnp.arange(S)[None, :]
    return jnp.where(j <= i, 0.0, NEG_INF).astype(jnp.float32)


# ---------------------------------------------------------------------------
if __name__ == "__main__":
    # Small shapes consistent with the module.
    S, B = 8, 2
    embed_size, nhead, nhid, nlayers = 32, 4, 64, 2
    num_poi, num_cat = 16, 10

    root = jax.random.PRNGKey(0)
    k_param, k_src = jax.random.split(root)
    params = init_params(k_param, num_poi=num_poi, num_cat=num_cat,
                         embed_size=embed_size, nhead=nhead,
                         nhid=nhid, nlayers=nlayers)

    src = jax.random.normal(k_src, (S, B, embed_size), dtype=jnp.float32)
    src_mask = causal_mask(S)

    outs = enhanced_transformer_forward(src, src_mask, params, nhead=nhead)
    outs = jax.block_until_ready(outs)

    refs = _reference_forward(src, src_mask, params, nhead=nhead)

    names = ("poi", "time", "lat", "lon", "cat", "categroy", "week")
    expected_dims = (num_poi, 1, 1, 1, num_cat, 11, 7)
    for name, o, r, d in zip(names, outs, refs, expected_dims):
        assert o.shape == (S, B, d), (name, o.shape)
        assert jnp.allclose(o, r, atol=1e-2, rtol=1e-2), f"mismatch in out_{name}"

    print("KERNEL_OK")
</pallas_src>

<mosaic_0001>
module attributes {stable_mosaic.version = 11 : i64} {
  func.func @kernel(%arg0: memref<2x8x32xf32, #tpu.memory_space<vmem>>, %arg1: memref<8x32xf32, #tpu.memory_space<vmem>>, %arg2: memref<8x8xf32, #tpu.memory_space<vmem>>, %arg3: memref<32x96xf32, #tpu.memory_space<vmem>>, %arg4: memref<1x96xf32, #tpu.memory_space<vmem>>, %arg5: memref<32x32xf32, #tpu.memory_space<vmem>>, %arg6: memref<1x32xf32, #tpu.memory_space<vmem>>, %arg7: memref<1x32xf32, #tpu.memory_space<vmem>>, %arg8: memref<1x32xf32, #tpu.memory_space<vmem>>, %arg9: memref<32x64xf32, #tpu.memory_space<vmem>>, %arg10: memref<1x64xf32, #tpu.memory_space<vmem>>, %arg11: memref<64x32xf32, #tpu.memory_space<vmem>>, %arg12: memref<1x32xf32, #tpu.memory_space<vmem>>, %arg13: memref<1x32xf32, #tpu.memory_space<vmem>>, %arg14: memref<1x32xf32, #tpu.memory_space<vmem>>, %arg15: memref<32x96xf32, #tpu.memory_space<vmem>>, %arg16: memref<1x96xf32, #tpu.memory_space<vmem>>, %arg17: memref<32x32xf32, #tpu.memory_space<vmem>>, %arg18: memref<1x32xf32, #tpu.memory_space<vmem>>, %arg19: memref<1x32xf32, #tpu.memory_space<vmem>>, %arg20: memref<1x32xf32, #tpu.memory_space<vmem>>, %arg21: memref<32x64xf32, #tpu.memory_space<vmem>>, %arg22: memref<1x64xf32, #tpu.memory_space<vmem>>, %arg23: memref<64x32xf32, #tpu.memory_space<vmem>>, %arg24: memref<1x32xf32, #tpu.memory_space<vmem>>, %arg25: memref<1x32xf32, #tpu.memory_space<vmem>>, %arg26: memref<1x32xf32, #tpu.memory_space<vmem>>, %arg27: memref<32x66xf32, #tpu.memory_space<vmem>>, %arg28: memref<1x66xf32, #tpu.memory_space<vmem>>, %arg29: memref<64x32xf32, #tpu.memory_space<vmem>>, %arg30: memref<2x32xf32, #tpu.memory_space<vmem>>, %arg31: memref<32x96xf32, #tpu.memory_space<vmem>>, %arg32: memref<1x96xf32, #tpu.memory_space<vmem>>, %arg33: memref<32x32xf32, #tpu.memory_space<vmem>>, %arg34: memref<1x32xf32, #tpu.memory_space<vmem>>, %arg35: memref<32x128xf32, #tpu.memory_space<vmem>>, %arg36: memref<1x128xf32, #tpu.memory_space<vmem>>, %arg37: memref<16x128xf32, #tpu.memory_space<vmem>>) attributes {dimension_semantics = [], scalar_prefetch = 0 : i64, scratch_operands = 0 : i64, tpu.core_type = #tpu.core_type<tc>} {
    %c0 = arith.constant 0 : index
    %c0_0 = arith.constant 0 : index
    %0 = vector.load %arg2[%c0, %c0_0] : memref<8x8xf32, #tpu.memory_space<vmem>>, vector<8x8xf32>
    %c0_1 = arith.constant 0 : index
    %c0_2 = arith.constant 0 : index
    %c0_3 = arith.constant 0 : index
    %1 = vector.load %arg0[%c0_1, %c0_2, %c0_3] : memref<2x8x32xf32, #tpu.memory_space<vmem>>, vector<2x8x32xf32>
    %cst = arith.constant 5.65685415 : f32
    %2 = vector.broadcast %cst : f32 to vector<2x8x32xf32>
    %3 = arith.mulf %1, %2 : vector<2x8x32xf32>
    %c0_4 = arith.constant 0 : index
    %c0_5 = arith.constant 0 : index
    %4 = vector.load %arg1[%c0_4, %c0_5] : memref<8x32xf32, #tpu.memory_space<vmem>>, vector<8x32xf32>
    %5 = vector.shape_cast %4 : vector<8x32xf32> to vector<1x8x32xf32>
    %6 = vector.broadcast %5 : vector<1x8x32xf32> to vector<2x8x32xf32>
    %7 = arith.addf %3, %6 : vector<2x8x32xf32>
    %8 = vector.shape_cast %7 : vector<2x8x32xf32> to vector<16x32xf32>
    %c0_6 = arith.constant 0 : index
    %c0_7 = arith.constant 0 : index
    %9 = vector.load %arg3[%c0_6, %c0_7] : memref<32x96xf32, #tpu.memory_space<vmem>>, vector<32x96xf32>
    %c0_8 = arith.constant 0 : index
    %c0_9 = arith.constant 0 : index
    %10 = vector.load %arg4[%c0_8, %c0_9] : memref<1x96xf32, #tpu.memory_space<vmem>>, vector<1x96xf32>
    %c0_10 = arith.constant 0 : index
    %c0_11 = arith.constant 0 : index
    %11 = vector.load %arg5[%c0_10, %c0_11] : memref<32x32xf32, #tpu.memory_space<vmem>>, vector<32x32xf32>
    %c0_12 = arith.constant 0 : index
    %c0_13 = arith.constant 0 : index
    %12 = vector.load %arg6[%c0_12, %c0_13] : memref<1x32xf32, #tpu.memory_space<vmem>>, vector<1x32xf32>
    %cst_14 = arith.constant dense<0.000000e+00> : vector<16x96xf32>
    %13 = tpu.matmul %8, %9, %cst_14 {dimension_numbers = #tpu.dot_dimension_numbers<[1], [0], [0], [1], [0, 0, 1, 1], [], []>} : vector<16x32xf32>, vector<32x96xf32>, vector<16x96xf32> -> vector<16x96xf32>
    %14 = vector.broadcast %10 : vector<1x96xf32> to vector<16x96xf32>
    %15 = arith.addf %13, %14 : vector<16x96xf32>
    %16 = vector.shape_cast %15 : vector<16x96xf32> to vector<2x8x96xf32>
    %17 = vector.extract_strided_slice %16 {offsets = [0, 0, 0], sizes = [2, 8, 8], strides = [1, 1, 1]} : vector<2x8x96xf32> to vector<2x8x8xf32>
    %18 = vector.extract_strided_slice %16 {offsets = [0, 0, 32], sizes = [2, 8, 8], strides = [1, 1, 1]} : vector<2x8x96xf32> to vector<2x8x8xf32>
    %19 = vector.extract_strided_slice %16 {offsets = [0, 0, 64], sizes = [2, 8, 8], strides = [1, 1, 1]} : vector<2x8x96xf32> to vector<2x8x8xf32>
    "tpu.trace_start"() <{level = 10 : i32, message = "bqd,bkd->bqk"}> : () -> ()
    %cst_15 = arith.constant dense<0.000000e+00> : vector<2x8x8xf32>
    %20 = tpu.matmul %17, %18, %cst_15 {dimension_numbers = #tpu.dot_dimension_numbers<[2], [2], [1], [1], [0, 0, 0, 1, 1, 1], [0], [0]>} : vector<2x8x8xf32>, vector<2x8x8xf32>, vector<2x8x8xf32> -> vector<2x8x8xf32>
    "tpu.trace_stop"() : () -> ()
    %cst_16 = arith.constant 0.353553385 : f32
    %21 = vector.broadcast %cst_16 : f32 to vector<2x8x8xf32>
    %22 = arith.mulf %20, %21 : vector<2x8x8xf32>
    %23 = vector.shape_cast %0 : vector<8x8xf32> to vector<1x8x8xf32>
    %24 = vector.broadcast %23 : vector<1x8x8xf32> to vector<2x8x8xf32>
    %25 = arith.addf %22, %24 : vector<2x8x8xf32>
    %cst_17 = arith.constant dense<0xFF800000> : vector<2x8xf32>
    %26 = vector.multi_reduction <maximumf>, %25, %cst_17 [2] : vector<2x8x8xf32> to vector<2x8xf32>
    %27 = vector.shape_cast %26 : vector<2x8xf32> to vector<2x8x1xf32>
    %28 = vector.broadcast %27 : vector<2x8x1xf32> to vector<2x8x8xf32>
    %29 = arith.subf %25, %28 : vector<2x8x8xf32>
    %30 = math.exp %29 : vector<2x8x8xf32>
    %cst_18 = arith.constant dense<0.000000e+00> : vector<2x8xf32>
    %31 = vector.multi_reduction <add>, %30, %cst_18 [2] : vector<2x8x8xf32> to vector<2x8xf32>
    %32 = vector.shape_cast %31 : vector<2x8xf32> to vector<2x8x1xf32>
    %33 = vector.broadcast %32 : vector<2x8x1xf32> to vector<2x8x8xf32>
    %34 = arith.divf %30, %33 : vector<2x8x8xf32>
    "tpu.trace_start"() <{level = 10 : i32, message = "bqk,bkd->bqd"}> : () -> ()
    %cst_19 = arith.constant dense<0.000000e+00> : vector<2x8x8xf32>
    %35 = tpu.matmul %34, %19, %cst_19 {dimension_numbers = #tpu.dot_dimension_numbers<[2], [1], [1], [2], [0, 0, 0, 1, 1, 2], [0], [0]>} : vector<2x8x8xf32>, vector<2x8x8xf32>, vector<2x8x8xf32> -> vector<2x8x8xf32>
    "tpu.trace_stop"() : () -> ()
    %36 = vector.extract_strided_slice %16 {offsets = [0, 0, 8], sizes = [2, 8, 8], strides = [1, 1, 1]} : vector<2x8x96xf32> to vector<2x8x8xf32>
    %37 = vector.extract_strided_slice %16 {offsets = [0, 0, 40], sizes = [2, 8, 8], strides = [1, 1, 1]} : vector<2x8x96xf32> to vector<2x8x8xf32>
    %38 = vector.extract_strided_slice %16 {offsets = [0, 0, 72], sizes = [2, 8, 8], strides = [1, 1, 1]} : vector<2x8x96xf32> to vector<2x8x8xf32>
    "tpu.trace_start"() <{level = 10 : i32, message = "bqd,bkd->bqk"}> : () -> ()
    %cst_20 = arith.constant dense<0.000000e+00> : vector<2x8x8xf32>
    %39 = tpu.matmul %36, %37, %cst_20 {dimension_numbers = #tpu.dot_dimension_numbers<[2], [2], [1], [1], [0, 0, 0, 1, 1, 1], [0], [0]>} : vector<2x8x8xf32>, vector<2x8x8xf32>, vector<2x8x8xf32> -> vector<2x8x8xf32>
    "tpu.trace_stop"() : () -> ()
    %cst_21 = arith.constant 0.353553385 : f32
    %40 = vector.broadcast %cst_21 : f32 to vector<2x8x8xf32>
    %41 = arith.mulf %39, %40 : vector<2x8x8xf32>
    %42 = vector.shape_cast %0 : vector<8x8xf32> to vector<1x8x8xf32>
    %43 = vector.broadcast %42 : vector<1x8x8xf32> to vector<2x8x8xf32>
    %44 = arith.addf %41, %43 : vector<2x8x8xf32>
    %cst_22 = arith.constant dense<0xFF800000> : vector<2x8xf32>
    %45 = vector.multi_reduction <maximumf>, %44, %cst_22 [2] : vector<2x8x8xf32> to vector<2x8xf32>
    %46 = vector.shape_cast %45 : vector<2x8xf32> to vector<2x8x1xf32>
    %47 = vector.broadcast %46 : vector<2x8x1xf32> to vector<2x8x8xf32>
    %48 = arith.subf %44, %47 : vector<2x8x8xf32>
    %49 = math.exp %48 : vector<2x8x8xf32>
    %cst_23 = arith.constant dense<0.000000e+00> : vector<2x8xf32>
    %50 = vector.multi_reduction <add>, %49, %cst_23 [2] : vector<2x8x8xf32> to vector<2x8xf32>
    %51 = vector.shape_cast %50 : vector<2x8xf32> to vector<2x8x1xf32>
    %52 = vector.broadcast %51 : vector<2x8x1xf32> to vector<2x8x8xf32>
    %53 = arith.divf %49, %52 : vector<2x8x8xf32>
    "tpu.trace_start"() <{level = 10 : i32, message = "bqk,bkd->bqd"}> : () -> ()
    %cst_24 = arith.constant dense<0.000000e+00> : vector<2x8x8xf32>
    %54 = tpu.matmul %53, %38, %cst_24 {dimension_numbers = #tpu.dot_dimension_numbers<[2], [1], [1], [2], [0, 0, 0, 1, 1, 2], [0], [0]>} : vector<2x8x8xf32>, vector<2x8x8xf32>, vector<2x8x8xf32> -> vector<2x8x8xf32>
    "tpu.trace_stop"() : () -> ()
    %55 = vector.extract_strided_slice %16 {offsets = [0, 0, 16], sizes = [2, 8, 8], strides = [1, 1, 1]} : vector<2x8x96xf32> to vector<2x8x8xf32>
    %56 = vector.extract_strided_slice %16 {offsets = [0, 0, 48], sizes = [2, 8, 8], strides = [1, 1, 1]} : vector<2x8x96xf32> to vector<2x8x8xf32>
    %57 = vector.extract_strided_slice %16 {offsets = [0, 0, 80], sizes = [2, 8, 8], strides = [1, 1, 1]} : vector<2x8x96xf32> to vector<2x8x8xf32>
    "tpu.trace_start"() <{level = 10 : i32, message = "bqd,bkd->bqk"}> : () -> ()
    %cst_25 = arith.constant dense<0.000000e+00> : vector<2x8x8xf32>
    %58 = tpu.matmul %55, %56, %cst_25 {dimension_numbers = #tpu.dot_dimension_numbers<[2], [2], [1], [1], [0, 0, 0, 1, 1, 1], [0], [0]>} : vector<2x8x8xf32>, vector<2x8x8xf32>, vector<2x8x8xf32> -> vector<2x8x8xf32>
    "tpu.trace_stop"() : () -> ()
    %cst_26 = arith.constant 0.353553385 : f32
    %59 = vector.broadcast %cst_26 : f32 to vector<2x8x8xf32>
    %60 = arith.mulf %58, %59 : vector<2x8x8xf32>
    %61 = vector.shape_cast %0 : vector<8x8xf32> to vector<1x8x8xf32>
    %62 = vector.broadcast %61 : vector<1x8x8xf32> to vector<2x8x8xf32>
    %63 = arith.addf %60, %62 : vector<2x8x8xf32>
    %cst_27 = arith.constant dense<0xFF800000> : vector<2x8xf32>
    %64 = vector.multi_reduction <maximumf>, %63, %cst_27 [2] : vector<2x8x8xf32> to vector<2x8xf32>
    %65 = vector.shape_cast %64 : vector<2x8xf32> to vector<2x8x1xf32>
    %66 = vector.broadcast %65 : vector<2x8x1xf32> to vector<2x8x8xf32>
    %67 = arith.subf %63, %66 : vector<2x8x8xf32>
    %68 = math.exp %67 : vector<2x8x8xf32>
    %cst_28 = arith.constant dense<0.000000e+00> : vector<2x8xf32>
    %69 = vector.multi_reduction <add>, %68, %cst_28 [2] : vector<2x8x8xf32> to vector<2x8xf32>
    %70 = vector.shape_cast %69 : vector<2x8xf32> to vector<2x8x1xf32>
    %71 = vector.broadcast %70 : vector<2x8x1xf32> to vector<2x8x8xf32>
    %72 = arith.divf %68, %71 : vector<2x8x8xf32>
    "tpu.trace_start"() <{level = 10 : i32, message = "bqk,bkd->bqd"}> : () -> ()
    %cst_29 = arith.constant dense<0.000000e+00> : vector<2x8x8xf32>
    %73 = tpu.matmul %72, %57, %cst_29 {dimension_numbers = #tpu.dot_dimension_numbers<[2], [1], [1], [2], [0, 0, 0, 1, 1, 2], [0], [0]>} : vector<2x8x8xf32>, vector<2x8x8xf32>, vector<2x8x8xf32> -> vector<2x8x8xf32>
    "tpu.trace_stop"() : () -> ()
    %74 = vector.extract_strided_slice %16 {offsets = [0, 0, 24], sizes = [2, 8, 8], strides = [1, 1, 1]} : vector<2x8x96xf32> to vector<2x8x8xf32>
    %75 = vector.extract_strided_slice %16 {offsets = [0, 0, 56], sizes = [2, 8, 8], strides = [1, 1, 1]} : vector<2x8x96xf32> to vector<2x8x8xf32>
    %76 = vector.extract_strided_slice %16 {offsets = [0, 0, 88], sizes = [2, 8, 8], strides = [1, 1, 1]} : vector<2x8x96xf32> to vector<2x8x8xf32>
    "tpu.trace_start"() <{level = 10 : i32, message = "bqd,bkd->bqk"}> : () -> ()
    %cst_30 = arith.constant dense<0.000000e+00> : vector<2x8x8xf32>
    %77 = tpu.matmul %74, %75, %cst_30 {dimension_numbers = #tpu.dot_dimension_numbers<[2], [2], [1], [1], [0, 0, 0, 1, 1, 1], [0], [0]>} : vector<2x8x8xf32>, vector<2x8x8xf32>, vector<2x8x8xf32> -> vector<2x8x8xf32>
    "tpu.trace_stop"() : () -> ()
    %cst_31 = arith.constant 0.353553385 : f32
    %78 = vector.broadcast %cst_31 : f32 to vector<2x8x8xf32>
    %79 = arith.mulf %77, %78 : vector<2x8x8xf32>
    %80 = vector.shape_cast %0 : vector<8x8xf32> to vector<1x8x8xf32>
    %81 = vector.broadcast %80 : vector<1x8x8xf32> to vector<2x8x8xf32>
    %82 = arith.addf %79, %81 : vector<2x8x8xf32>
    %cst_32 = arith.constant dense<0xFF800000> : vector<2x8xf32>
    %83 = vector.multi_reduction <maximumf>, %82, %cst_32 [2] : vector<2x8x8xf32> to vector<2x8xf32>
    %84 = vector.shape_cast %83 : vector<2x8xf32> to vector<2x8x1xf32>
    %85 = vector.broadcast %84 : vector<2x8x1xf32> to vector<2x8x8xf32>
    %86 = arith.subf %82, %85 : vector<2x8x8xf32>
    %87 = math.exp %86 : vector<2x8x8xf32>
    %cst_33 = arith.constant dense<0.000000e+00> : vector<2x8xf32>
    %88 = vector.multi_reduction <add>, %87, %cst_33 [2] : vector<2x8x8xf32> to vector<2x8xf32>
    %89 = vector.shape_cast %88 : vector<2x8xf32> to vector<2x8x1xf32>
    %90 = vector.broadcast %89 : vector<2x8x1xf32> to vector<2x8x8xf32>
    %91 = arith.divf %87, %90 : vector<2x8x8xf32>
    "tpu.trace_start"() <{level = 10 : i32, message = "bqk,bkd->bqd"}> : () -> ()
    %cst_34 = arith.constant dense<0.000000e+00> : vector<2x8x8xf32>
    %92 = tpu.matmul %91, %76, %cst_34 {dimension_numbers = #tpu.dot_dimension_numbers<[2], [1], [1], [2], [0, 0, 0, 1, 1, 2], [0], [0]>} : vector<2x8x8xf32>, vector<2x8x8xf32>, vector<2x8x8xf32> -> vector<2x8x8xf32>
    "tpu.trace_stop"() : () -> ()
    %93 = tpu.concatenate %35, %54, %73, %92 in 2 : vector<2x8x8xf32>, vector<2x8x8xf32>, vector<2x8x8xf32>, vector<2x8x8xf32> -> vector<2x8x32xf32>
    %94 = vector.shape_cast %93 : vector<2x8x32xf32> to vector<16x32xf32>
    %cst_35 = arith.constant dense<0.000000e+00> : vector<16x32xf32>
    %95 = tpu.matmul %94, %11, %cst_35 {dimension_numbers = #tpu.dot_dimension_numbers<[1], [0], [0], [1], [0, 0, 1, 1], [], []>} : vector<16x32xf32>, vector<32x32xf32>, vector<16x32xf32> -> vector<16x32xf32>
    %96 = vector.broadcast %12 : vector<1x32xf32> to vector<16x32xf32>
    %97 = arith.addf %95, %96 : vector<16x32xf32>
    %98 = arith.addf %8, %97 : vector<16x32xf32>
    %c0_36 = arith.constant 0 : index
    %c0_37 = arith.constant 0 : index
    %99 = vector.load %arg7[%c0_36, %c0_37] : memref<1x32xf32, #tpu.memory_space<vmem>>, vector<1x32xf32>
    %c0_38 = arith.constant 0 : index
    %c0_39 = arith.constant 0 : index
    %100 = vector.load %arg8[%c0_38, %c0_39] : memref<1x32xf32, #tpu.memory_space<vmem>>, vector<1x32xf32>
    %cst_40 = arith.constant dense<0.000000e+00> : vector<16xf32>
    %101 = vector.multi_reduction <add>, %98, %cst_40 [1] : vector<16x32xf32> to vector<16xf32>
    %102 = vector.shape_cast %101 : vector<16xf32> to vector<16x1xf32>
    %cst_41 = arith.constant 3.200000e+01 : f32
    %103 = vector.broadcast %cst_41 : f32 to vector<16x1xf32>
    %104 = arith.divf %102, %103 : vector<16x1xf32>
    %105 = vector.broadcast %104 : vector<16x1xf32> to vector<16x32xf32>
    %106 = arith.subf %98, %105 : vector<16x32xf32>
    %107 = arith.mulf %106, %106 : vector<16x32xf32>
    %cst_42 = arith.constant dense<0.000000e+00> : vector<16xf32>
    %108 = vector.multi_reduction <add>, %107, %cst_42 [1] : vector<16x32xf32> to vector<16xf32>
    %109 = vector.shape_cast %108 : vector<16xf32> to vector<16x1xf32>
    %cst_43 = arith.constant 3.200000e+01 : f32
    %110 = vector.broadcast %cst_43 : f32 to vector<16x1xf32>
    %111 = arith.divf %109, %110 : vector<16x1xf32>
    %cst_44 = arith.constant 9.99999974E-6 : f32
    %112 = vector.broadcast %cst_44 : f32 to vector<16x1xf32>
    %113 = arith.addf %111, %112 : vector<16x1xf32>
    %114 = math.rsqrt %113 : vector<16x1xf32>
    %115 = vector.broadcast %114 : vector<16x1xf32> to vector<16x32xf32>
    %116 = arith.mulf %106, %115 : vector<16x32xf32>
    %117 = vector.broadcast %99 : vector<1x32xf32> to vector<16x32xf32>
    %118 = arith.mulf %116, %117 : vector<16x32xf32>
    %119 = vector.broadcast %100 : vector<1x32xf32> to vector<16x32xf32>
    %120 = arith.addf %118, %119 : vector<16x32xf32>
    %c0_45 = arith.constant 0 : index
    %c0_46 = arith.constant 0 : index
    %121 = vector.load %arg9[%c0_45, %c0_46] : memref<32x64xf32, #tpu.memory_space<vmem>>, vector<32x64xf32>
    %cst_47 = arith.constant dense<0.000000e+00> : vector<16x64xf32>
    %122 = tpu.matmul %120, %121, %cst_47 {dimension_numbers = #tpu.dot_dimension_numbers<[1], [0], [0], [1], [0, 0, 1, 1], [], []>} : vector<16x32xf32>, vector<32x64xf32>, vector<16x64xf32> -> vector<16x64xf32>
    %c0_48 = arith.constant 0 : index
    %c0_49 = arith.constant 0 : index
    %123 = vector.load %arg10[%c0_48, %c0_49] : memref<1x64xf32, #tpu.memory_space<vmem>>, vector<1x64xf32>
    %124 = vector.broadcast %123 : vector<1x64xf32> to vector<16x64xf32>
    %125 = arith.addf %122, %124 : vector<16x64xf32>
    %cst_50 = arith.constant 0.000000e+00 : f32
    %126 = vector.broadcast %cst_50 : f32 to vector<16x64xf32>
    %127 = arith.maximumf %125, %126 : vector<16x64xf32>
    %c0_51 = arith.constant 0 : index
    %c0_52 = arith.constant 0 : index
    %128 = vector.load %arg11[%c0_51, %c0_52] : memref<64x32xf32, #tpu.memory_space<vmem>>, vector<64x32xf32>
    %cst_53 = arith.constant dense<0.000000e+00> : vector<16x32xf32>
    %129 = tpu.matmul %127, %128, %cst_53 {dimension_numbers = #tpu.dot_dimension_numbers<[1], [0], [0], [1], [0, 0, 1, 1], [], []>} : vector<16x64xf32>, vector<64x32xf32>, vector<16x32xf32> -> vector<16x32xf32>
    %c0_54 = arith.constant 0 : index
    %c0_55 = arith.constant 0 : index
    %130 = vector.load %arg12[%c0_54, %c0_55] : memref<1x32xf32, #tpu.memory_space<vmem>>, vector<1x32xf32>
    %131 = vector.broadcast %130 : vector<1x32xf32> to vector<16x32xf32>
    %132 = arith.addf %129, %131 : vector<16x32xf32>
    %133 = arith.addf %120, %132 : vector<16x32xf32>
    %c0_56 = arith.constant 0 : index
    %c0_57 = arith.constant 0 : index
    %134 = vector.load %arg13[%c0_56, %c0_57] : memref<1x32xf32, #tpu.memory_space<vmem>>, vector<1x32xf32>
    %c0_58 = arith.constant 0 : index
    %c0_59 = arith.constant 0 : index
    %135 = vector.load %arg14[%c0_58, %c0_59] : memref<1x32xf32, #tpu.memory_space<vmem>>, vector<1x32xf32>
    %cst_60 = arith.constant dense<0.000000e+00> : vector<16xf32>
    %136 = vector.multi_reduction <add>, %133, %cst_60 [1] : vector<16x32xf32> to vector<16xf32>
    %137 = vector.shape_cast %136 : vector<16xf32> to vector<16x1xf32>
    %cst_61 = arith.constant 3.200000e+01 : f32
    %138 = vector.broadcast %cst_61 : f32 to vector<16x1xf32>
    %139 = arith.divf %137, %138 : vector<16x1xf32>
    %140 = vector.broadcast %139 : vector<16x1xf32> to vector<16x32xf32>
    %141 = arith.subf %133, %140 : vector<16x32xf32>
    %142 = arith.mulf %141, %141 : vector<16x32xf32>
    %cst_62 = arith.constant dense<0.000000e+00> : vector<16xf32>
    %143 = vector.multi_reduction <add>, %142, %cst_62 [1] : vector<16x32xf32> to vector<16xf32>
    %144 = vector.shape_cast %143 : vector<16xf32> to vector<16x1xf32>
    %cst_63 = arith.constant 3.200000e+01 : f32
    %145 = vector.broadcast %cst_63 : f32 to vector<16x1xf32>
    %146 = arith.divf %144, %145 : vector<16x1xf32>
    %cst_64 = arith.constant 9.99999974E-6 : f32
    %147 = vector.broadcast %cst_64 : f32 to vector<16x1xf32>
    %148 = arith.addf %146, %147 : vector<16x1xf32>
    %149 = math.rsqrt %148 : vector<16x1xf32>
    %150 = vector.broadcast %149 : vector<16x1xf32> to vector<16x32xf32>
    %151 = arith.mulf %141, %150 : vector<16x32xf32>
    %152 = vector.broadcast %134 : vector<1x32xf32> to vector<16x32xf32>
    %153 = arith.mulf %151, %152 : vector<16x32xf32>
    %154 = vector.broadcast %135 : vector<1x32xf32> to vector<16x32xf32>
    %155 = arith.addf %153, %154 : vector<16x32xf32>
    %c0_65 = arith.constant 0 : index
    %c0_66 = arith.constant 0 : index
    %156 = vector.load %arg15[%c0_65, %c0_66] : memref<32x96xf32, #tpu.memory_space<vmem>>, vector<32x96xf32>
    %c0_67 = arith.constant 0 : index
    %c0_68 = arith.constant 0 : index
    %157 = vector.load %arg16[%c0_67, %c0_68] : memref<1x96xf32, #tpu.memory_space<vmem>>, vector<1x96xf32>
    %c0_69 = arith.constant 0 : index
    %c0_70 = arith.constant 0 : index
    %158 = vector.load %arg17[%c0_69, %c0_70] : memref<32x32xf32, #tpu.memory_space<vmem>>, vector<32x32xf32>
    %c0_71 = arith.constant 0 : index
    %c0_72 = arith.constant 0 : index
    %159 = vector.load %arg18[%c0_71, %c0_72] : memref<1x32xf32, #tpu.memory_space<vmem>>, vector<1x32xf32>
    %cst_73 = arith.constant dense<0.000000e+00> : vector<16x96xf32>
    %160 = tpu.matmul %155, %156, %cst_73 {dimension_numbers = #tpu.dot_dimension_numbers<[1], [0], [0], [1], [0, 0, 1, 1], [], []>} : vector<16x32xf32>, vector<32x96xf32>, vector<16x96xf32> -> vector<16x96xf32>
    %161 = vector.broadcast %157 : vector<1x96xf32> to vector<16x96xf32>
    %162 = arith.addf %160, %161 : vector<16x96xf32>
    %163 = vector.shape_cast %162 : vector<16x96xf32> to vector<2x8x96xf32>
    %164 = vector.extract_strided_slice %163 {offsets = [0, 0, 0], sizes = [2, 8, 8], strides = [1, 1, 1]} : vector<2x8x96xf32> to vector<2x8x8xf32>
    %165 = vector.extract_strided_slice %163 {offsets = [0, 0, 32], sizes = [2, 8, 8], strides = [1, 1, 1]} : vector<2x8x96xf32> to vector<2x8x8xf32>
    %166 = vector.extract_strided_slice %163 {offsets = [0, 0, 64], sizes = [2, 8, 8], strides = [1, 1, 1]} : vector<2x8x96xf32> to vector<2x8x8xf32>
    "tpu.trace_start"() <{level = 10 : i32, message = "bqd,bkd->bqk"}> : () -> ()
    %cst_74 = arith.constant dense<0.000000e+00> : vector<2x8x8xf32>
    %167 = tpu.matmul %164, %165, %cst_74 {dimension_numbers = #tpu.dot_dimension_numbers<[2], [2], [1], [1], [0, 0, 0, 1, 1, 1], [0], [0]>} : vector<2x8x8xf32>, vector<2x8x8xf32>, vector<2x8x8xf32> -> vector<2x8x8xf32>
    "tpu.trace_stop"() : () -> ()
    %cst_75 = arith.constant 0.353553385 : f32
    %168 = vector.broadcast %cst_75 : f32 to vector<2x8x8xf32>
    %169 = arith.mulf %167, %168 : vector<2x8x8xf32>
    %170 = vector.shape_cast %0 : vector<8x8xf32> to vector<1x8x8xf32>
    %171 = vector.broadcast %170 : vector<1x8x8xf32> to vector<2x8x8xf32>
    %172 = arith.addf %169, %171 : vector<2x8x8xf32>
    %cst_76 = arith.constant dense<0xFF800000> : vector<2x8xf32>
    %173 = vector.multi_reduction <maximumf>, %172, %cst_76 [2] : vector<2x8x8xf32> to vector<2x8xf32>
    %174 = vector.shape_cast %173 : vector<2x8xf32> to vector<2x8x1xf32>
    %175 = vector.broadcast %174 : vector<2x8x1xf32> to vector<2x8x8xf32>
    %176 = arith.subf %172, %175 : vector<2x8x8xf32>
    %177 = math.exp %176 : vector<2x8x8xf32>
    %cst_77 = arith.constant dense<0.000000e+00> : vector<2x8xf32>
    %178 = vector.multi_reduction <add>, %177, %cst_77 [2] : vector<2x8x8xf32> to vector<2x8xf32>
    %179 = vector.shape_cast %178 : vector<2x8xf32> to vector<2x8x1xf32>
    %180 = vector.broadcast %179 : vector<2x8x1xf32> to vector<2x8x8xf32>
    %181 = arith.divf %177, %180 : vector<2x8x8xf32>
    "tpu.trace_start"() <{level = 10 : i32, message = "bqk,bkd->bqd"}> : () -> ()
    %cst_78 = arith.constant dense<0.000000e+00> : vector<2x8x8xf32>
    %182 = tpu.matmul %181, %166, %cst_78 {dimension_numbers = #tpu.dot_dimension_numbers<[2], [1], [1], [2], [0, 0, 0, 1, 1, 2], [0], [0]>} : vector<2x8x8xf32>, vector<2x8x8xf32>, vector<2x8x8xf32> -> vector<2x8x8xf32>
    "tpu.trace_stop"() : () -> ()
    %183 = vector.extract_strided_slice %163 {offsets = [0, 0, 8], sizes = [2, 8, 8], strides = [1, 1, 1]} : vector<2x8x96xf32> to vector<2x8x8xf32>
    %184 = vector.extract_strided_slice %163 {offsets = [0, 0, 40], sizes = [2, 8, 8], strides = [1, 1, 1]} : vector<2x8x96xf32> to vector<2x8x8xf32>
    %185 = vector.extract_strided_slice %163 {offsets = [0, 0, 72], sizes = [2, 8, 8], strides = [1, 1, 1]} : vector<2x8x96xf32> to vector<2x8x8xf32>
    "tpu.trace_start"() <{level = 10 : i32, message = "bqd,bkd->bqk"}> : () -> ()
    %cst_79 = arith.constant dense<0.000000e+00> : vector<2x8x8xf32>
    %186 = tpu.matmul %183, %184, %cst_79 {dimension_numbers = #tpu.dot_dimension_numbers<[2], [2], [1], [1], [0, 0, 0, 1, 1, 1], [0], [0]>} : vector<2x8x8xf32>, vector<2x8x8xf32>, vector<2x8x8xf32> -> vector<2x8x8xf32>
    "tpu.trace_stop"() : () -> ()
    %cst_80 = arith.constant 0.353553385 : f32
    %187 = vector.broadcast %cst_80 : f32 to vector<2x8x8xf32>
    %188 = arith.mulf %186, %187 : vector<2x8x8xf32>
    %189 = vector.shape_cast %0 : vector<8x8xf32> to vector<1x8x8xf32>
    %190 = vector.broadcast %189 : vector<1x8x8xf32> to vector<2x8x8xf32>
    %191 = arith.addf %188, %190 : vector<2x8x8xf32>
    %cst_81 = arith.constant dense<0xFF800000> : vector<2x8xf32>
    %192 = vector.multi_reduction <maximumf>, %191, %cst_81 [2] : vector<2x8x8xf32> to vector<2x8xf32>
    %193 = vector.shape_cast %192 : vector<2x8xf32> to vector<2x8x1xf32>
    %194 = vector.broadcast %193 : vector<2x8x1xf32> to vector<2x8x8xf32>
    %195 = arith.subf %191, %194 : vector<2x8x8xf32>
    %196 = math.exp %195 : vector<2x8x8xf32>
    %cst_82 = arith.constant dense<0.000000e+00> : vector<2x8xf32>
    %197 = vector.multi_reduction <add>, %196, %cst_82 [2] : vector<2x8x8xf32> to vector<2x8xf32>
    %198 = vector.shape_cast %197 : vector<2x8xf32> to vector<2x8x1xf32>
    %199 = vector.broadcast %198 : vector<2x8x1xf32> to vector<2x8x8xf32>
    %200 = arith.divf %196, %199 : vector<2x8x8xf32>
    "tpu.trace_start"() <{level = 10 : i32, message = "bqk,bkd->bqd"}> : () -> ()
    %cst_83 = arith.constant dense<0.000000e+00> : vector<2x8x8xf32>
    %201 = tpu.matmul %200, %185, %cst_83 {dimension_numbers = #tpu.dot_dimension_numbers<[2], [1], [1], [2], [0, 0, 0, 1, 1, 2], [0], [0]>} : vector<2x8x8xf32>, vector<2x8x8xf32>, vector<2x8x8xf32> -> vector<2x8x8xf32>
    "tpu.trace_stop"() : () -> ()
    %202 = vector.extract_strided_slice %163 {offsets = [0, 0, 16], sizes = [2, 8, 8], strides = [1, 1, 1]} : vector<2x8x96xf32> to vector<2x8x8xf32>
    %203 = vector.extract_strided_slice %163 {offsets = [0, 0, 48], sizes = [2, 8, 8], strides = [1, 1, 1]} : vector<2x8x96xf32> to vector<2x8x8xf32>
    %204 = vector.extract_strided_slice %163 {offsets = [0, 0, 80], sizes = [2, 8, 8], strides = [1, 1, 1]} : vector<2x8x96xf32> to vector<2x8x8xf32>
    "tpu.trace_start"() <{level = 10 : i32, message = "bqd,bkd->bqk"}> : () -> ()
    %cst_84 = arith.constant dense<0.000000e+00> : vector<2x8x8xf32>
    %205 = tpu.matmul %202, %203, %cst_84 {dimension_numbers = #tpu.dot_dimension_numbers<[2], [2], [1], [1], [0, 0, 0, 1, 1, 1], [0], [0]>} : vector<2x8x8xf32>, vector<2x8x8xf32>, vector<2x8x8xf32> -> vector<2x8x8xf32>
    "tpu.trace_stop"() : () -> ()
    %cst_85 = arith.constant 0.353553385 : f32
    %206 = vector.broadcast %cst_85 : f32 to vector<2x8x8xf32>
    %207 = arith.mulf %205, %206 : vector<2x8x8xf32>
    %208 = vector.shape_cast %0 : vector<8x8xf32> to vector<1x8x8xf32>
    %209 = vector.broadcast %208 : vector<1x8x8xf32> to vector<2x8x8xf32>
    %210 = arith.addf %207, %209 : vector<2x8x8xf32>
    %cst_86 = arith.constant dense<0xFF800000> : vector<2x8xf32>
    %211 = vector.multi_reduction <maximumf>, %210, %cst_86 [2] : vector<2x8x8xf32> to vector<2x8xf32>
    %212 = vector.shape_cast %211 : vector<2x8xf32> to vector<2x8x1xf32>
    %213 = vector.broadcast %212 : vector<2x8x1xf32> to vector<2x8x8xf32>
    %214 = arith.subf %210, %213 : vector<2x8x8xf32>
    %215 = math.exp %214 : vector<2x8x8xf32>
    %cst_87 = arith.constant dense<0.000000e+00> : vector<2x8xf32>
    %216 = vector.multi_reduction <add>, %215, %cst_87 [2] : vector<2x8x8xf32> to vector<2x8xf32>
    %217 = vector.shape_cast %216 : vector<2x8xf32> to vector<2x8x1xf32>
    %218 = vector.broadcast %217 : vector<2x8x1xf32> to vector<2x8x8xf32>
    %219 = arith.divf %215, %218 : vector<2x8x8xf32>
    "tpu.trace_start"() <{level = 10 : i32, message = "bqk,bkd->bqd"}> : () -> ()
    %cst_88 = arith.constant dense<0.000000e+00> : vector<2x8x8xf32>
    %220 = tpu.matmul %219, %204, %cst_88 {dimension_numbers = #tpu.dot_dimension_numbers<[2], [1], [1], [2], [0, 0, 0, 1, 1, 2], [0], [0]>} : vector<2x8x8xf32>, vector<2x8x8xf32>, vector<2x8x8xf32> -> vector<2x8x8xf32>
    "tpu.trace_stop"() : () -> ()
    %221 = vector.extract_strided_slice %163 {offsets = [0, 0, 24], sizes = [2, 8, 8], strides = [1, 1, 1]} : vector<2x8x96xf32> to vector<2x8x8xf32>
    %222 = vector.extract_strided_slice %163 {offsets = [0, 0, 56], sizes = [2, 8, 8], strides = [1, 1, 1]} : vector<2x8x96xf32> to vector<2x8x8xf32>
    %223 = vector.extract_strided_slice %163 {offsets = [0, 0, 88], sizes = [2, 8, 8], strides = [1, 1, 1]} : vector<2x8x96xf32> to vector<2x8x8xf32>
    "tpu.trace_start"() <{level = 10 : i32, message = "bqd,bkd->bqk"}> : () -> ()
    %cst_89 = arith.constant dense<0.000000e+00> : vector<2x8x8xf32>
    %224 = tpu.matmul %221, %222, %cst_89 {dimension_numbers = #tpu.dot_dimension_numbers<[2], [2], [1], [1], [0, 0, 0, 1, 1, 1], [0], [0]>} : vector<2x8x8xf32>, vector<2x8x8xf32>, vector<2x8x8xf32> -> vector<2x8x8xf32>
    "tpu.trace_stop"() : () -> ()
    %cst_90 = arith.constant 0.353553385 : f32
    %225 = vector.broadcast %cst_90 : f32 to vector<2x8x8xf32>
    %226 = arith.mulf %224, %225 : vector<2x8x8xf32>
    %227 = vector.shape_cast %0 : vector<8x8xf32> to vector<1x8x8xf32>
    %228 = vector.broadcast %227 : vector<1x8x8xf32> to vector<2x8x8xf32>
    %229 = arith.addf %226, %228 : vector<2x8x8xf32>
    %cst_91 = arith.constant dense<0xFF800000> : vector<2x8xf32>
    %230 = vector.multi_reduction <maximumf>, %229, %cst_91 [2] : vector<2x8x8xf32> to vector<2x8xf32>
    %231 = vector.shape_cast %230 : vector<2x8xf32> to vector<2x8x1xf32>
    %232 = vector.broadcast %231 : vector<2x8x1xf32> to vector<2x8x8xf32>
    %233 = arith.subf %229, %232 : vector<2x8x8xf32>
    %234 = math.exp %233 : vector<2x8x8xf32>
    %cst_92 = arith.constant dense<0.000000e+00> : vector<2x8xf32>
    %235 = vector.multi_reduction <add>, %234, %cst_92 [2] : vector<2x8x8xf32> to vector<2x8xf32>
    %236 = vector.shape_cast %235 : vector<2x8xf32> to vector<2x8x1xf32>
    %237 = vector.broadcast %236 : vector<2x8x1xf32> to vector<2x8x8xf32>
    %238 = arith.divf %234, %237 : vector<2x8x8xf32>
    "tpu.trace_start"() <{level = 10 : i32, message = "bqk,bkd->bqd"}> : () -> ()
    %cst_93 = arith.constant dense<0.000000e+00> : vector<2x8x8xf32>
    %239 = tpu.matmul %238, %223, %cst_93 {dimension_numbers = #tpu.dot_dimension_numbers<[2], [1], [1], [2], [0, 0, 0, 1, 1, 2], [0], [0]>} : vector<2x8x8xf32>, vector<2x8x8xf32>, vector<2x8x8xf32> -> vector<2x8x8xf32>
    "tpu.trace_stop"() : () -> ()
    %240 = tpu.concatenate %182, %201, %220, %239 in 2 : vector<2x8x8xf32>, vector<2x8x8xf32>, vector<2x8x8xf32>, vector<2x8x8xf32> -> vector<2x8x32xf32>
    %241 = vector.shape_cast %240 : vector<2x8x32xf32> to vector<16x32xf32>
    %cst_94 = arith.constant dense<0.000000e+00> : vector<16x32xf32>
    %242 = tpu.matmul %241, %158, %cst_94 {dimension_numbers = #tpu.dot_dimension_numbers<[1], [0], [0], [1], [0, 0, 1, 1], [], []>} : vector<16x32xf32>, vector<32x32xf32>, vector<16x32xf32> -> vector<16x32xf32>
    %243 = vector.broadcast %159 : vector<1x32xf32> to vector<16x32xf32>
    %244 = arith.addf %242, %243 : vector<16x32xf32>
    %245 = arith.addf %155, %244 : vector<16x32xf32>
    %c0_95 = arith.constant 0 : index
    %c0_96 = arith.constant 0 : index
    %246 = vector.load %arg19[%c0_95, %c0_96] : memref<1x32xf32, #tpu.memory_space<vmem>>, vector<1x32xf32>
    %c0_97 = arith.constant 0 : index
    %c0_98 = arith.constant 0 : index
    %247 = vector.load %arg20[%c0_97, %c0_98] : memref<1x32xf32, #tpu.memory_space<vmem>>, vector<1x32xf32>
    %cst_99 = arith.constant dense<0.000000e+00> : vector<16xf32>
    %248 = vector.multi_reduction <add>, %245, %cst_99 [1] : vector<16x32xf32> to vector<16xf32>
    %249 = vector.shape_cast %248 : vector<16xf32> to vector<16x1xf32>
    %cst_100 = arith.constant 3.200000e+01 : f32
    %250 = vector.broadcast %cst_100 : f32 to vector<16x1xf32>
    %251 = arith.divf %249, %250 : vector<16x1xf32>
    %252 = vector.broadcast %251 : vector<16x1xf32> to vector<16x32xf32>
    %253 = arith.subf %245, %252 : vector<16x32xf32>
    %254 = arith.mulf %253, %253 : vector<16x32xf32>
    %cst_101 = arith.constant dense<0.000000e+00> : vector<16xf32>
    %255 = vector.multi_reduction <add>, %254, %cst_101 [1] : vector<16x32xf32> to vector<16xf32>
    %256 = vector.shape_cast %255 : vector<16xf32> to vector<16x1xf32>
    %cst_102 = arith.constant 3.200000e+01 : f32
    %257 = vector.broadcast %cst_102 : f32 to vector<16x1xf32>
    %258 = arith.divf %256, %257 : vector<16x1xf32>
    %cst_103 = arith.constant 9.99999974E-6 : f32
    %259 = vector.broadcast %cst_103 : f32 to vector<16x1xf32>
    %260 = arith.addf %258, %259 : vector<16x1xf32>
    %261 = math.rsqrt %260 : vector<16x1xf32>
    %262 = vector.broadcast %261 : vector<16x1xf32> to vector<16x32xf32>
    %263 = arith.mulf %253, %262 : vector<16x32xf32>
    %264 = vector.broadcast %246 : vector<1x32xf32> to vector<16x32xf32>
    %265 = arith.mulf %263, %264 : vector<16x32xf32>
    %266 = vector.broadcast %247 : vector<1x32xf32> to vector<16x32xf32>
    %267 = arith.addf %265, %266 : vector<16x32xf32>
    %c0_104 = arith.constant 0 : index
    %c0_105 = arith.constant 0 : index
    %268 = vector.load %arg21[%c0_104, %c0_105] : memref<32x64xf32, #tpu.memory_space<vmem>>, vector<32x64xf32>
    %cst_106 = arith.constant dense<0.000000e+00> : vector<16x64xf32>
    %269 = tpu.matmul %267, %268, %cst_106 {dimension_numbers = #tpu.dot_dimension_numbers<[1], [0], [0], [1], [0, 0, 1, 1], [], []>} : vector<16x32xf32>, vector<32x64xf32>, vector<16x64xf32> -> vector<16x64xf32>
    %c0_107 = arith.constant 0 : index
    %c0_108 = arith.constant 0 : index
    %270 = vector.load %arg22[%c0_107, %c0_108] : memref<1x64xf32, #tpu.memory_space<vmem>>, vector<1x64xf32>
    %271 = vector.broadcast %270 : vector<1x64xf32> to vector<16x64xf32>
    %272 = arith.addf %269, %271 : vector<16x64xf32>
    %cst_109 = arith.constant 0.000000e+00 : f32
    %273 = vector.broadcast %cst_109 : f32 to vector<16x64xf32>
    %274 = arith.maximumf %272, %273 : vector<16x64xf32>
    %c0_110 = arith.constant 0 : index
    %c0_111 = arith.constant 0 : index
    %275 = vector.load %arg23[%c0_110, %c0_111] : memref<64x32xf32, #tpu.memory_space<vmem>>, vector<64x32xf32>
    %cst_112 = arith.constant dense<0.000000e+00> : vector<16x32xf32>
    %276 = tpu.matmul %274, %275, %cst_112 {dimension_numbers = #tpu.dot_dimension_numbers<[1], [0], [0], [1], [0, 0, 1, 1], [], []>} : vector<16x64xf32>, vector<64x32xf32>, vector<16x32xf32> -> vector<16x32xf32>
    %c0_113 = arith.constant 0 : index
    %c0_114 = arith.constant 0 : index
    %277 = vector.load %arg24[%c0_113, %c0_114] : memref<1x32xf32, #tpu.memory_space<vmem>>, vector<1x32xf32>
    %278 = vector.broadcast %277 : vector<1x32xf32> to vector<16x32xf32>
    %279 = arith.addf %276, %278 : vector<16x32xf32>
    %280 = arith.addf %267, %279 : vector<16x32xf32>
    %c0_115 = arith.constant 0 : index
    %c0_116 = arith.constant 0 : index
    %281 = vector.load %arg25[%c0_115, %c0_116] : memref<1x32xf32, #tpu.memory_space<vmem>>, vector<1x32xf32>
    %c0_117 = arith.constant 0 : index
    %c0_118 = arith.constant 0 : index
    %282 = vector.load %arg26[%c0_117, %c0_118] : memref<1x32xf32, #tpu.memory_space<vmem>>, vector<1x32xf32>
    %cst_119 = arith.constant dense<0.000000e+00> : vector<16xf32>
    %283 = vector.multi_reduction <add>, %280, %cst_119 [1] : vector<16x32xf32> to vector<16xf32>
    %284 = vector.shape_cast %283 : vector<16xf32> to vector<16x1xf32>
    %cst_120 = arith.constant 3.200000e+01 : f32
    %285 = vector.broadcast %cst_120 : f32 to vector<16x1xf32>
    %286 = arith.divf %284, %285 : vector<16x1xf32>
    %287 = vector.broadcast %286 : vector<16x1xf32> to vector<16x32xf32>
    %288 = arith.subf %280, %287 : vector<16x32xf32>
    %289 = arith.mulf %288, %288 : vector<16x32xf32>
    %cst_121 = arith.constant dense<0.000000e+00> : vector<16xf32>
    %290 = vector.multi_reduction <add>, %289, %cst_121 [1] : vector<16x32xf32> to vector<16xf32>
    %291 = vector.shape_cast %290 : vector<16xf32> to vector<16x1xf32>
    %cst_122 = arith.constant 3.200000e+01 : f32
    %292 = vector.broadcast %cst_122 : f32 to vector<16x1xf32>
    %293 = arith.divf %291, %292 : vector<16x1xf32>
    %cst_123 = arith.constant 9.99999974E-6 : f32
    %294 = vector.broadcast %cst_123 : f32 to vector<16x1xf32>
    %295 = arith.addf %293, %294 : vector<16x1xf32>
    %296 = math.rsqrt %295 : vector<16x1xf32>
    %297 = vector.broadcast %296 : vector<16x1xf32> to vector<16x32xf32>
    %298 = arith.mulf %288, %297 : vector<16x32xf32>
    %299 = vector.broadcast %281 : vector<1x32xf32> to vector<16x32xf32>
    %300 = arith.mulf %298, %299 : vector<16x32xf32>
    %301 = vector.broadcast %282 : vector<1x32xf32> to vector<16x32xf32>
    %302 = arith.addf %300, %301 : vector<16x32xf32>
    %c0_124 = arith.constant 0 : index
    %c0_125 = arith.constant 0 : index
    %303 = vector.load %arg27[%c0_124, %c0_125] : memref<32x66xf32, #tpu.memory_space<vmem>>, vector<32x66xf32>
    %cst_126 = arith.constant dense<0.000000e+00> : vector<16x66xf32>
    %304 = tpu.matmul %302, %303, %cst_126 {dimension_numbers = #tpu.dot_dimension_numbers<[1], [0], [0], [1], [0, 0, 1, 1], [], []>} : vector<16x32xf32>, vector<32x66xf32>, vector<16x66xf32> -> vector<16x66xf32>
    %c0_127 = arith.constant 0 : index
    %c0_128 = arith.constant 0 : index
    %305 = vector.load %arg28[%c0_127, %c0_128] : memref<1x66xf32, #tpu.memory_space<vmem>>, vector<1x66xf32>
    %306 = vector.broadcast %305 : vector<1x66xf32> to vector<16x66xf32>
    %307 = arith.addf %304, %306 : vector<16x66xf32>
    %308 = vector.extract_strided_slice %307 {offsets = [0, 0], sizes = [16, 64], strides = [1, 1]} : vector<16x66xf32> to vector<16x64xf32>
    %cst_129 = arith.constant 0.000000e+00 : f32
    %309 = vector.broadcast %cst_129 : f32 to vector<16x64xf32>
    %310 = arith.maximumf %308, %309 : vector<16x64xf32>
    %311 = vector.extract_strided_slice %307 {offsets = [0, 64], sizes = [16, 2], strides = [1, 1]} : vector<16x66xf32> to vector<16x2xf32>
    %cst_130 = arith.constant dense<0xFF800000> : vector<16xf32>
    %312 = vector.multi_reduction <maximumf>, %311, %cst_130 [1] : vector<16x2xf32> to vector<16xf32>
    %313 = vector.shape_cast %312 : vector<16xf32> to vector<16x1xf32>
    %314 = vector.broadcast %313 : vector<16x1xf32> to vector<16x2xf32>
    %315 = arith.subf %311, %314 : vector<16x2xf32>
    %316 = math.exp %315 : vector<16x2xf32>
    %cst_131 = arith.constant dense<0.000000e+00> : vector<16xf32>
    %317 = vector.multi_reduction <add>, %316, %cst_131 [1] : vector<16x2xf32> to vector<16xf32>
    %318 = vector.shape_cast %317 : vector<16xf32> to vector<16x1xf32>
    %319 = vector.broadcast %318 : vector<16x1xf32> to vector<16x2xf32>
    %320 = arith.divf %316, %319 : vector<16x2xf32>
    %321 = vector.extract_strided_slice %320 {offsets = [0, 0], sizes = [16, 1], strides = [1, 1]} : vector<16x2xf32> to vector<16x1xf32>
    %322 = vector.shape_cast %321 : vector<16x1xf32> to vector<16x1xf32>
    %323 = vector.broadcast %322 : vector<16x1xf32> to vector<16x32xf32>
    %324 = vector.extract_strided_slice %320 {offsets = [0, 1], sizes = [16, 1], strides = [1, 1]} : vector<16x2xf32> to vector<16x1xf32>
    %325 = vector.shape_cast %324 : vector<16x1xf32> to vector<16x1xf32>
    %326 = vector.broadcast %325 : vector<16x1xf32> to vector<16x32xf32>
    %327 = tpu.concatenate %323, %326 in 1 : vector<16x32xf32>, vector<16x32xf32> -> vector<16x64xf32>
    %328 = arith.mulf %310, %327 : vector<16x64xf32>
    %c0_132 = arith.constant 0 : index
    %c0_133 = arith.constant 0 : index
    %329 = vector.load %arg29[%c0_132, %c0_133] : memref<64x32xf32, #tpu.memory_space<vmem>>, vector<64x32xf32>
    %cst_134 = arith.constant dense<0.000000e+00> : vector<16x32xf32>
    %330 = tpu.matmul %328, %329, %cst_134 {dimension_numbers = #tpu.dot_dimension_numbers<[1], [0], [0], [1], [0, 0, 1, 1], [], []>} : vector<16x64xf32>, vector<64x32xf32>, vector<16x32xf32> -> vector<16x32xf32>
    %331 = vector.extract_strided_slice %320 {offsets = [0, 0], sizes = [16, 1], strides = [1, 1]} : vector<16x2xf32> to vector<16x1xf32>
    %c0_135 = arith.constant 0 : index
    %c0_136 = arith.constant 0 : index
    %332 = vector.load %arg30[%c0_135, %c0_136] : memref<2x32xf32, #tpu.memory_space<vmem>>, vector<1x32xf32>
    %333 = vector.broadcast %331 : vector<16x1xf32> to vector<16x32xf32>
    %334 = vector.broadcast %332 : vector<1x32xf32> to vector<16x32xf32>
    %335 = arith.mulf %333, %334 : vector<16x32xf32>
    %336 = vector.extract_strided_slice %320 {offsets = [0, 1], sizes = [16, 1], strides = [1, 1]} : vector<16x2xf32> to vector<16x1xf32>
    %c1 = arith.constant 1 : index
    %c0_137 = arith.constant 0 : index
    %337 = vector.load %arg30[%c1, %c0_137] : memref<2x32xf32, #tpu.memory_space<vmem>>, vector<1x32xf32>
    %338 = vector.broadcast %336 : vector<16x1xf32> to vector<16x32xf32>
    %339 = vector.broadcast %337 : vector<1x32xf32> to vector<16x32xf32>
    %340 = arith.mulf %338, %339 : vector<16x32xf32>
    %341 = arith.addf %335, %340 : vector<16x32xf32>
    %342 = arith.addf %330, %341 : vector<16x32xf32>
    %c0_138 = arith.constant 0 : index
    %c0_139 = arith.constant 0 : index
    %343 = vector.load %arg31[%c0_138, %c0_139] : memref<32x96xf32, #tpu.memory_space<vmem>>, vector<32x96xf32>
    %c0_140 = arith.constant 0 : index
    %c0_141 = arith.constant 0 : index
    %344 = vector.load %arg32[%c0_140, %c0_141] : memref<1x96xf32, #tpu.memory_space<vmem>>, vector<1x96xf32>
    %c0_142 = arith.constant 0 : index
    %c0_143 = arith.constant 0 : index
    %345 = vector.load %arg33[%c0_142, %c0_143] : memref<32x32xf32, #tpu.memory_space<vmem>>, vector<32x32xf32>
    %c0_144 = arith.constant 0 : index
    %c0_145 = arith.constant 0 : index
    %346 = vector.load %arg34[%c0_144, %c0_145] : memref<1x32xf32, #tpu.memory_space<vmem>>, vector<1x32xf32>
    %cst_146 = arith.constant dense<0.000000e+00> : vector<16x96xf32>
    %347 = tpu.matmul %342, %343, %cst_146 {dimension_numbers = #tpu.dot_dimension_numbers<[1], [0], [0], [1], [0, 0, 1, 1], [], []>} : vector<16x32xf32>, vector<32x96xf32>, vector<16x96xf32> -> vector<16x96xf32>
    %348 = vector.broadcast %344 : vector<1x96xf32> to vector<16x96xf32>
    %349 = arith.addf %347, %348 : vector<16x96xf32>
    %350 = vector.shape_cast %349 : vector<16x96xf32> to vector<2x8x96xf32>
    %351 = vector.extract_strided_slice %350 {offsets = [0, 0, 0], sizes = [2, 8, 8], strides = [1, 1, 1]} : vector<2x8x96xf32> to vector<2x8x8xf32>
    %352 = vector.extract_strided_slice %350 {offsets = [0, 0, 32], sizes = [2, 8, 8], strides = [1, 1, 1]} : vector<2x8x96xf32> to vector<2x8x8xf32>
    %353 = vector.extract_strided_slice %350 {offsets = [0, 0, 64], sizes = [2, 8, 8], strides = [1, 1, 1]} : vector<2x8x96xf32> to vector<2x8x8xf32>
    "tpu.trace_start"() <{level = 10 : i32, message = "bqd,bkd->bqk"}> : () -> ()
    %cst_147 = arith.constant dense<0.000000e+00> : vector<2x8x8xf32>
    %354 = tpu.matmul %351, %352, %cst_147 {dimension_numbers = #tpu.dot_dimension_numbers<[2], [2], [1], [1], [0, 0, 0, 1, 1, 1], [0], [0]>} : vector<2x8x8xf32>, vector<2x8x8xf32>, vector<2x8x8xf32> -> vector<2x8x8xf32>
    "tpu.trace_stop"() : () -> ()
    %cst_148 = arith.constant 0.353553385 : f32
    %355 = vector.broadcast %cst_148 : f32 to vector<2x8x8xf32>
    %356 = arith.mulf %354, %355 : vector<2x8x8xf32>
    %cst_149 = arith.constant dense<0xFF800000> : vector<2x8xf32>
    %357 = vector.multi_reduction <maximumf>, %356, %cst_149 [2] : vector<2x8x8xf32> to vector<2x8xf32>
    %358 = vector.shape_cast %357 : vector<2x8xf32> to vector<2x8x1xf32>
    %359 = vector.broadcast %358 : vector<2x8x1xf32> to vector<2x8x8xf32>
    %360 = arith.subf %356, %359 : vector<2x8x8xf32>
    %361 = math.exp %360 : vector<2x8x8xf32>
    %cst_150 = arith.constant dense<0.000000e+00> : vector<2x8xf32>
    %362 = vector.multi_reduction <add>, %361, %cst_150 [2] : vector<2x8x8xf32> to vector<2x8xf32>
    %363 = vector.shape_cast %362 : vector<2x8xf32> to vector<2x8x1xf32>
    %364 = vector.broadcast %363 : vector<2x8x1xf32> to vector<2x8x8xf32>
    %365 = arith.divf %361, %364 : vector<2x8x8xf32>
    "tpu.trace_start"() <{level = 10 : i32, message = "bqk,bkd->bqd"}> : () -> ()
    %cst_151 = arith.constant dense<0.000000e+00> : vector<2x8x8xf32>
    %366 = tpu.matmul %365, %353, %cst_151 {dimension_numbers = #tpu.dot_dimension_numbers<[2], [1], [1], [2], [0, 0, 0, 1, 1, 2], [0], [0]>} : vector<2x8x8xf32>, vector<2x8x8xf32>, vector<2x8x8xf32> -> vector<2x8x8xf32>
    "tpu.trace_stop"() : () -> ()
    %367 = vector.extract_strided_slice %350 {offsets = [0, 0, 8], sizes = [2, 8, 8], strides = [1, 1, 1]} : vector<2x8x96xf32> to vector<2x8x8xf32>
    %368 = vector.extract_strided_slice %350 {offsets = [0, 0, 40], sizes = [2, 8, 8], strides = [1, 1, 1]} : vector<2x8x96xf32> to vector<2x8x8xf32>
    %369 = vector.extract_strided_slice %350 {offsets = [0, 0, 72], sizes = [2, 8, 8], strides = [1, 1, 1]} : vector<2x8x96xf32> to vector<2x8x8xf32>
    "tpu.trace_start"() <{level = 10 : i32, message = "bqd,bkd->bqk"}> : () -> ()
    %cst_152 = arith.constant dense<0.000000e+00> : vector<2x8x8xf32>
    %370 = tpu.matmul %367, %368, %cst_152 {dimension_numbers = #tpu.dot_dimension_numbers<[2], [2], [1], [1], [0, 0, 0, 1, 1, 1], [0], [0]>} : vector<2x8x8xf32>, vector<2x8x8xf32>, vector<2x8x8xf32> -> vector<2x8x8xf32>
    "tpu.trace_stop"() : () -> ()
    %cst_153 = arith.constant 0.353553385 : f32
    %371 = vector.broadcast %cst_153 : f32 to vector<2x8x8xf32>
    %372 = arith.mulf %370, %371 : vector<2x8x8xf32>
    %cst_154 = arith.constant dense<0xFF800000> : vector<2x8xf32>
    %373 = vector.multi_reduction <maximumf>, %372, %cst_154 [2] : vector<2x8x8xf32> to vector<2x8xf32>
    %374 = vector.shape_cast %373 : vector<2x8xf32> to vector<2x8x1xf32>
    %375 = vector.broadcast %374 : vector<2x8x1xf32> to vector<2x8x8xf32>
    %376 = arith.subf %372, %375 : vector<2x8x8xf32>
    %377 = math.exp %376 : vector<2x8x8xf32>
    %cst_155 = arith.constant dense<0.000000e+00> : vector<2x8xf32>
    %378 = vector.multi_reduction <add>, %377, %cst_155 [2] : vector<2x8x8xf32> to vector<2x8xf32>
    %379 = vector.shape_cast %378 : vector<2x8xf32> to vector<2x8x1xf32>
    %380 = vector.broadcast %379 : vector<2x8x1xf32> to vector<2x8x8xf32>
    %381 = arith.divf %377, %380 : vector<2x8x8xf32>
    "tpu.trace_start"() <{level = 10 : i32, message = "bqk,bkd->bqd"}> : () -> ()
    %cst_156 = arith.constant dense<0.000000e+00> : vector<2x8x8xf32>
    %382 = tpu.matmul %381, %369, %cst_156 {dimension_numbers = #tpu.dot_dimension_numbers<[2], [1], [1], [2], [0, 0, 0, 1, 1, 2], [0], [0]>} : vector<2x8x8xf32>, vector<2x8x8xf32>, vector<2x8x8xf32> -> vector<2x8x8xf32>
    "tpu.trace_stop"() : () -> ()
    %383 = vector.extract_strided_slice %350 {offsets = [0, 0, 16], sizes = [2, 8, 8], strides = [1, 1, 1]} : vector<2x8x96xf32> to vector<2x8x8xf32>
    %384 = vector.extract_strided_slice %350 {offsets = [0, 0, 48], sizes = [2, 8, 8], strides = [1, 1, 1]} : vector<2x8x96xf32> to vector<2x8x8xf32>
    %385 = vector.extract_strided_slice %350 {offsets = [0, 0, 80], sizes = [2, 8, 8], strides = [1, 1, 1]} : vector<2x8x96xf32> to vector<2x8x8xf32>
    "tpu.trace_start"() <{level = 10 : i32, message = "bqd,bkd->bqk"}> : () -> ()
    %cst_157 = arith.constant dense<0.000000e+00> : vector<2x8x8xf32>
    %386 = tpu.matmul %383, %384, %cst_157 {dimension_numbers = #tpu.dot_dimension_numbers<[2], [2], [1], [1], [0, 0, 0, 1, 1, 1], [0], [0]>} : vector<2x8x8xf32>, vector<2x8x8xf32>, vector<2x8x8xf32> -> vector<2x8x8xf32>
    "tpu.trace_stop"() : () -> ()
    %cst_158 = arith.constant 0.353553385 : f32
    %387 = vector.broadcast %cst_158 : f32 to vector<2x8x8xf32>
    %388 = arith.mulf %386, %387 : vector<2x8x8xf32>
    %cst_159 = arith.constant dense<0xFF800000> : vector<2x8xf32>
    %389 = vector.multi_reduction <maximumf>, %388, %cst_159 [2] : vector<2x8x8xf32> to vector<2x8xf32>
    %390 = vector.shape_cast %389 : vector<2x8xf32> to vector<2x8x1xf32>
    %391 = vector.broadcast %390 : vector<2x8x1xf32> to vector<2x8x8xf32>
    %392 = arith.subf %388, %391 : vector<2x8x8xf32>
    %393 = math.exp %392 : vector<2x8x8xf32>
    %cst_160 = arith.constant dense<0.000000e+00> : vector<2x8xf32>
    %394 = vector.multi_reduction <add>, %393, %cst_160 [2] : vector<2x8x8xf32> to vector<2x8xf32>
    %395 = vector.shape_cast %394 : vector<2x8xf32> to vector<2x8x1xf32>
    %396 = vector.broadcast %395 : vector<2x8x1xf32> to vector<2x8x8xf32>
    %397 = arith.divf %393, %396 : vector<2x8x8xf32>
    "tpu.trace_start"() <{level = 10 : i32, message = "bqk,bkd->bqd"}> : () -> ()
    %cst_161 = arith.constant dense<0.000000e+00> : vector<2x8x8xf32>
    %398 = tpu.matmul %397, %385, %cst_161 {dimension_numbers = #tpu.dot_dimension_numbers<[2], [1], [1], [2], [0, 0, 0, 1, 1, 2], [0], [0]>} : vector<2x8x8xf32>, vector<2x8x8xf32>, vector<2x8x8xf32> -> vector<2x8x8xf32>
    "tpu.trace_stop"() : () -> ()
    %399 = vector.extract_strided_slice %350 {offsets = [0, 0, 24], sizes = [2, 8, 8], strides = [1, 1, 1]} : vector<2x8x96xf32> to vector<2x8x8xf32>
    %400 = vector.extract_strided_slice %350 {offsets = [0, 0, 56], sizes = [2, 8, 8], strides = [1, 1, 1]} : vector<2x8x96xf32> to vector<2x8x8xf32>
    %401 = vector.extract_strided_slice %350 {offsets = [0, 0, 88], sizes = [2, 8, 8], strides = [1, 1, 1]} : vector<2x8x96xf32> to vector<2x8x8xf32>
    "tpu.trace_start"() <{level = 10 : i32, message = "bqd,bkd->bqk"}> : () -> ()
    %cst_162 = arith.constant dense<0.000000e+00> : vector<2x8x8xf32>
    %402 = tpu.matmul %399, %400, %cst_162 {dimension_numbers = #tpu.dot_dimension_numbers<[2], [2], [1], [1], [0, 0, 0, 1, 1, 1], [0], [0]>} : vector<2x8x8xf32>, vector<2x8x8xf32>, vector<2x8x8xf32> -> vector<2x8x8xf32>
    "tpu.trace_stop"() : () -> ()
    %cst_163 = arith.constant 0.353553385 : f32
    %403 = vector.broadcast %cst_163 : f32 to vector<2x8x8xf32>
    %404 = arith.mulf %402, %403 : vector<2x8x8xf32>
    %cst_164 = arith.constant dense<0xFF800000> : vector<2x8xf32>
    %405 = vector.multi_reduction <maximumf>, %404, %cst_164 [2] : vector<2x8x8xf32> to vector<2x8xf32>
    %406 = vector.shape_cast %405 : vector<2x8xf32> to vector<2x8x1xf32>
    %407 = vector.broadcast %406 : vector<2x8x1xf32> to vector<2x8x8xf32>
    %408 = arith.subf %404, %407 : vector<2x8x8xf32>
    %409 = math.exp %408 : vector<2x8x8xf32>
    %cst_165 = arith.constant dense<0.000000e+00> : vector<2x8xf32>
    %410 = vector.multi_reduction <add>, %409, %cst_165 [2] : vector<2x8x8xf32> to vector<2x8xf32>
    %411 = vector.shape_cast %410 : vector<2x8xf32> to vector<2x8x1xf32>
    %412 = vector.broadcast %411 : vector<2x8x1xf32> to vector<2x8x8xf32>
    %413 = arith.divf %409, %412 : vector<2x8x8xf32>
    "tpu.trace_start"() <{level = 10 : i32, message = "bqk,bkd->bqd"}> : () -> ()
    %cst_166 = arith.constant dense<0.000000e+00> : vector<2x8x8xf32>
    %414 = tpu.matmul %413, %401, %cst_166 {dimension_numbers = #tpu.dot_dimension_numbers<[2], [1], [1], [2], [0, 0, 0, 1, 1, 2], [0], [0]>} : vector<2x8x8xf32>, vector<2x8x8xf32>, vector<2x8x8xf32> -> vector<2x8x8xf32>
    "tpu.trace_stop"() : () -> ()
    %415 = tpu.concatenate %366, %382, %398, %414 in 2 : vector<2x8x8xf32>, vector<2x8x8xf32>, vector<2x8x8xf32>, vector<2x8x8xf32> -> vector<2x8x32xf32>
    %416 = vector.shape_cast %415 : vector<2x8x32xf32> to vector<16x32xf32>
    %cst_167 = arith.constant dense<0.000000e+00> : vector<16x32xf32>
    %417 = tpu.matmul %416, %345, %cst_167 {dimension_numbers = #tpu.dot_dimension_numbers<[1], [0], [0], [1], [0, 0, 1, 1], [], []>} : vector<16x32xf32>, vector<32x32xf32>, vector<16x32xf32> -> vector<16x32xf32>
    %418 = vector.broadcast %346 : vector<1x32xf32> to vector<16x32xf32>
    %419 = arith.addf %417, %418 : vector<16x32xf32>
    %c0_168 = arith.constant 0 : index
    %c0_169 = arith.constant 0 : index
    %420 = vector.load %arg35[%c0_168, %c0_169] : memref<32x128xf32, #tpu.memory_space<vmem>>, vector<32x128xf32>
    %cst_170 = arith.constant dense<0.000000e+00> : vector<16x128xf32>
    %421 = tpu.matmul %419, %420, %cst_170 {dimension_numbers = #tpu.dot_dimension_numbers<[1], [0], [0], [1], [0, 0, 1, 1], [], []>} : vector<16x32xf32>, vector<32x128xf32>, vector<16x128xf32> -> vector<16x128xf32>
    %c0_171 = arith.constant 0 : index
    %c0_172 = arith.constant 0 : index
    %422 = vector.load %arg36[%c0_171, %c0_172] : memref<1x128xf32, #tpu.memory_space<vmem>>, vector<1x128xf32>
    %423 = vector.broadcast %422 : vector<1x128xf32> to vector<16x128xf32>
    %424 = arith.addf %421, %423 : vector<16x128xf32>
    %c0_173 = arith.constant 0 : index
    %c0_174 = arith.constant 0 : index
    %425 = vector.load %arg37[%c0_173, %c0_174] : memref<16x128xf32, #tpu.memory_space<vmem>>, vector<16x128xf32>
    tpu.vector_store %arg37[%c0_173, %c0_174], %424 {strides = array<i32>} : memref<16x128xf32, #tpu.memory_space<vmem>>, vector<16x128xf32>,
    return
  }
}

</mosaic_0001>

<bundles_post_ra>
// kernel: tpu_custom_call.1
= control target key start
LH: loop header
LB: loop body
LE: loop exit
PB: predicated region body
PF: predicated region fallthrough
CT: control target
= control target key end

     0   :  { %s7167_s6 = smov 1   ;;  %s7168_s10 = smov 2   ;;  %s8107_s0 = inlined_call_operand.smem [shape: u32[38], index: -1, kind: input, shape index: {}] }
   0x1   :  { %s7246_s5 = sld [smem:[%s8107_s0]]   ;;  %s7169_s14 = smov 3  }
   0x2   :  { %s7251_s9 = sld [smem:[%s8107_s0 + %s7167_s6]]   ;;  %s7170_s18 = smov 4  }
   0x3   :  { %s7256_s13 = sld [smem:[%s8107_s0 + %s7168_s10]]   ;;  %s7171_s22 = smov 5  }
   0x4   :  { %s7261_s17 = sld [smem:[%s8107_s0 + %s7169_s14]]   ;;  %s7172_s26 = smov 6  }
   0x5   :  { %s7266_s21 = sld [smem:[%s8107_s0 + %s7170_s18]]   ;;  %s7173_s30 = smov 7  }
   0x6   :  { %s7271_s25 = sld [smem:[%s8107_s0 + %s7171_s22]]   ;;  %s7174_s4 = smov 8  }
   0x7   :  { %s7276_s29 = sld [smem:[%s8107_s0 + %s7172_s26]]   ;;  %s7175_s10 = smov 9  }
   0x8   :  { %s7281_s3 = sld [smem:[%s8107_s0 + %s7173_s30]]   ;;  %s7176_s15 = smov 10  }
   0x9   :  { %s7286_s8 = sld [smem:[%s8107_s0 + %s7174_s4]]   ;;  %s7177_s20 = smov 11  }
   0xa   :  { %8121 = sst [smem:[#allocation35_spill]] %s7261_s17  ;;  %s7178_s26 = smov 12  }
   0xb   :  { %s7291_s14 = sld [smem:[%s8107_s0 + %s7175_s10]]   ;;  %s7179_s1 = smov 13  }
   0xc   :  { %8122 = sst [smem:[#allocation36_spill]] %s7271_s25  ;;  %s7180_s7 = smov 14  }
   0xd   :  { %s7296_s19 = sld [smem:[%s8107_s0 + %s7176_s15]]   ;;  %s7181_s15 = smov 15  }
   0xe   :  { %s7301_s24 = sld [smem:[%s8107_s0 + %s7177_s20]]   ;;  %s7182_s22 = smov 16  }
   0xf   :  { %s7306_s30 = sld [smem:[%s8107_s0 + %s7178_s26]]   ;;  %s7183_s28 = smov 17  }
  0x10   :  { %s7311_s6 = sld [smem:[%s8107_s0 + %s7179_s1]]  }
  0x11   :  { %8123 = sst [smem:[#allocation37_spill]] %s7291_s14 }
  0x12   :  { %s7316_s12 = sld [smem:[%s8107_s0 + %s7180_s7]]   ;;  %s7184_s7 = smov 18  }
  0x13   :  { %s7321_s20 = sld [smem:[%s8107_s0 + %s7181_s15]]   ;;  %s7185_s15 = smov 19  }
  0x14   :  { %8124 = sst [smem:[#allocation38_spill]] %s7301_s24 }
  0x15   :  { %s7326_s27 = sld [smem:[%s8107_s0 + %s7182_s22]]   ;;  %s7186_s22 = smov 20  }
  0x16   :  { %s7331_s4 = sld [smem:[%s8107_s0 + %s7183_s28]]   ;;  %s7187_s28 = smov 21  }
  0x17   :  { %s7336_s24 = sld [smem:[%s8107_s0 + %s7184_s7]]   ;;  %s7188_s7 = smov 22  }
  0x18   :  { %s7346_s14 = sld [smem:[%s8107_s0 + %s7186_s22]]   ;;  %s7190_s22 = smov 24  }
  0x19   :  { %8125 = sst [smem:[#allocation39_spill]] %s7321_s20 }
  0x1a   :  { %s7341_s20 = sld [smem:[%s8107_s0 + %s7185_s15]]   ;;  %s7189_s15 = smov 23  }
  0x1b   :  { %s7356_s25 = sld [smem:[%s8107_s0 + %s7188_s7]]   ;;  %s7192_s7 = smov 26  }
  0x1c   :  { %8126 = sst [smem:[#allocation40_spill]] %s7331_s4 }
  0x1d   :  { %s7351_s4 = sld [smem:[%s8107_s0 + %s7187_s28]]   ;;  %s7191_s28 = smov 25  }
  0x1e   :  { %8127 = sst [smem:[#allocation41_spill]] %s7346_s14 }
  0x1f   :  { %s7361_s17 = sld [smem:[%s8107_s0 + %s7189_s15]]   ;;  %s7193_s15 = smov 27  }
  0x20   :  { %s7366_s14 = sld [smem:[%s8107_s0 + %s7190_s22]]   ;;  %s7194_s22 = smov 28  }
  0x21   :  { %8129 = sst [smem:[#allocation43_spill]] %s7356_s25 }
  0x22   :  { %s7376_s25 = sld [smem:[%s8107_s0 + %s7192_s7]]   ;;  %s7196_s7 = smov 30  }
  0x23   :  { %8128 = sst [smem:[#allocation42_spill]] %s7351_s4 }
  0x24   :  { %s7371_s4 = sld [smem:[%s8107_s0 + %s7191_s28]]   ;;  %s7195_s28 = smov 29  }
  0x25   :  { %8130 = sst [smem:[#allocation44_spill]] %s7361_s17 }
  0x26   :  { %8131 = sst [smem:[#allocation45_spill]] %s7366_s14 }
  0x27   :  { %s7381_s17 = sld [smem:[%s8107_s0 + %s7193_s15]]   ;;  %s7197_s15 = smov 31  }
  0x28   :  { %8133 = sst [smem:[#allocation47_spill]] %s7376_s25 }
  0x29   :  { %s7386_s14 = sld [smem:[%s8107_s0 + %s7194_s22]]   ;;  %s7198_s22 = smov 32  }
  0x2a   :  { %8132 = sst [smem:[#allocation46_spill]] %s7371_s4 }
  0x2b   :  { %s7391_s4 = sld [smem:[%s8107_s0 + %s7195_s28]]   ;;  %s7199_s28 = smov 33  }
  0x2c   :  { %s7396_s25 = sld [smem:[%s8107_s0 + %s7196_s7]]   ;;  %s7200_s7 = smov 34  }
  0x2d   :  { %8134 = sst [smem:[#allocation48_spill]] %s7381_s17 }
  0x2e   :  { %s7401_s17 = sld [smem:[%s8107_s0 + %s7197_s15]]   ;;  %s7201_s15 = smov 35  }
  0x2f   :  { %8135 = sst [smem:[#allocation49_spill]] %s7386_s14 }
  0x30   :  { %s7406_s14 = sld [smem:[%s8107_s0 + %s7198_s22]]   ;;  %s7202_s22 = smov 36  }
  0x31   :  { %8136 = sst [smem:[#allocation50_spill]] %s7391_s4 }
  0x32   :  { %8137 = sst [smem:[#allocation51_spill]] %s7396_s25 }
  0x33   :  { %s7411_s4 = sld [smem:[%s8107_s0 + %s7199_s28]]   ;;  %s7203_s28 = smov 37  }
  0x34   :  { %8138 = sst [smem:[#allocation52_spill]] %s7401_s17 }
  0x35   :  { %s7416_s25 = sld [smem:[%s8107_s0 + %s7200_s7]]  }
  0x36   :  { %8139 = sst [smem:[#allocation53_spill]] %s7406_s14 }
  0x37   :  { %s7421_s17 = sld [smem:[%s8107_s0 + %s7201_s15]]  }
  0x38   :  { %s7426_s14 = sld [smem:[%s8107_s0 + %s7202_s22]]  }
  0x39   :  { %8140 = sst [smem:[#allocation54_spill]] %s7411_s4 }
  0x3a   :  { %s7431_s4 = sld [smem:[%s8107_s0 + %s7203_s28]]  }
  0x3b   :  { %80 = vsyncpa [#allocation3], 0 }
  0x3c   :  { %81 = vsyncpa [#allocation6], 0 }
  0x3d   :  { %82 = vsyncpa [#allocation9], 0 }
  0x3e   :  { %83 = vsyncpa [#allocation12], 0 }
  0x3f   :  { %84 = vsyncpa [#allocation15], 0 }
  0x40   :  { %85 = vsyncpa [#allocation18], 0 }
  0x41   :  { %86 = vsyncpa [#allocation21], 0 }
  0x42   :  { %87 = vsyncpa [#allocation24], 0 }
  0x43   :  { %88 = vsyncpa [#allocation4], 0  ;;  %s7204_s7 = smov [#allocation5]   ;;  %s7205_s11 = smov [#allocation8]  }
  0x44   :  { %s107_s10 = sshll.u32 %s7204_s7, 4  ;;  %s129_s15 = sshll.u32 %s7205_s11, 4  ;;  %s108_s10 = int_to_ptr.vmem [resolvable:$true] %s107_s10  ;;  %s130_s15 = int_to_ptr.vmem [resolvable:$true] %s129_s15 }
  0x45   :  { %s6857_s16 = scalar_lea.vmem %s108_s10, 128  ;;  %p6862_p1 = scmp.lt.s32.totalorder %s108_s10, %s108_s10 }
  0x46   :  { %p6858_p0 = scmp.ne.s32.totalorder %s108_s10, %s6857_s16  ;;  %p6863_p2 = scmp.lt.s32.totalorder %s6857_s16, %s6857_s16 }
  0x48   :  { %p6864_p3 = por %p6863_p2, %p6862_p1 }
  0x4a   :  { %p6865_p4 = pnand %p6864_p3, %p6858_p0 }
  0x4c   :  { %6868 = shalt.err (!%p6865_p4)
}
  0x4d   :  { %110 = dma.hbm_to_vmem [thread:$0]  %s7251_s9, 128, %s108_s10, [#allocation6]  }
  0x4e   :  { %s6877_s0 = scalar_lea.vmem %s130_s15, 16  ;;  %s6881_s18 = scalar_lea.vmem %s130_s15, 32 }
  0x4f   :  { %p6878_p5 = scmp.ne.s32.totalorder %s130_s15, %s6877_s0  ;;  %p6882_p6 = scmp.lt.s32.totalorder %s130_s15, %s130_s15 }
  0x50   :  { %p6883_p7 = scmp.lt.s32.totalorder %s6881_s18, %s6877_s0 }
  0x52   :  { %p6884_p8 = por %p6883_p7, %p6882_p6 }
  0x54   :  { %p6885_p9 = pnand %p6884_p8, %p6878_p5 }
  0x56   :  { %6888 = shalt.err (!%p6885_p9)
}
  0x57   :  { %132 = dma.hbm_to_vmem [thread:$0]  %s7266_s21, 16, %s130_s15, [#allocation9]  }
  0x58   :  { %s7206_s22 = smov [#allocation11]   ;;  %s7207_s26 = smov [#allocation14]  }
  0x59   :  { %s151_s23 = sshll.u32 %s7206_s22, 4  ;;  %s173_s28 = sshll.u32 %s7207_s26, 4  ;;  %s152_s23 = int_to_ptr.vmem [resolvable:$true] %s151_s23  ;;  %s174_s28 = int_to_ptr.vmem [resolvable:$true] %s173_s28 }
  0x5a   :  { %s6897_s1 = scalar_lea.vmem %s152_s23, 16  ;;  %s6901_s2 = scalar_lea.vmem %s152_s23, 32 }
  0x5b   :  { %p6898_p10 = scmp.ne.s32.totalorder %s152_s23, %s6897_s1  ;;  %p6902_p11 = scmp.lt.s32.totalorder %s152_s23, %s152_s23 }
  0x5c   :  { %p6903_p12 = scmp.lt.s32.totalorder %s6901_s2, %s6897_s1 }
  0x5e   :  { %p6904_p13 = por %p6903_p12, %p6902_p11 }
  0x60   :  { %p6905_p0 = pnand %p6904_p13, %p6898_p10 }
  0x62   :  { %6908 = shalt.err (!%p6905_p0)
}
  0x63   :  { %154 = dma.hbm_to_vmem [thread:$0]  %s7281_s3, 16, %s152_s23, [#allocation12]  }
  0x64   :  { %s6917_s9 = scalar_lea.vmem %s174_s28, 16  ;;  %s6921_s7 = scalar_lea.vmem %s174_s28, 32 }
  0x65   :  { %p6918_p1 = scmp.ne.s32.totalorder %s174_s28, %s6917_s9  ;;  %p6922_p2 = scmp.lt.s32.totalorder %s174_s28, %s174_s28 }
  0x66   :  { %p6923_p3 = scmp.lt.s32.totalorder %s6921_s7, %s6917_s9 }
  0x68   :  { %p6924_p4 = por %p6923_p3, %p6922_p2 }
  0x6a   :  { %p6925_p5 = pnand %p6924_p4, %p6918_p1 }
  0x6c   :  { %6928 = shalt.err (!%p6925_p5)
}
  0x6d   :  { %176 = dma.hbm_to_vmem [thread:$0]  %s7296_s19, 16, %s174_s28, [#allocation15]  }
  0x6e   :  { %s7208_s21 = smov [#allocation17]   ;;  %s7209_s11 = smov [#allocation20]  }
  0x6f   :  { %s195_s10 = sshll.u32 %s7208_s21, 4  ;;  %s217_s15 = sshll.u32 %s7209_s11, 4  ;;  %s196_s10 = int_to_ptr.vmem [resolvable:$true] %s195_s10  ;;  %s218_s15 = int_to_ptr.vmem [resolvable:$true] %s217_s15 }
  0x70   :  { %s6937_s16 = scalar_lea.vmem %s196_s10, 16  ;;  %s6941_s0 = scalar_lea.vmem %s196_s10, 32 }
  0x71   :  { %p6938_p6 = scmp.ne.s32.totalorder %s196_s10, %s6937_s16  ;;  %p6942_p7 = scmp.lt.s32.totalorder %s196_s10, %s196_s10 }
  0x72   :  { %p6943_p8 = scmp.lt.s32.totalorder %s6941_s0, %s6937_s16 }
  0x74   :  { %p6944_p9 = por %p6943_p8, %p6942_p7 }
  0x76   :  { %p6945_p10 = pnand %p6944_p9, %p6938_p6 }
  0x78   :  { %6948 = shalt.err (!%p6945_p10)
}
  0x79   :  { %198 = dma.hbm_to_vmem [thread:$0]  %s7311_s6, 16, %s196_s10, [#allocation18]  }
  0x7a   :  { %s6957_s3 = scalar_lea.vmem %s218_s15, 16  ;;  %s6961_s18 = scalar_lea.vmem %s218_s15, 32 }
  0x7b   :  { %p6958_p11 = scmp.ne.s32.totalorder %s218_s15, %s6957_s3  ;;  %p6962_p12 = scmp.lt.s32.totalorder %s218_s15, %s218_s15 }
  0x7c   :  { %p6963_p13 = scmp.lt.s32.totalorder %s6961_s18, %s6957_s3 }
  0x7e   :  { %p6964_p0 = por %p6963_p13, %p6962_p12 }
  0x80   :  { %p6965_p1 = pnand %p6964_p0, %p6958_p11 }
  0x82   :  { %6968 = shalt.err (!%p6965_p1)
}
  0x83   :  { %220 = dma.hbm_to_vmem [thread:$0]  %s7326_s27, 16, %s218_s15, [#allocation21]  }
  0x84   :  { %s7210_s19 = smov [#allocation2]  }
  0x85   :  { %s94_s22 = sshll.u32 %s7210_s19, 4  ;;  %s95_s22 = int_to_ptr.vmem [resolvable:$true] %s94_s22 }
  0x86   :  { %s6977_s23 = scalar_lea.vmem %s95_s22, 256  ;;  %p6982_p3 = scmp.lt.s32.totalorder %s95_s22, %s95_s22 }
  0x87   :  { %p6978_p2 = scmp.ne.s32.totalorder %s95_s22, %s6977_s23  ;;  %p6983_p4 = scmp.lt.s32.totalorder %s6977_s23, %s6977_s23 }
  0x89   :  { %p6984_p5 = por %p6983_p4, %p6982_p3 }
  0x8b   :  { %p6985_p6 = pnand %p6984_p5, %p6978_p2 }
  0x8d   :  { %6988 = shalt.err (!%p6985_p6)
}
  0x8e   :  { %s7211_s6 = smov 128   ;;  %s7212_s26 = smov 8  }
  0x8f   :  { %100 = dma.hbm_to_vmem [thread:$0]  %s7246_s5, 256, %s95_s22, [#allocation3], %s7211_s6, %s7211_s6, %s7212_s26  }
  0x90   :  { %s7213_s28 = smov [#allocation7]   ;;  %s7214_s27 = smov [#allocation10]  }
  0x91   :  { %s117_s1 = sshll.u32 %s7213_s28, 4  ;;  %s141_s2 = sshll.u32 %s7214_s27, 4  ;;  %s118_s1 = int_to_ptr.vmem [resolvable:$true] %s117_s1  ;;  %s142_s2 = int_to_ptr.vmem [resolvable:$true] %s141_s2 }
  0x92   :  { %s6997_s9 = scalar_lea.vmem %s118_s1, 128  ;;  %p7002_p8 = scmp.lt.s32.totalorder %s118_s1, %s118_s1 }
  0x93   :  { %p6998_p7 = scmp.ne.s32.totalorder %s118_s1, %s6997_s9  ;;  %p7003_p9 = scmp.lt.s32.totalorder %s6997_s9, %s6997_s9 }
  0x95   :  { %p7004_p10 = por %p7003_p9, %p7002_p8 }
  0x97   :  { %p7005_p11 = pnand %p7004_p10, %p6998_p7 }
  0x99   :  { %7008 = shalt.err (!%p7005_p11)
}
  0x9a   :  { %120 = dma.hbm_to_vmem [thread:$0]  %s7256_s13, 128, %s118_s1, [#allocation6]  }
  0x9b   :  { %s7017_s7 = scalar_lea.vmem %s142_s2, 16  ;;  %s7021_s21 = scalar_lea.vmem %s142_s2, 32 }
  0x9c   :  { %p7018_p12 = scmp.ne.s32.totalorder %s142_s2, %s7017_s7  ;;  %p7022_p13 = scmp.lt.s32.totalorder %s142_s2, %s142_s2 }
  0x9d   :  { %p7023_p0 = scmp.lt.s32.totalorder %s7021_s21, %s7017_s7 }
  0x9f   :  { %p7024_p1 = por %p7023_p0, %p7022_p13 }
  0xa1   :  { %p7025_p2 = pnand %p7024_p1, %p7018_p12 }
  0xa3   :  { %7028 = shalt.err (!%p7025_p2)
}
  0xa4   :  { %144 = dma.hbm_to_vmem [thread:$0]  %s7276_s29, 16, %s142_s2, [#allocation9]  }
  0xa5   :  { %s7215_s5 = smov [#allocation13]   ;;  %s7216_s11 = smov [#allocation16]  }
  0xa6   :  { %s161_s10 = sshll.u32 %s7215_s5, 4  ;;  %s185_s15 = sshll.u32 %s7216_s11, 4  ;;  %s162_s10 = int_to_ptr.vmem [resolvable:$true] %s161_s10  ;;  %s186_s15 = int_to_ptr.vmem [resolvable:$true] %s185_s15 }
  0xa7   :  { %s7037_s16 = scalar_lea.vmem %s162_s10, 16  ;;  %s7041_s0 = scalar_lea.vmem %s162_s10, 32 }
  0xa8   :  { %p7038_p3 = scmp.ne.s32.totalorder %s162_s10, %s7037_s16  ;;  %p7042_p4 = scmp.lt.s32.totalorder %s162_s10, %s162_s10 }
  0xa9   :  { %p7043_p5 = scmp.lt.s32.totalorder %s7041_s0, %s7037_s16 }
  0xab   :  { %p7044_p6 = por %p7043_p5, %p7042_p4 }
  0xad   :  { %p7045_p7 = pnand %p7044_p6, %p7038_p3 }
  0xaf   :  { %7048 = shalt.err (!%p7045_p7)
}
  0xb0   :  { %164 = dma.hbm_to_vmem [thread:$0]  %s7286_s8, 16, %s162_s10, [#allocation12]  }
  0xb1   :  { %s7057_s13 = scalar_lea.vmem %s186_s15, 16  ;;  %s7061_s3 = scalar_lea.vmem %s186_s15, 32 }
  0xb2   :  { %p7058_p8 = scmp.ne.s32.totalorder %s186_s15, %s7057_s13  ;;  %p7062_p9 = scmp.lt.s32.totalorder %s186_s15, %s186_s15 }
  0xb3   :  { %p7063_p10 = scmp.lt.s32.totalorder %s7061_s3, %s7057_s13 }
  0xb5   :  { %p7064_p11 = por %p7063_p10, %p7062_p9 }
  0xb7   :  { %p7065_p12 = pnand %p7064_p11, %p7058_p8 }
  0xb9   :  { %7068 = shalt.err (!%p7065_p12)
}
  0xba   :  { %188 = dma.hbm_to_vmem [thread:$0]  %s7306_s30, 16, %s186_s15, [#allocation15]  }
  0xbb   :  { %s7217_s29 = smov [#allocation19]   ;;  %s7218_s19 = smov [#allocation22]  }
  0xbc   :  { %s205_s18 = sshll.u32 %s7217_s29, 4  ;;  %s229_s22 = sshll.u32 %s7218_s19, 4  ;;  %s206_s18 = int_to_ptr.vmem [resolvable:$true] %s205_s18  ;;  %s230_s22 = int_to_ptr.vmem [resolvable:$true] %s229_s22 }
  0xbd   :  { %s7077_s23 = scalar_lea.vmem %s206_s18, 16  ;;  %s7081_s28 = scalar_lea.vmem %s206_s18, 32 }
  0xbe   :  { %p7078_p13 = scmp.ne.s32.totalorder %s206_s18, %s7077_s23  ;;  %p7082_p0 = scmp.lt.s32.totalorder %s206_s18, %s206_s18 }
  0xbf   :  { %p7083_p1 = scmp.lt.s32.totalorder %s7081_s28, %s7077_s23 }
  0xc1   :  { %p7084_p2 = por %p7083_p1, %p7082_p0 }
  0xc3   :  { %p7085_p3 = pnand %p7084_p2, %p7078_p13 }
  0xc5   :  { %7088 = shalt.err (!%p7085_p3)
}
  0xc6   :  { %208 = dma.hbm_to_vmem [thread:$0]  %s7316_s12, 16, %s206_s18, [#allocation18]  }
  0xc7   :  { %s7097_s8 = scalar_lea.vmem %s230_s22, 16  ;;  %s7101_s1 = scalar_lea.vmem %s230_s22, 32 }
  0xc8   :  { %p7098_p4 = scmp.ne.s32.totalorder %s230_s22, %s7097_s8  ;;  %p7102_p5 = scmp.lt.s32.totalorder %s230_s22, %s230_s22 }
  0xc9   :  { %p7103_p6 = scmp.lt.s32.totalorder %s7101_s1, %s7097_s8 }
  0xcb   :  { %p7104_p7 = por %p7103_p6, %p7102_p5 }
  0xcd   :  { %p7105_p8 = pnand %p7104_p7, %p7098_p4 }
  0xcf   :  { %7108 = shalt.err (!%p7105_p8)
}
  0xd0   :  { %232 = dma.hbm_to_vmem [thread:$0]  %s7336_s24, 16, %s230_s22, [#allocation21]  }
  0xd1   :  { %s7219_s30 = smov [#allocation23]  }
  0xd2   :  { %s239_s27 = sshll.u32 %s7219_s30, 4  ;;  %s240_s27 = int_to_ptr.vmem [resolvable:$true] %s239_s27 }
  0xd3   :  { %s7117_s2 = scalar_lea.vmem %s240_s27, 16  ;;  %s7121_s9 = scalar_lea.vmem %s240_s27, 32 }
  0xd4   :  { %p7118_p9 = scmp.ne.s32.totalorder %s240_s27, %s7117_s2  ;;  %p7122_p10 = scmp.lt.s32.totalorder %s240_s27, %s240_s27 }
  0xd5   :  { %p7123_p11 = scmp.lt.s32.totalorder %s7121_s9, %s7117_s2 }
  0xd7   :  { %p7124_p12 = por %p7123_p11, %p7122_p10 }
  0xd9   :  { %p7125_p13 = pnand %p7124_p12, %p7118_p9 }
  0xdb   :  { %7128 = shalt.err (!%p7125_p13)
}
  0xdc   :  { %242 = dma.hbm_to_vmem [thread:$0]  %s7341_s20, 16, %s240_s27, [#allocation24]  }
  0xdd   :  { %7149 = dma.done.wait [#allocation3], 256  }
  0xde   :  { %7150 = vsyncadd [#allocation3], 4294967040 }
  0xdf   :  { %7151 = dma.done.wait [#allocation6], 256  }
  0xe0   :  { %7152 = vsyncadd [#allocation6], 4294967040 }
  0xe1   :  { %7153 = dma.done.wait [#allocation9], 32  }
  0xe2   :  { %7154 = vsyncadd [#allocation9], 4294967264 }
  0xe3   :  { %7155 = dma.done.wait [#allocation12], 32  }
  0xe4   :  { %7156 = vsyncadd [#allocation12], 4294967264 }
  0xe5   :  { %7157 = dma.done.wait [#allocation15], 32  }
  0xe6   :  { %7158 = vsyncadd [#allocation15], 4294967264 }
  0xe7   :  { %7159 = dma.done.wait [#allocation18], 32  }
  0xe8   :  { %7160 = vsyncadd [#allocation18], 4294967264 }
  0xe9   :  { %7161 = dma.done.wait [#allocation21], 32  }
  0xea   :  { %7162 = vsyncadd [#allocation21], 4294967264 }
  0xeb   :  { %7163 = dma.done.wait [#allocation24], 16  }
  0xec   :  { %7164 = vsyncadd [#allocation24], 4294967280  ;;  %s8141_s24 = sld [smem:[#allocation35_spill]]  ;;  %v320_v2 = vld [vmem:[#allocation2] sm:$0xff]  ;;  %v321_v3 = vld [vmem:[#allocation2 + $0x8] sm:$0xff]  ;;  %vm343_vm0 = vcmask 261120  }
  0xed   :  { %v322_v5 = vmul.f32 5.656854, %v320_v2  ;;  %v323_v6 = vmul.f32 5.656854, %v321_v3  ;;  %v324_v7 = vld [vmem:[#allocation5] sm:$0xff]  ;;  %v7220_v11 = vmov 0.0  }
  0xee   :  { %6258 = vmatprep.subr.mxu1 %v7220_v11  ;;  %vm7221_vm1 = vmmov 0   ;;  %v5941_v13 = vld [vmem:[#allocation8] ss:$0 sm:$0xff]  ;;  %s7222_s12 = smov 96   ;;  %vm428_vm2 = vcmask 64512   ;;  %v7488_v20 = vld [vmem:[#allocation7] sm:$0xff] }
  0xef   :  { %v7454_v9 = vadd.f32 %v324_v7, %v322_v5  ;;  %v7456_v10 = vadd.f32 %v324_v7, %v323_v6  ;;  %6260 = vmatprep.mubr.msk.f32.mxu1 %vm7221_vm1, %v7220_v11  ;;  %s7223_s20 = smov 64   ;;  %s7224_s7 = smov 88   ;;  %vm1789_vm3 = vcmask 195584   ;;  %vm1786_vm4 = vcmask 130048  }
  0xf0   :  { %s7225_s21 = smov 120   ;;  %s7226_s5 = smov 56   ;;  %vm2035_vm5 = vcmask 523264   ;;  %vm4087_vm6 = vcmask 540160   ;;  %vm4108_vm7 = vcmask 15360  }
  0xf1   :  { %6255 = vmatprep.mubr.msk.f32.mxu0 %vm343_vm0, %v7454_v9  ;;  %s7227_s10 = smov 80   ;;  %s7228_s11 = smov 112  }
  0xf2   :  { %v330_v0 = vld [vmem:[%s8141_s24 + $0x18] sm:$0xff]  ;;  %v329_v1 = vld [vmem:[%s8141_s24 + $0x10] sm:$0xff]  ;;  %v328_v4 = vld [vmem:[%s8141_s24 + $0x8] sm:$0xff]  ;;  %s7229_s15 = smov 48   ;;  %s7230_s16 = smov 72  }
  0xf3   :  { %6247 = vmatprep.subr.mxu0 %v330_v0  ;;  %v327_v8 = vld [vmem:[%s8141_s24] sm:$0xff]  ;;  %s7231_s0 = smov 104   ;;  %s7232_s13 = smov 40  }
  0xf4   :  { %6248 = vmatpush3.msra.mxu0 %v330_v0  ;;  %s7233_s3 = smov 16   ;;  %s8142_s29 = sld [smem:[#allocation36_spill]] }
  0xf5   :  { %6249 = vmatprep.subr.mxu0 %v329_v1  ;;  %s7234_s18 = smov 24   ;;  %s8143_s19 = sld [smem:[#allocation37_spill]] }
  0xf6   :  { %6250 = vmatpush3.msra.mxu0 %v329_v1  ;;  %s8144_s22 = sld [smem:[#allocation38_spill]] }
  0xf7   :  { %6251 = vmatprep.subr.mxu0 %v328_v4  ;;  %s8145_s23 = sld [smem:[#allocation39_spill]] }
  0xf8   :  { %6252 = vmatpush3.msra.mxu0 %v328_v4  ;;  %s8146_s28 = sld [smem:[#allocation40_spill]] }
  0xf9   :  { %6253 = vmatprep.subr.mxu0 %v327_v8  ;;  %s8147_s8 = sld [smem:[#allocation42_spill]] }
  0xfa   :  { %6254 = vmatpush3.msra.mxu0 %v327_v8  ;;  %s8148_s1 = sld [smem:[#allocation44_spill]] }
  0xfb   :  { %6256 = vmatmul.mubr.msk.f32.vlgmr.msra.gmra.mxu0 %vm343_vm0, %v7456_v10  ;;  %6268 = vmatprep.subr.mxu0 %v7220_v11  ;;  %s8149_s30 = sld [smem:[#allocation41_spill]] }
  0xfc   :  { %6270 = vmatprep.mubr.msk.f32.mxu0 %vm7221_vm1, %v7220_v11  ;;  %s8150_s27 = sld [smem:[#allocation43_spill]] }
  0xfd   :  { %s8151_s2 = sld [smem:[#allocation45_spill]] }
  0xfe   :  { %s8152_s9 = sld [smem:[#allocation48_spill]] }
  0xff   :  { %s8153_s24 = sld [smem:[#allocation46_spill]] }
 0x1bb   :  { %v6257_v12 = vpop.f32.mrf.mxu0 }
 0x1bc   :  { %v7472_v16 = vadd.f32 %v6257_v12, %v5941_v13 }
 0x1bd   :  { %v416_v14 = vpop.f32.mrf.mxu0 }
 0x1be   :  { %v7468_v15 = vadd.f32 %v5941_v13, %v416_v14 }
 0x1c0   :  { %426 = vrot.lane.b32.xlu0 %v7468_v15, %s7222_s12 }
 0x1c4   :  { %504 = vrot.lane.b32.xlu0 %v7472_v16, %s7222_s12 }
 0x232   :  { %v427_v17 = vpop.permute.xlu0 %426 }
 0x233   :  { %6259 = vmatpush3.xpose.msk.msra.mxu1 %vm428_vm2, %v427_v17 }
 0x234   :  { %6263 = vmatprep.subr.mxu1 %v7220_v11 }
 0x236   :  { %6261 = vmatmul.mubr.msk.f32.vlgmr.msra.gmra.mxu1 %vm428_vm2, %v7468_v15  ;;  %v505_v18 = vpop.permute.xlu0 %504 }
 0x237   :  { %6264 = vmatpush3.xpose.msk.msra.mxu1 %vm428_vm2, %v505_v18  ;;  %6265 = vmatprep.mubr.msk.f32.mxu1 %vm7221_vm1, %v7220_v11 }
 0x238   :  { %6273 = vmatprep.subr.mxu1 %v7220_v11 }
 0x23a   :  { %6266 = vmatmul.mubr.msk.f32.vlgmr.msra.gmra.mxu1 %vm428_vm2, %v7472_v16 }
 0x23b   :  { %6275 = vmatprep.mubr.msk.f32.mxu1 %vm7221_vm1, %v7220_v11 }
 0x2f6   :  { %v499_v19 = vpop.f32.mrf.mxu1 }
 0x2f7   :  { %v580_v21 = vmul.f32 0.35355338, %v499_v19 }
 0x2f8   :  { %v6262_v22 = vpop.f32.mrf.mxu1 }
 0x2f9   :  { %v582_v23 = vadd.f32 %v580_v21, %v7488_v20 }
 0x2fa   :  { %v576_v24 = vpop.f32.mrf.mxu1 }
 0x2fb   :  { %v581_v25 = vmul.f32 0.35355338, %v576_v24  ;;  %v584_v26 = vsel %vm428_vm2, %v582_v23, -inf }
 0x2fc   :  { %v6267_v27 = vpop.f32.mrf.mxu1  ;;  %585 = vmax.xlane.f32.xlu1 %v584_v26 }
 0x2fd   :  { %v583_v28 = vadd.f32 %v581_v25, %v7488_v20 }
 0x2ff   :  { %v587_v29 = vsel %vm428_vm2, %v583_v28, -inf }
 0x300   :  { %588 = vmax.xlane.f32.xlu1 %v587_v29 }
 0x311   :  { %606 = vrot.lane.b32.xlu1 %v7468_v15, %s7223_s20 }
 0x315   :  { %682 = vrot.lane.b32.xlu1 %v7472_v16, %s7223_s20 }
 0x319   :  { %760 = vrot.lane.b32.xlu1 %v7468_v15, %s7224_s7 }
 0x31d   :  { %838 = vrot.lane.b32.xlu1 %v7472_v16, %s7224_s7 }
 0x385   :  { %v586_v30 = vpop.xlane.xlu1 %585 }
 0x386   :  { %v590_v31 = vsub.f32 %v582_v23, %v586_v30 }
 0x388   :  { %v592_v32 = vmul.f32 1.442695, %v590_v31 }
 0x389   :  { %v589_v33 = vpop.xlane.xlu1 %588 }
 0x38a   :  { %6728 = vpow2.f32 %v592_v32  ;;  %v591_v34 = vsub.f32 %v583_v28, %v589_v33 }
 0x38c   :  { %v594_v35 = vmul.f32 1.442695, %v591_v34 }
 0x38d   :  { %v607_v36 = vpop.permute.xlu1 %606 }
 0x38e   :  { %6730 = vpow2.f32 %v594_v35  ;;  %6269 = vmatpush3.msra.mxu0 %v607_v36 }
 0x38f   :  { %6278 = vmatprep.subr.mxu0 %v7220_v11 }
 0x391   :  { %v683_v37 = vpop.permute.xlu1 %682 }
 0x392   :  { %6274 = vmatpush3.msra.mxu1 %v683_v37 }
 0x393   :  { %6283 = vmatprep.subr.mxu1 %v7220_v11 }
 0x395   :  { %v761_v42 = vpop.permute.xlu1 %760 }
 0x397   :  { %v6729_v38 = vpop.eup %6728 }
 0x398   :  { %v596_v39 = vsel %vm428_vm2, %v6729_v38, 0.0 }
 0x399   :  { %597 = vadd.xlane.f32.xlu0 %v596_v39  ;;  %v839_v43 = vpop.permute.xlu1 %838 }
 0x39b   :  { %v6731_v40 = vpop.eup %6730 }
 0x39c   :  { %v599_v41 = vsel %vm428_vm2, %v6731_v40, 0.0 }
 0x39d   :  { %600 = vadd.xlane.f32.xlu1 %v599_v41 }
 0x3ae   :  { %836 = vrot.lane.b32.xlu1 %v7472_v16, %s7225_s21 }
 0x3af   :  { %758 = vrot.lane.b32.xlu0 %v7468_v15, %s7225_s21 }
 0x422   :  { %v598_v44 = vpop.xlane.xlu0 %597 }
 0x423   :  { %6732 = vrcp.f32 %v598_v44 }
 0x426   :  { %v601_v45 = vpop.xlane.xlu1 %600  ;;  %v759_v50 = vpop.permute.xlu0 %758 }
 0x427   :  { %6734 = vrcp.f32 %v601_v45 }
 0x42a   :  { %v837_v51 = vpop.permute.xlu1 %836 }
 0x430   :  { %v6733_v46 = vpop.eup %6732 }
 0x431   :  { %v603_v47 = vmul.f32 %v6733_v46, %v6729_v38 }
 0x433   :  { %6271 = vmatmul.mubr.msk.f32.vlgmr.msra.gmra.mxu0 %vm428_vm2, %v603_v47 }
 0x434   :  { %v6735_v48 = vpop.eup %6734  ;;  %6279 = vmatpush3.xpose.msk.msra.mxu0 %vm428_vm2, %v761_v42  ;;  %6280 = vmatprep.mubr.msk.f32.mxu0 %vm7221_vm1, %v7220_v11 }
 0x435   :  { %v605_v49 = vmul.f32 %v6735_v48, %v6731_v40  ;;  %6288 = vmatprep.subr.mxu0 %v7220_v11 }
 0x437   :  { %6276 = vmatmul.mubr.msk.f32.vlgmr.msra.gmra.mxu1 %vm428_vm2, %v605_v49  ;;  %6281 = vmatmul.mubr.msk.f32.vlgmr.msra.gmra.mxu0 %vm428_vm2, %v759_v50 }
 0x438   :  { %6284 = vmatpush3.xpose.msk.msra.mxu1 %vm428_vm2, %v839_v43  ;;  %6285 = vmatprep.mubr.msk.f32.mxu1 %vm7221_vm1, %v7220_v11 }
 0x439   :  { %6293 = vmatprep.subr.mxu1 %v7220_v11  ;;  %6290 = vmatprep.mubr.msk.f32.mxu0 %vm7221_vm1, %v7220_v11 }
 0x43b   :  { %6286 = vmatmul.mubr.msk.f32.vlgmr.msra.gmra.mxu1 %vm428_vm2, %v837_v51 }
 0x43c   :  { %6295 = vmatprep.mubr.msk.f32.mxu1 %vm7221_vm1, %v7220_v11 }
 0x4f3   :  { %v7526_v52 = vpop.f32.mrf.mxu0 }
 0x4f5   :  { %v6272_v53 = vpop.f32.mrf.mxu0 }
 0x4f7   :  { %v7528_v54 = vpop.f32.mrf.mxu1  ;;  %v832_v55 = vpop.f32.mrf.mxu0 }
 0x4f8   :  { %v914_v56 = vmul.f32 0.35355338, %v832_v55 }
 0x4f9   :  { %v6277_v57 = vpop.f32.mrf.mxu1  ;;  %v6282_v58 = vpop.f32.mrf.mxu0 }
 0x4fa   :  { %v916_v59 = vadd.f32 %v914_v56, %v7488_v20 }
 0x4fb   :  { %v910_v60 = vpop.f32.mrf.mxu1 }
 0x4fc   :  { %v915_v61 = vmul.f32 0.35355338, %v910_v60  ;;  %v918_v62 = vsel %vm428_vm2, %v916_v59, -inf }
 0x4fd   :  { %919 = vmax.xlane.f32.xlu1 %v918_v62  ;;  %v6287_v63 = vpop.f32.mrf.mxu1 }
 0x4fe   :  { %v917_v0 = vadd.f32 %v915_v61, %v7488_v20 }
 0x500   :  { %v921_v1 = vsel %vm428_vm2, %v917_v0, -inf }
 0x501   :  { %922 = vmax.xlane.f32.xlu0 %v921_v1 }
 0x50e   :  { %940 = vrot.lane.b32.xlu1 %v7468_v15, %s7226_s5 }
 0x512   :  { %1094 = vrot.lane.b32.xlu1 %v7468_v15, %s7227_s10 }
 0x516   :  { %1172 = vrot.lane.b32.xlu1 %v7472_v16, %s7227_s10 }
 0x517   :  { %1016 = vrot.lane.b32.xlu0 %v7472_v16, %s7226_s5 }
 0x51b   :  { %1092 = vrot.lane.b32.xlu0 %v7468_v15, %s7228_s11 }
 0x586   :  { %v920_v2 = vpop.xlane.xlu1 %919 }
 0x587   :  { %v924_v3 = vsub.f32 %v916_v59, %v920_v2 }
 0x589   :  { %v926_v4 = vmul.f32 1.442695, %v924_v3 }
 0x58a   :  { %v923_v5 = vpop.xlane.xlu0 %922  ;;  %v941_v6 = vpop.permute.xlu1 %940 }
 0x58b   :  { %6736 = vpow2.f32 %v926_v4  ;;  %v925_v7 = vsub.f32 %v917_v0, %v923_v5  ;;  %6289 = vmatpush3.msra.mxu0 %v941_v6 }
 0x58c   :  { %6298 = vmatprep.subr.mxu0 %v7220_v11 }
 0x58d   :  { %v928_v8 = vmul.f32 1.442695, %v925_v7 }
 0x58e   :  { %v1017_v12 = vpop.permute.xlu0 %1016  ;;  %v1095_v19 = vpop.permute.xlu1 %1094 }
 0x58f   :  { %6738 = vpow2.f32 %v928_v8  ;;  %6294 = vmatpush3.msra.mxu1 %v1017_v12 }
 0x590   :  { %6303 = vmatprep.subr.mxu1 %v7220_v11 }
 0x592   :  { %v1173_v21 = vpop.permute.xlu1 %1172  ;;  %v1093_v28 = vpop.permute.xlu0 %1092 }
 0x598   :  { %v6737_v13 = vpop.eup %6736 }
 0x599   :  { %v930_v14 = vsel %vm428_vm2, %v6737_v13, 0.0 }
 0x59a   :  { %931 = vadd.xlane.f32.xlu1 %v930_v14 }
 0x59c   :  { %v6739_v17 = vpop.eup %6738 }
 0x59d   :  { %v933_v18 = vsel %vm428_vm2, %v6739_v17, 0.0 }
 0x59e   :  { %934 = vadd.xlane.f32.xlu1 %v933_v18 }
 0x5af   :  { %1170 = vrot.lane.b32.xlu1 %v7472_v16, %s7228_s11 }
 0x623   :  { %v932_v22 = vpop.xlane.xlu1 %931 }
 0x624   :  { %6740 = vrcp.f32 %v932_v22 }
 0x627   :  { %v935_v23 = vpop.xlane.xlu1 %934 }
 0x628   :  { %6742 = vrcp.f32 %v935_v23 }
 0x62b   :  { %v1171_v29 = vpop.permute.xlu1 %1170 }
 0x631   :  { %v6741_v24 = vpop.eup %6740 }
 0x632   :  { %v937_v25 = vmul.f32 %v6741_v24, %v6737_v13 }
 0x634   :  { %6291 = vmatmul.mubr.msk.f32.vlgmr.msra.gmra.mxu0 %vm428_vm2, %v937_v25 }
 0x635   :  { %v6743_v26 = vpop.eup %6742  ;;  %6299 = vmatpush3.xpose.msk.msra.mxu0 %vm428_vm2, %v1095_v19  ;;  %6300 = vmatprep.mubr.msk.f32.mxu0 %vm7221_vm1, %v7220_v11 }
 0x636   :  { %v939_v27 = vmul.f32 %v6743_v26, %v6739_v17  ;;  %6308 = vmatprep.subr.mxu0 %v7220_v11 }
 0x638   :  { %6296 = vmatmul.mubr.msk.f32.vlgmr.msra.gmra.mxu1 %vm428_vm2, %v939_v27  ;;  %6301 = vmatmul.mubr.msk.f32.vlgmr.msra.gmra.mxu0 %vm428_vm2, %v1093_v28 }
 0x639   :  { %6304 = vmatpush3.xpose.msk.msra.mxu1 %vm428_vm2, %v1173_v21  ;;  %6305 = vmatprep.mubr.msk.f32.mxu1 %vm7221_vm1, %v7220_v11 }
 0x63a   :  { %6313 = vmatprep.subr.mxu1 %v7220_v11  ;;  %6310 = vmatprep.mubr.msk.f32.mxu0 %vm7221_vm1, %v7220_v11 }
 0x63c   :  { %6306 = vmatmul.mubr.msk.f32.vlgmr.msra.gmra.mxu1 %vm428_vm2, %v1171_v29 }
 0x63d   :  { %6315 = vmatprep.mubr.msk.f32.mxu1 %vm7221_vm1, %v7220_v11 }
 0x6f4   :  { %v7566_v30 = vpop.f32.mrf.mxu0 }
 0x6f6   :  { %v6292_v31 = vpop.f32.mrf.mxu0 }
 0x6f8   :  { %v7568_v32 = vpop.f32.mrf.mxu1  ;;  %v1166_v33 = vpop.f32.mrf.mxu0 }
 0x6f9   :  { %v1248_v34 = vmul.f32 0.35355338, %v1166_v33 }
 0x6fa   :  { %v6297_v35 = vpop.f32.mrf.mxu1  ;;  %v6302_v36 = vpop.f32.mrf.mxu0 }
 0x6fb   :  { %v1250_v37 = vadd.f32 %v1248_v34, %v7488_v20 }
 0x6fc   :  { %v1244_v38 = vpop.f32.mrf.mxu1 }
 0x6fd   :  { %v1249_v39 = vmul.f32 0.35355338, %v1244_v38  ;;  %v1252_v40 = vsel %vm428_vm2, %v1250_v37, -inf }
 0x6fe   :  { %1253 = vmax.xlane.f32.xlu0 %v1252_v40  ;;  %v6307_v41 = vpop.f32.mrf.mxu1 }
 0x6ff   :  { %v1251_v42 = vadd.f32 %v1249_v39, %v7488_v20  ;;  %v335_v41 = vld [vmem:[%s8142_s29 + $0x18] sm:$0xff] }
 0x701   :  { %v1255_v43 = vsel %vm428_vm2, %v1251_v42, -inf }
 0x702   :  { %1256 = vmax.xlane.f32.xlu1 %v1255_v43  ;;  %v332_v43 = vld [vmem:[%s8142_s29] sm:$0xff] }
 0x713   :  { %1274 = vrot.lane.b32.xlu1 %v7468_v15, %s7229_s15 }
 0x714   :  { %1350 = vrot.lane.b32.xlu0 %v7472_v16, %s7229_s15 }
 0x717   :  { %1428 = vrot.lane.b32.xlu1 %v7468_v15, %s7230_s16 }
 0x71b   :  { %1506 = vrot.lane.b32.xlu1 %v7472_v16, %s7230_s16 }
 0x71f   :  { %1504 = vrot.lane.b32.xlu1 %v7472_v16, %s7231_s0 }
 0x787   :  { %v1254_v44 = vpop.xlane.xlu0 %1253 }
 0x788   :  { %v1258_v45 = vsub.f32 %v1250_v37, %v1254_v44 }
 0x78a   :  { %v1260_v46 = vmul.f32 1.442695, %v1258_v45 }
 0x78b   :  { %v1351_v47 = vpop.permute.xlu0 %1350  ;;  %v1257_v48 = vpop.xlane.xlu1 %1256 }
 0x78c   :  { %6744 = vpow2.f32 %v1260_v46  ;;  %v1259_v49 = vsub.f32 %v1251_v42, %v1257_v48  ;;  %6314 = vmatpush3.msra.mxu1 %v1351_v47  ;;  %v333_v42 = vld [vmem:[%s8142_s29 + $0x8] sm:$0xff] }
 0x78d   :  { %6323 = vmatprep.subr.mxu1 %v7220_v11 }
 0x78e   :  { %v1262_v50 = vmul.f32 1.442695, %v1259_v49 }
 0x78f   :  { %v1275_v51 = vpop.permute.xlu1 %1274 }
 0x790   :  { %6746 = vpow2.f32 %v1262_v50  ;;  %6309 = vmatpush3.msra.mxu0 %v1275_v51 }
 0x791   :  { %6318 = vmatprep.subr.mxu0 %v7220_v11 }
 0x793   :  { %v1429_v60 = vpop.permute.xlu1 %1428 }
 0x797   :  { %v1507_v0 = vpop.permute.xlu1 %1506 }
 0x799   :  { %v6745_v53 = vpop.eup %6744 }
 0x79a   :  { %v1264_v55 = vsel %vm428_vm2, %v6745_v53, 0.0 }
 0x79b   :  { %1265 = vadd.xlane.f32.xlu0 %v1264_v55  ;;  %v1505_v3 = vpop.permute.xlu1 %1504 }
 0x79d   :  { %v6747_v56 = vpop.eup %6746 }
 0x79e   :  { %v1267_v57 = vsel %vm428_vm2, %v6747_v56, 0.0 }
 0x79f   :  { %1268 = vadd.xlane.f32.xlu0 %v1267_v57 }
 0x7b5   :  { %1426 = vrot.lane.b32.xlu0 %v7468_v15, %s7231_s0 }
 0x824   :  { %v1266_v58 = vpop.xlane.xlu0 %1265 }
 0x825   :  { %6748 = vrcp.f32 %v1266_v58 }
 0x828   :  { %v1269_v59 = vpop.xlane.xlu0 %1268 }
 0x829   :  { %6750 = vrcp.f32 %v1269_v59 }
 0x82c   :  { %v1427_v2 = vpop.permute.xlu0 %1426 }
 0x832   :  { %v6749_v61 = vpop.eup %6748 }
 0x833   :  { %v1271_v62 = vmul.f32 %v6749_v61, %v6745_v53 }
 0x835   :  { %6311 = vmatmul.mubr.msk.f32.vlgmr.msra.gmra.mxu0 %vm428_vm2, %v1271_v62 }
 0x836   :  { %v6751_v63 = vpop.eup %6750  ;;  %6319 = vmatpush3.xpose.msk.msra.mxu0 %vm428_vm2, %v1429_v60  ;;  %6320 = vmatprep.mubr.msk.f32.mxu0 %vm7221_vm1, %v7220_v11 }
 0x837   :  { %v1273_v1 = vmul.f32 %v6751_v63, %v6747_v56  ;;  %6328 = vmatprep.subr.mxu0 %v7220_v11 }
 0x839   :  { %6316 = vmatmul.mubr.msk.f32.vlgmr.msra.gmra.mxu1 %vm428_vm2, %v1273_v1  ;;  %6321 = vmatmul.mubr.msk.f32.vlgmr.msra.gmra.mxu0 %vm428_vm2, %v1427_v2 }
 0x83a   :  { %6324 = vmatpush3.xpose.msk.msra.mxu1 %vm428_vm2, %v1507_v0  ;;  %6325 = vmatprep.mubr.msk.f32.mxu1 %vm7221_vm1, %v7220_v11 }
 0x83b   :  { %6333 = vmatprep.subr.mxu1 %v7220_v11  ;;  %6330 = vmatprep.mubr.msk.f32.mxu0 %vm7221_vm1, %v7220_v11 }
 0x83d   :  { %6326 = vmatmul.mubr.msk.f32.vlgmr.msra.gmra.mxu1 %vm428_vm2, %v1505_v3 }
 0x83e   :  { %6335 = vmatprep.mubr.msk.f32.mxu1 %vm7221_vm1, %v7220_v11 }
 0x8f5   :  { %v1346_v4 = vpop.f32.mrf.mxu0 }
 0x8f7   :  { %v6312_v5 = vpop.f32.mrf.mxu0 }
 0x8f9   :  { %v1422_v6 = vpop.f32.mrf.mxu1  ;;  %v1500_v7 = vpop.f32.mrf.mxu0 }
 0x8fa   :  { %v1582_v8 = vmul.f32 0.35355338, %v1500_v7 }
 0x8fb   :  { %v6317_v12 = vpop.f32.mrf.mxu1  ;;  %v6322_v13 = vpop.f32.mrf.mxu0 }
 0x8fc   :  { %v1584_v14 = vadd.f32 %v1582_v8, %v7488_v20 }
 0x8fd   :  { %v1578_v17 = vpop.f32.mrf.mxu1 }
 0x8fe   :  { %v1583_v18 = vmul.f32 0.35355338, %v1578_v17  ;;  %v1586_v19 = vsel %vm428_vm2, %v1584_v14, -inf }
 0x8ff   :  { %1587 = vmax.xlane.f32.xlu0 %v1586_v19  ;;  %v6327_v21 = vpop.f32.mrf.mxu1  ;;  %v1928_v19 = vld [vmem:[%s8143_s19 + $0x10] sm:$0xff] }
 0x900   :  { %v1585_v22 = vadd.f32 %v1583_v18, %v7488_v20  ;;  %v1929_v18 = vld [vmem:[%s8143_s19 + $0x18] sm:$0xff]  ;;  %v1927_v21 = vld [vmem:[%s8143_s19 + $0x8] sm:$0xff] }
 0x902   :  { %v1589_v23 = vsel %vm428_vm2, %v1585_v22, -inf }
 0x903   :  { %1590 = vmax.xlane.f32.xlu1 %v1589_v23  ;;  %v2027_v23 = vld [vmem:[%s8144_s22 + $0x38] sm:$0xff] }
 0x914   :  { %1608 = vrot.lane.b32.xlu1 %v7468_v15, %s7232_s13 }
 0x918   :  { %1762 = vrot.lane.b32.xlu1 %v7566_v30, %s7212_s26 }
 0x91c   :  { %1764 = vrot.lane.b32.xlu1 %v7568_v32, %s7212_s26 }
 0x920   :  { %1772 = vrot.lane.b32.xlu1 %v1422_v6, %s7233_s3 }
 0x988   :  { %v1588_v24 = vpop.xlane.xlu0 %1587 }
 0x989   :  { %v1592_v25 = vsub.f32 %v1584_v14, %v1588_v24  ;;  %v2026_v24 = vld [vmem:[%s8144_s22 + $0x30] sm:$0xff] }
 0x98b   :  { %v1594_v26 = vmul.f32 1.442695, %v1592_v25  ;;  %v2025_v25 = vld [vmem:[%s8144_s22 + $0x28] sm:$0xff] }
 0x98c   :  { %v1591_v27 = vpop.xlane.xlu1 %1590 }
 0x98d   :  { %6752 = vpow2.f32 %v1594_v26  ;;  %v1593_v28 = vsub.f32 %v1585_v22, %v1591_v27  ;;  %v1926_v22 = vld [vmem:[%s8143_s19] sm:$0xff]  ;;  %s8155_s19 = sld [smem:[#allocation49_spill]] }
 0x98e   :  { %v2024_v26 = vld [vmem:[%s8144_s22 + $0x20] sm:$0xff] }
 0x98f   :  { %v1596_v29 = vmul.f32 1.442695, %v1593_v28 }
 0x990   :  { %v1609_v31 = vpop.permute.xlu1 %1608 }
 0x991   :  { %6754 = vpow2.f32 %v1596_v29  ;;  %6329 = vmatpush3.msra.mxu0 %v1609_v31 }
 0x992   :  { %6338 = vmatprep.subr.mxu0 %v335_v41 }
 0x994   :  { %v1763_v48 = vpop.permute.xlu1 %1762 }
 0x995   :  { %v1784_v51 = vsel %vm428_vm2, %v7526_v52, %v1763_v48  ;;  %v5968_v52 = vld [vmem:[#allocation10] ss:$0 sm:$0xff] }
 0x998   :  { %v1765_v49 = vpop.permute.xlu1 %1764 }
 0x999   :  { %v1785_v58 = vsel %vm428_vm2, %v7528_v54, %v1765_v49 }
 0x99a   :  { %v6753_v15 = vpop.eup %6752 }
 0x99b   :  { %v1598_v33 = vsel %vm428_vm2, %v6753_v15, 0.0 }
 0x99c   :  { %1599 = vadd.xlane.f32.xlu0 %v1598_v33  ;;  %v1773_v53 = vpop.permute.xlu1 %1772 }
 0x99d   :  { %v1788_v59 = vsel %vm1786_vm4, %v1785_v58, %v1773_v53  ;;  %v5976_v53 = vld [vmem:[#allocation16] ss:$0 sm:$0xff] }
 0x99e   :  { %v6755_v30 = vpop.eup %6754 }
 0x99f   :  { %v1601_v32 = vsel %vm428_vm2, %v6755_v30, 0.0 }
 0x9a0   :  { %1602 = vadd.xlane.f32.xlu0 %v1601_v32  ;;  %v5971_v32 = vld [vmem:[#allocation11] ss:$0 sm:$0xff] }
 0x9b6   :  { %1684 = vrot.lane.b32.xlu0 %v7472_v16, %s7232_s13  ;;  %v334_v16 = vld [vmem:[%s8142_s29 + $0x10] sm:$0xff]  ;;  %s8154_s29 = sld [smem:[#allocation47_spill]] }
 0x9ba   :  { %1770 = vrot.lane.b32.xlu0 %v1346_v4, %s7233_s3 }
 0xa25   :  { %v1600_v34 = vpop.xlane.xlu0 %1599 }
 0xa26   :  { %6756 = vrcp.f32 %v1600_v34 }
 0xa29   :  { %v1603_v35 = vpop.xlane.xlu0 %1602 }
 0xa2a   :  { %6758 = vrcp.f32 %v1603_v35  ;;  %v5972_v35 = vld [vmem:[#allocation13] ss:$0 sm:$0xff] }
 0xa2d   :  { %v1685_v36 = vpop.permute.xlu0 %1684 }
 0xa2e   :  { %6334 = vmatpush3.msra.mxu1 %v1685_v36 }
 0xa2f   :  { %6349 = vmatprep.subr.mxu1 %v1929_v18 }
 0xa31   :  { %v1771_v50 = vpop.permute.xlu0 %1770 }
 0xa32   :  { %v1787_v55 = vsel %vm1786_vm4, %v1784_v51, %v1771_v50 }
 0xa33   :  { %v6757_v37 = vpop.eup %6756 }
 0xa34   :  { %v1605_v38 = vmul.f32 %v6757_v37, %v6753_v15 }
 0xa36   :  { %6331 = vmatmul.mubr.msk.f32.vlgmr.msra.gmra.mxu0 %vm428_vm2, %v1605_v38 }
 0xa37   :  { %v6759_v39 = vpop.eup %6758  ;;  %6339 = vmatpush3.msra.mxu0 %v335_v41 }
 0xa38   :  { %v1607_v40 = vmul.f32 %v6759_v39, %v6755_v30  ;;  %6340 = vmatprep.subr.mxu0 %v334_v16 }
 0xa39   :  { %6341 = vmatpush3.msra.mxu0 %v334_v16  ;;  %v2023_v16 = vld [vmem:[%s8144_s22 + $0x18] sm:$0xff] }
 0xa3a   :  { %6336 = vmatmul.mubr.msk.f32.vlgmr.msra.gmra.mxu1 %vm428_vm2, %v1607_v40  ;;  %6342 = vmatprep.subr.mxu0 %v333_v42 }
 0xa3b   :  { %6343 = vmatpush3.msra.mxu0 %v333_v42  ;;  %6350 = vmatpush3.msra.mxu1 %v1929_v18  ;;  %v2022_v42 = vld [vmem:[%s8144_s22 + $0x10] sm:$0xff] }
 0xa3c   :  { %6344 = vmatprep.subr.mxu0 %v332_v43  ;;  %6351 = vmatprep.subr.mxu1 %v1928_v19 }
 0xa3d   :  { %6345 = vmatpush3.msra.mxu0 %v332_v43  ;;  %6352 = vmatpush3.msra.mxu1 %v1928_v19  ;;  %v2021_v43 = vld [vmem:[%s8144_s22 + $0x8] sm:$0xff] }
 0xa3e   :  { %6353 = vmatprep.subr.mxu1 %v1927_v21  ;;  %6360 = vmatprep.subr.mxu0 %v2027_v23 }
 0xa3f   :  { %6354 = vmatpush3.msra.mxu1 %v1927_v21 }
 0xa40   :  { %6355 = vmatprep.subr.mxu1 %v1926_v22 }
 0xa41   :  { %6356 = vmatpush3.msra.mxu1 %v1926_v22  ;;  %v5979_v22 = vld [vmem:[#allocation17] ss:$0 sm:$0xff] }
 0xaf6   :  { %v1680_v44 = vpop.f32.mrf.mxu0 }
 0xaf7   :  { %1778 = vrot.lane.b32.xlu0 %v1680_v44, %s7234_s18  ;;  %v2020_v44 = vld [vmem:[%s8144_s22] sm:$0xff]  ;;  %s8156_s22 = sld [smem:[#allocation50_spill]] }
 0xaf8   :  { %v6332_v45 = vpop.f32.mrf.mxu0 }
 0xaf9   :  { %v5973_v45 = vld [vmem:[#allocation14] ss:$0 sm:$0xff] }
 0xafa   :  { %v1756_v46 = vpop.f32.mrf.mxu1 }
 0xafb   :  { %1780 = vrot.lane.b32.xlu1 %v1756_v46, %s7234_s18 }
 0xafc   :  { %v6337_v47 = vpop.f32.mrf.mxu1 }
 0xb69   :  { %v1779_v56 = vpop.permute.xlu0 %1778 }
 0xb6a   :  { %v1790_v57 = vsel %vm1789_vm3, %v1787_v55, %v1779_v56 }
 0xb6b   :  { %6346 = vmatprep.mubr.msk.f32.mxu0 %vm343_vm0, %v1790_v57 }
 0xb6d   :  { %v1781_v60 = vpop.permute.xlu1 %1780 }
 0xb6e   :  { %v1791_v61 = vsel %vm1789_vm3, %v1788_v59, %v1781_v60 }
 0xb6f   :  { %6347 = vmatmul.mubr.msk.f32.vlgmr.msra.gmra.mxu0 %vm343_vm0, %v1791_v61 }
 0xb70   :  { %6361 = vmatpush3.msra.mxu0 %v2027_v23 }
 0xb71   :  { %6362 = vmatprep.subr.mxu0 %v2026_v24 }
 0xb72   :  { %6363 = vmatpush3.msra.mxu0 %v2026_v24 }
 0xb73   :  { %6364 = vmatprep.subr.mxu0 %v2025_v25 }
 0xb74   :  { %6365 = vmatpush3.msra.mxu0 %v2025_v25 }
 0xb75   :  { %6366 = vmatprep.subr.mxu0 %v2024_v26 }
 0xb76   :  { %6367 = vmatpush3.msra.mxu0 %v2024_v26 }
 0xb77   :  { %6368 = vmatprep.subr.mxu0 %v2023_v16 }
 0xb78   :  { %6369 = vmatpush3.msra.mxu0 %v2023_v16 }
 0xb79   :  { %6370 = vmatprep.subr.mxu0 %v2022_v42 }
 0xb7a   :  { %6371 = vmatpush3.msra.mxu0 %v2022_v42 }
 0xb7b   :  { %6372 = vmatprep.subr.mxu0 %v2021_v43 }
 0xb7c   :  { %6373 = vmatpush3.msra.mxu0 %v2021_v43 }
 0xb7d   :  { %6374 = vmatprep.subr.mxu0 %v2020_v44 }
 0xb7e   :  { %6375 = vmatpush3.msra.mxu0 %v2020_v44 }
 0xb7f   :  { %6400 = vmatprep.subr.mxu0 %v7220_v11 }
 0xc2f   :  { %v6348_v62 = vpop.f32.mrf.mxu0 }
 0xc30   :  { %v1876_v63 = vadd.f32 %v6348_v62, %v5968_v52 }
 0xc31   :  { %v1870_v0 = vpop.f32.mrf.mxu0 }
 0xc32   :  { %v1871_v1 = vadd.f32 %v5968_v52, %v1870_v0  ;;  %v1880_v2 = vadd.f32 %v1876_v63, %v7456_v10 }
 0xc34   :  { %v1886_v3 = vsel %vm343_vm0, %v1880_v2, 0.0  ;;  %v1879_v4 = vadd.f32 %v1871_v1, %v7454_v9 }
 0xc35   :  { %1887 = vadd.xlane.f32.xlu1 %v1886_v3 }
 0xc36   :  { %v1883_v54 = vsel %vm343_vm0, %v1879_v4, 0.0 }
 0xc37   :  { %1884 = vadd.xlane.f32.xlu0 %v1883_v54 }
 0xcbe   :  { %v1888_v5 = vpop.xlane.xlu1 %1887 }
 0xcbf   :  { %v1891_v6 = vmul.f32 0.03125, %v1888_v5 }
 0xcc0   :  { %v1885_v7 = vpop.xlane.xlu0 %1884 }
 0xcc1   :  { %v1890_v8 = vmul.f32 0.03125, %v1885_v7  ;;  %v1893_v12 = vsub.f32 %v1880_v2, %v1891_v6  ;;  %v2166_v7 = vld [vmem:[%s8145_s23 + $0x18] sm:$0xff] }
 0xcc2   :  { %6379 = vmatprep.subr.mxu1 %v2166_v7 }
 0xcc3   :  { %v1892_v13 = vsub.f32 %v1879_v4, %v1890_v8  ;;  %v1895_v17 = vmul.f32 %v1893_v12, %v1893_v12  ;;  %v2165_v8 = vld [vmem:[%s8145_s23 + $0x10] sm:$0xff] }
 0xcc5   :  { %v1894_v14 = vmul.f32 %v1892_v13, %v1892_v13  ;;  %v1899_v9 = vsel %vm343_vm0, %v1895_v17, 0.0 }
 0xcc7   :  { %v1896_v10 = vsel %vm343_vm0, %v1894_v14, 0.0 }
 0xcc8   :  { %1897 = vadd.xlane.f32.xlu0 %v1896_v10 }
 0xccc   :  { %1900 = vadd.xlane.f32.xlu0 %v1899_v9 }
 0xd51   :  { %v1898_v27 = vpop.xlane.xlu0 %1897 }
 0xd52   :  { %v1902_v28 = vmul.f32 0.03125, %v1898_v27  ;;  %v5980_v27 = vld [vmem:[#allocation19] ss:$0 sm:$0xff] }
 0xd54   :  { %v1904_v29 = vadd.f32 1e-05, %v1902_v28 }
 0xd55   :  { %v1901_v31 = vpop.xlane.xlu0 %1900 }
 0xd56   :  { %6760 = vrsqrt.f32 %v1904_v29  ;;  %v1903_v15 = vmul.f32 0.03125, %v1901_v31 }
 0xd58   :  { %v1905_v33 = vadd.f32 1e-05, %v1903_v15  ;;  %v5981_v15 = vld [vmem:[#allocation20] ss:$0 sm:$0xff] }
 0xd5a   :  { %6762 = vrsqrt.f32 %v1905_v33 }
 0xd63   :  { %v6761_v30 = vpop.eup %6760 }
 0xd64   :  { %v1908_v34 = vmul.f32 %v6761_v30, %v1892_v13  ;;  %v2163_v13 = vld [vmem:[%s8145_s23] sm:$0xff] }
 0xd66   :  { %v1916_v36 = vmul.f32 %v5971_v32, %v1908_v34 }
 0xd67   :  { %v6763_v37 = vpop.eup %6762 }
 0xd68   :  { %v1909_v38 = vmul.f32 %v6763_v37, %v1893_v12  ;;  %v1924_v39 = vadd.f32 %v5972_v35, %v1916_v36  ;;  %v2164_v12 = vld [vmem:[%s8145_s23 + $0x8] sm:$0xff]  ;;  %s8157_s23 = sld [smem:[#allocation52_spill]] }
 0xd6a   :  { %v1917_v40 = vmul.f32 %v5971_v32, %v1909_v38  ;;  %6357 = vmatprep.mubr.msk.f32.mxu1 %vm343_vm0, %v1924_v39 }
 0xd6c   :  { %v1925_v41 = vadd.f32 %v5972_v35, %v1917_v40 }
 0xd6e   :  { %6358 = vmatmul.mubr.msk.f32.vlgmr.msra.gmra.mxu1 %vm343_vm0, %v1925_v41 }
 0xd6f   :  { %6380 = vmatpush3.msra.mxu1 %v2166_v7 }
 0xd70   :  { %6381 = vmatprep.subr.mxu1 %v2165_v8 }
 0xd71   :  { %6382 = vmatpush3.msra.mxu1 %v2165_v8 }
 0xd72   :  { %6383 = vmatprep.subr.mxu1 %v2164_v12 }
 0xd73   :  { %6384 = vmatpush3.msra.mxu1 %v2164_v12 }
 0xd74   :  { %6385 = vmatprep.subr.mxu1 %v2163_v13 }
 0xd75   :  { %6386 = vmatpush3.msra.mxu1 %v2163_v13  ;;  %v7744_v13 = vld [vmem:[#allocation7] sm:$0xff] }
 0xd76   :  { %6390 = vmatprep.subr.mxu1 %v7220_v11 }
 0xe2e   :  { %v6359_v46 = vpop.f32.mrf.mxu1 }
 0xe2f   :  { %v2015_v47 = vadd.f32 %v6359_v46, %v5973_v45 }
 0xe30   :  { %v2009_v48 = vpop.f32.mrf.mxu1 }
 0xe31   :  { %v2010_v49 = vadd.f32 %v5973_v45, %v2009_v48  ;;  %v2019_v51 = vmax.f32 %v2015_v47, 0.0 }
 0xe33   :  { %v2018_v50 = vmax.f32 %v2010_v49, 0.0 }
 0xe35   :  { %6376 = vmatprep.mubr.msk.f32.mxu0 %vm2035_vm5, %v2018_v50 }
 0xe36   :  { %6377 = vmatmul.mubr.msk.f32.vlgmr.msra.gmra.mxu0 %vm2035_vm5, %v2019_v51 }
 0xe37   :  { %6402 = vmatprep.mubr.msk.f32.mxu0 %vm7221_vm1, %v7220_v11 }
 0xef6   :  { %v6378_v55 = vpop.f32.mrf.mxu0 }
 0xef7   :  { %v2114_v56 = vadd.f32 %v6378_v55, %v5976_v53 }
 0xef8   :  { %v2108_v57 = vpop.f32.mrf.mxu0 }
 0xef9   :  { %v2109_v58 = vadd.f32 %v5976_v53, %v2108_v57  ;;  %v2118_v59 = vadd.f32 %v2114_v56, %v1925_v41 }
 0xefb   :  { %v2124_v60 = vsel %vm343_vm0, %v2118_v59, 0.0  ;;  %v2117_v61 = vadd.f32 %v2109_v58, %v1924_v39 }
 0xefc   :  { %2125 = vadd.xlane.f32.xlu0 %v2124_v60 }
 0xefd   :  { %v2121_v52 = vsel %vm343_vm0, %v2117_v61, 0.0 }
 0xefe   :  { %2122 = vadd.xlane.f32.xlu1 %v2121_v52 }
 0xf85   :  { %v2126_v62 = vpop.xlane.xlu0 %2125 }
 0xf86   :  { %v2128_v63 = vmul.f32 0.03125, %v2126_v62 }
 0xf87   :  { %v2123_v0 = vpop.xlane.xlu1 %2122 }
 0xf88   :  { %v2130_v1 = vsub.f32 %v2118_v59, %v2128_v63  ;;  %v2127_v2 = vmul.f32 0.03125, %v2123_v0 }
 0xf8a   :  { %v2129_v3 = vsub.f32 %v2117_v61, %v2127_v2  ;;  %v2132_v4 = vmul.f32 %v2130_v1, %v2130_v1 }
 0xf8c   :  { %v2136_v54 = vsel %vm343_vm0, %v2132_v4, 0.0  ;;  %v2131_v5 = vmul.f32 %v2129_v3, %v2129_v3 }
 0xf8d   :  { %2137 = vadd.xlane.f32.xlu0 %v2136_v54 }
 0xf8e   :  { %v2133_v6 = vsel %vm343_vm0, %v2131_v5, 0.0 }
 0xf8f   :  { %2134 = vadd.xlane.f32.xlu1 %v2133_v6 }
0x1016   :  { %v2138_v14 = vpop.xlane.xlu0 %2137 }
0x1017   :  { %v2140_v10 = vmul.f32 0.03125, %v2138_v14 }
0x1018   :  { %v2135_v17 = vpop.xlane.xlu1 %2134 }
0x1019   :  { %v2142_v9 = vadd.f32 1e-05, %v2140_v10  ;;  %v2139_v18 = vmul.f32 0.03125, %v2135_v17 }
0x101b   :  { %6764 = vrsqrt.f32 %v2142_v9  ;;  %v2141_v19 = vadd.f32 1e-05, %v2139_v18 }
0x101d   :  { %6766 = vrsqrt.f32 %v2141_v19 }
0x1028   :  { %v6765_v21 = vpop.eup %6764 }
0x1029   :  { %v2146_v23 = vmul.f32 %v6765_v21, %v2130_v1 }
0x102a   :  { %v6767_v24 = vpop.eup %6766 }
0x102b   :  { %v2145_v25 = vmul.f32 %v6767_v24, %v2129_v3  ;;  %v2154_v26 = vmul.f32 %v5979_v22, %v2146_v23 }
0x102d   :  { %v2153_v28 = vmul.f32 %v5979_v22, %v2145_v25  ;;  %v7676_v31 = vadd.f32 %v5980_v27, %v2154_v26 }
0x102f   :  { %v7674_v29 = vadd.f32 %v5980_v27, %v2153_v28 }
0x1031   :  { %6387 = vmatprep.mubr.msk.f32.mxu1 %vm343_vm0, %v7674_v29 }
0x1032   :  { %6388 = vmatmul.mubr.msk.f32.vlgmr.msra.gmra.mxu1 %vm343_vm0, %v7676_v31 }
0x1033   :  { %6392 = vmatprep.mubr.msk.f32.mxu1 %vm7221_vm1, %v7220_v11 }
0x10f2   :  { %v6389_v33 = vpop.f32.mrf.mxu1 }
0x10f3   :  { %v7684_v30 = vadd.f32 %v6389_v33, %v5981_v15 }
0x10f4   :  { %v2251_v32 = vpop.f32.mrf.mxu1 }
0x10f5   :  { %v7686_v34 = vadd.f32 %v5981_v15, %v2251_v32  ;;  %2338 = vrot.lane.b32.xlu0 %v7684_v30, %s7222_s12 }
0x10f7   :  { %2261 = vrot.lane.b32.xlu1 %v7686_v34, %s7222_s12 }
0x1167   :  { %v2339_v36 = vpop.permute.xlu0 %2338 }
0x1169   :  { %v2262_v35 = vpop.permute.xlu1 %2261 }
0x116a   :  { %6391 = vmatpush3.xpose.msk.msra.mxu1 %vm428_vm2, %v2262_v35 }
0x116b   :  { %6395 = vmatprep.subr.mxu1 %v7220_v11 }
0x116d   :  { %6393 = vmatmul.mubr.msk.f32.vlgmr.msra.gmra.mxu1 %vm428_vm2, %v7686_v34 }
0x116e   :  { %6396 = vmatpush3.xpose.msk.msra.mxu1 %vm428_vm2, %v2339_v36  ;;  %6397 = vmatprep.mubr.msk.f32.mxu1 %vm7221_vm1, %v7220_v11 }
0x116f   :  { %6405 = vmatprep.subr.mxu1 %v7220_v11 }
0x1171   :  { %6398 = vmatmul.mubr.msk.f32.vlgmr.msra.gmra.mxu1 %vm428_vm2, %v7684_v30 }
0x1172   :  { %6407 = vmatprep.mubr.msk.f32.mxu1 %vm7221_vm1, %v7220_v11 }
0x122d   :  { %v2333_v37 = vpop.f32.mrf.mxu1 }
0x122e   :  { %v2414_v38 = vmul.f32 0.35355338, %v2333_v37 }
0x122f   :  { %v6394_v39 = vpop.f32.mrf.mxu1 }
0x1230   :  { %v2416_v40 = vadd.f32 %v2414_v38, %v7488_v20 }
0x1231   :  { %v2410_v41 = vpop.f32.mrf.mxu1 }
0x1232   :  { %v2415_v16 = vmul.f32 0.35355338, %v2410_v41  ;;  %v2418_v42 = vsel %vm428_vm2, %v2416_v40, -inf }
0x1233   :  { %2419 = vmax.xlane.f32.xlu1 %v2418_v42  ;;  %v6399_v43 = vpop.f32.mrf.mxu1 }
0x1234   :  { %v2417_v44 = vadd.f32 %v2415_v16, %v7488_v20 }
0x1236   :  { %v2421_v45 = vsel %vm428_vm2, %v2417_v44, -inf }
0x1237   :  { %2422 = vmax.xlane.f32.xlu0 %v2421_v45 }
0x1244   :  { %2440 = vrot.lane.b32.xlu1 %v7686_v34, %s7223_s20 }
0x1248   :  { %2594 = vrot.lane.b32.xlu1 %v7686_v34, %s7224_s7 }
0x124c   :  { %2672 = vrot.lane.b32.xlu1 %v7684_v30, %s7224_s7 }
0x124d   :  { %2516 = vrot.lane.b32.xlu0 %v7684_v30, %s7223_s20 }
0x12bc   :  { %v2420_v46 = vpop.xlane.xlu1 %2419 }
0x12bd   :  { %v2424_v47 = vsub.f32 %v2416_v40, %v2420_v46 }
0x12bf   :  { %v2426_v48 = vmul.f32 1.442695, %v2424_v47 }
0x12c0   :  { %v2441_v49 = vpop.permute.xlu1 %2440  ;;  %v2423_v20 = vpop.xlane.xlu0 %2422 }
0x12c1   :  { %6768 = vpow2.f32 %v2426_v48  ;;  %v2425_v50 = vsub.f32 %v2417_v44, %v2423_v20  ;;  %6401 = vmatpush3.msra.mxu0 %v2441_v49 }
0x12c2   :  { %6410 = vmatprep.subr.mxu0 %v7220_v11 }
0x12c3   :  { %v2428_v51 = vmul.f32 1.442695, %v2425_v50 }
0x12c4   :  { %v2517_v53 = vpop.permute.xlu0 %2516  ;;  %v2595_v59 = vpop.permute.xlu1 %2594 }
0x12c5   :  { %6770 = vpow2.f32 %v2428_v51  ;;  %6406 = vmatpush3.msra.mxu1 %v2517_v53 }
0x12c6   :  { %6415 = vmatprep.subr.mxu1 %v7220_v11 }
0x12c8   :  { %v2673_v60 = vpop.permute.xlu1 %2672 }
0x12ce   :  { %v6769_v55 = vpop.eup %6768 }
0x12cf   :  { %v2430_v56 = vsel %vm428_vm2, %v6769_v55, 0.0 }
0x12d0   :  { %2431 = vadd.xlane.f32.xlu1 %v2430_v56 }
0x12d2   :  { %v6771_v57 = vpop.eup %6770 }
0x12d3   :  { %v2433_v58 = vsel %vm428_vm2, %v6771_v57, 0.0 }
0x12d4   :  { %2434 = vadd.xlane.f32.xlu0 %v2433_v58 }
0x12e1   :  { %2670 = vrot.lane.b32.xlu1 %v7684_v30, %s7225_s21 }
0x12ea   :  { %2592 = vrot.lane.b32.xlu0 %v7686_v34, %s7225_s21 }
0x1359   :  { %v2432_v61 = vpop.xlane.xlu1 %2431 }
0x135a   :  { %6772 = vrcp.f32 %v2432_v61 }
0x135d   :  { %v2435_v52 = vpop.xlane.xlu0 %2434  ;;  %v2671_v3 = vpop.permute.xlu1 %2670 }
0x135e   :  { %6774 = vrcp.f32 %v2435_v52 }
0x1361   :  { %v2593_v2 = vpop.permute.xlu0 %2592 }
0x1367   :  { %v6773_v62 = vpop.eup %6772 }
0x1368   :  { %v2437_v63 = vmul.f32 %v6773_v62, %v6769_v55 }
0x136a   :  { %6403 = vmatmul.mubr.msk.f32.vlgmr.msra.gmra.mxu0 %vm428_vm2, %v2437_v63 }
0x136b   :  { %v6775_v0 = vpop.eup %6774  ;;  %6411 = vmatpush3.xpose.msk.msra.mxu0 %vm428_vm2, %v2595_v59  ;;  %6412 = vmatprep.mubr.msk.f32.mxu0 %vm7221_vm1, %v7220_v11 }
0x136c   :  { %v2439_v1 = vmul.f32 %v6775_v0, %v6771_v57  ;;  %6420 = vmatprep.subr.mxu0 %v7220_v11 }
0x136e   :  { %6408 = vmatmul.mubr.msk.f32.vlgmr.msra.gmra.mxu1 %vm428_vm2, %v2439_v1  ;;  %6413 = vmatmul.mubr.msk.f32.vlgmr.msra.gmra.mxu0 %vm428_vm2, %v2593_v2 }
0x136f   :  { %6416 = vmatpush3.xpose.msk.msra.mxu1 %vm428_vm2, %v2673_v60  ;;  %6417 = vmatprep.mubr.msk.f32.mxu1 %vm7221_vm1, %v7220_v11 }
0x1370   :  { %6425 = vmatprep.subr.mxu1 %v7220_v11  ;;  %6422 = vmatprep.mubr.msk.f32.mxu0 %vm7221_vm1, %v7220_v11 }
0x1372   :  { %6418 = vmatmul.mubr.msk.f32.vlgmr.msra.gmra.mxu1 %vm428_vm2, %v2671_v3 }
0x1373   :  { %6427 = vmatprep.mubr.msk.f32.mxu1 %vm7221_vm1, %v7220_v11 }
0x142a   :  { %v7740_v4 = vpop.f32.mrf.mxu0 }
0x142c   :  { %v6404_v54 = vpop.f32.mrf.mxu0 }
0x142e   :  { %v7742_v5 = vpop.f32.mrf.mxu1  ;;  %v2666_v6 = vpop.f32.mrf.mxu0 }
0x142f   :  { %v2748_v7 = vmul.f32 0.35355338, %v2666_v6 }
0x1430   :  { %v6409_v8 = vpop.f32.mrf.mxu1  ;;  %v6414_v12 = vpop.f32.mrf.mxu0 }
0x1431   :  { %v2750_v14 = vadd.f32 %v7744_v13, %v2748_v7 }
0x1432   :  { %v2744_v10 = vpop.f32.mrf.mxu1 }
0x1433   :  { %v2749_v17 = vmul.f32 0.35355338, %v2744_v10  ;;  %v2752_v9 = vsel %vm428_vm2, %v2750_v14, -inf }
0x1434   :  { %2753 = vmax.xlane.f32.xlu0 %v2752_v9  ;;  %v6419_v18 = vpop.f32.mrf.mxu1 }
0x1435   :  { %v2751_v19 = vadd.f32 %v7744_v13, %v2749_v17 }
0x1437   :  { %v2755_v21 = vsel %vm428_vm2, %v2751_v19, -inf }
0x1438   :  { %2756 = vmax.xlane.f32.xlu1 %v2755_v21 }
0x1449   :  { %2774 = vrot.lane.b32.xlu1 %v7686_v34, %s7226_s5 }
0x144a   :  { %2850 = vrot.lane.b32.xlu0 %v7684_v30, %s7226_s5 }
0x144d   :  { %2928 = vrot.lane.b32.xlu1 %v7686_v34, %s7227_s10 }
0x1451   :  { %3006 = vrot.lane.b32.xlu1 %v7684_v30, %s7227_s10 }
0x1455   :  { %3004 = vrot.lane.b32.xlu1 %v7684_v30, %s7228_s11 }
0x14bd   :  { %v2754_v22 = vpop.xlane.xlu0 %2753 }
0x14be   :  { %v2758_v23 = vsub.f32 %v2750_v14, %v2754_v22 }
0x14c0   :  { %v2760_v24 = vmul.f32 1.442695, %v2758_v23 }
0x14c1   :  { %v2851_v25 = vpop.permute.xlu0 %2850  ;;  %v2757_v26 = vpop.xlane.xlu1 %2756 }
0x14c2   :  { %6776 = vpow2.f32 %v2760_v24  ;;  %v2759_v27 = vsub.f32 %v2751_v19, %v2757_v26  ;;  %6426 = vmatpush3.msra.mxu1 %v2851_v25 }
0x14c3   :  { %6435 = vmatprep.subr.mxu1 %v7220_v11 }
0x14c4   :  { %v2762_v28 = vmul.f32 1.442695, %v2759_v27 }
0x14c5   :  { %v2775_v15 = vpop.permute.xlu1 %2774 }
0x14c6   :  { %6778 = vpow2.f32 %v2762_v28  ;;  %6421 = vmatpush3.msra.mxu0 %v2775_v15 }
0x14c7   :  { %6430 = vmatprep.subr.mxu0 %v7220_v11 }
0x14c9   :  { %v2929_v39 = vpop.permute.xlu1 %2928 }
0x14cd   :  { %v3007_v42 = vpop.permute.xlu1 %3006 }
0x14cf   :  { %v6777_v33 = vpop.eup %6776 }
0x14d0   :  { %v2764_v32 = vsel %vm428_vm2, %v6777_v33, 0.0 }
0x14d1   :  { %2765 = vadd.xlane.f32.xlu0 %v2764_v32  ;;  %v3005_v45 = vpop.permute.xlu1 %3004 }
0x14d3   :  { %v6779_v35 = vpop.eup %6778 }
0x14d4   :  { %v2767_v36 = vsel %vm428_vm2, %v6779_v35, 0.0 }
0x14d5   :  { %2768 = vadd.xlane.f32.xlu0 %v2767_v36 }
0x14eb   :  { %2926 = vrot.lane.b32.xlu0 %v7686_v34, %s7228_s11 }
0x155a   :  { %v2766_v37 = vpop.xlane.xlu0 %2765 }
0x155b   :  { %6780 = vrcp.f32 %v2766_v37 }
0x155e   :  { %v2769_v38 = vpop.xlane.xlu0 %2768 }
0x155f   :  { %6782 = vrcp.f32 %v2769_v38 }
0x1562   :  { %v2927_v44 = vpop.permute.xlu0 %2926 }
0x1568   :  { %v6781_v40 = vpop.eup %6780 }
0x1569   :  { %v2771_v41 = vmul.f32 %v6781_v40, %v6777_v33 }
0x156b   :  { %6423 = vmatmul.mubr.msk.f32.vlgmr.msra.gmra.mxu0 %vm428_vm2, %v2771_v41 }
0x156c   :  { %v6783_v16 = vpop.eup %6782  ;;  %6431 = vmatpush3.xpose.msk.msra.mxu0 %vm428_vm2, %v2929_v39  ;;  %6432 = vmatprep.mubr.msk.f32.mxu0 %vm7221_vm1, %v7220_v11 }
0x156d   :  { %v2773_v43 = vmul.f32 %v6783_v16, %v6779_v35  ;;  %6440 = vmatprep.subr.mxu0 %v7220_v11 }
0x156f   :  { %6428 = vmatmul.mubr.msk.f32.vlgmr.msra.gmra.mxu1 %vm428_vm2, %v2773_v43  ;;  %6433 = vmatmul.mubr.msk.f32.vlgmr.msra.gmra.mxu0 %vm428_vm2, %v2927_v44 }
0x1570   :  { %6436 = vmatpush3.xpose.msk.msra.mxu1 %vm428_vm2, %v3007_v42  ;;  %6437 = vmatprep.mubr.msk.f32.mxu1 %vm7221_vm1, %v7220_v11 }
0x1571   :  { %6445 = vmatprep.subr.mxu1 %v7220_v11  ;;  %6442 = vmatprep.mubr.msk.f32.mxu0 %vm7221_vm1, %v7220_v11 }
0x1573   :  { %6438 = vmatmul.mubr.msk.f32.vlgmr.msra.gmra.mxu1 %vm428_vm2, %v3005_v45 }
0x1574   :  { %6447 = vmatprep.mubr.msk.f32.mxu1 %vm7221_vm1, %v7220_v11 }
0x162b   :  { %v7782_v46 = vpop.f32.mrf.mxu0 }
0x162d   :  { %v6424_v47 = vpop.f32.mrf.mxu0 }
0x162f   :  { %v7784_v48 = vpop.f32.mrf.mxu1  ;;  %v3000_v49 = vpop.f32.mrf.mxu0 }
0x1630   :  { %v3082_v20 = vmul.f32 0.35355338, %v3000_v49 }
0x1631   :  { %v6429_v50 = vpop.f32.mrf.mxu1  ;;  %v6434_v51 = vpop.f32.mrf.mxu0 }
0x1632   :  { %v3084_v53 = vadd.f32 %v7744_v13, %v3082_v20 }
0x1633   :  { %v3078_v55 = vpop.f32.mrf.mxu1 }
0x1634   :  { %v3083_v56 = vmul.f32 0.35355338, %v3078_v55  ;;  %v3086_v57 = vsel %vm428_vm2, %v3084_v53, -inf }
0x1635   :  { %3087 = vmax.xlane.f32.xlu0 %v3086_v57  ;;  %v6439_v58 = vpop.f32.mrf.mxu1  ;;  %v2171_v57 = vld [vmem:[%s8146_s28 + $0x18] sm:$0xff] }
0x1636   :  { %v3085_v59 = vadd.f32 %v7744_v13, %v3083_v56  ;;  %v2169_v58 = vld [vmem:[%s8146_s28 + $0x8] sm:$0xff] }
0x1638   :  { %v3089_v60 = vsel %vm428_vm2, %v3085_v59, -inf }
0x1639   :  { %3090 = vmax.xlane.f32.xlu1 %v3089_v60 }
0x164a   :  { %3108 = vrot.lane.b32.xlu1 %v7686_v34, %s7229_s15 }
0x164b   :  { %3184 = vrot.lane.b32.xlu0 %v7684_v30, %s7229_s15 }
0x164e   :  { %3262 = vrot.lane.b32.xlu1 %v7686_v34, %s7230_s16 }
0x1652   :  { %3340 = vrot.lane.b32.xlu1 %v7684_v30, %s7230_s16 }
0x1656   :  { %3338 = vrot.lane.b32.xlu1 %v7684_v30, %s7231_s0 }
0x16be   :  { %v3088_v61 = vpop.xlane.xlu0 %3087 }
0x16bf   :  { %v3092_v52 = vsub.f32 %v3084_v53, %v3088_v61 }
0x16c1   :  { %v3094_v62 = vmul.f32 1.442695, %v3092_v52 }
0x16c2   :  { %v3185_v63 = vpop.permute.xlu0 %3184  ;;  %v3091_v0 = vpop.xlane.xlu1 %3090 }
0x16c3   :  { %6784 = vpow2.f32 %v3094_v62  ;;  %v3093_v1 = vsub.f32 %v3085_v59, %v3091_v0  ;;  %6446 = vmatpush3.msra.mxu1 %v3185_v63  ;;  %v2168_v59 = vld [vmem:[%s8146_s28] sm:$0xff] }
0x16c4   :  { %6455 = vmatprep.subr.mxu1 %v7220_v11 }
0x16c5   :  { %v3096_v2 = vmul.f32 1.442695, %v3093_v1 }
0x16c6   :  { %v3109_v3 = vpop.permute.xlu1 %3108 }
0x16c7   :  { %6786 = vpow2.f32 %v3096_v2  ;;  %6441 = vmatpush3.msra.mxu0 %v3109_v3 }
0x16c8   :  { %6450 = vmatprep.subr.mxu0 %v7220_v11 }
0x16ca   :  { %v3263_v10 = vpop.permute.xlu1 %3262 }
0x16ce   :  { %v3341_v19 = vpop.permute.xlu1 %3340 }
0x16d0   :  { %v6785_v54 = vpop.eup %6784 }
0x16d1   :  { %v3098_v6 = vsel %vm428_vm2, %v6785_v54, 0.0 }
0x16d2   :  { %3099 = vadd.xlane.f32.xlu0 %v3098_v6  ;;  %v3339_v23 = vpop.permute.xlu1 %3338 }
0x16d4   :  { %v6787_v7 = vpop.eup %6786 }
0x16d5   :  { %v3101_v8 = vsel %vm428_vm2, %v6787_v7, 0.0 }
0x16d6   :  { %3102 = vadd.xlane.f32.xlu0 %v3101_v8 }
0x16ec   :  { %3260 = vrot.lane.b32.xlu0 %v7686_v34, %s7231_s0 }
0x175b   :  { %v3100_v12 = vpop.xlane.xlu0 %3099 }
0x175c   :  { %6788 = vrcp.f32 %v3100_v12 }
0x175f   :  { %v3103_v14 = vpop.xlane.xlu0 %3102 }
0x1760   :  { %6790 = vrcp.f32 %v3103_v14 }
0x1763   :  { %v3261_v22 = vpop.permute.xlu0 %3260 }
0x1769   :  { %v6789_v17 = vpop.eup %6788 }
0x176a   :  { %v3105_v9 = vmul.f32 %v6789_v17, %v6785_v54  ;;  %v6008_v17 = vld [vmem:[#allocation22] ss:$0 sm:$0xff] }
0x176c   :  { %6443 = vmatmul.mubr.msk.f32.vlgmr.msra.gmra.mxu0 %vm428_vm2, %v3105_v9 }
0x176d   :  { %v6791_v18 = vpop.eup %6790  ;;  %6451 = vmatpush3.xpose.msk.msra.mxu0 %vm428_vm2, %v3263_v10  ;;  %6452 = vmatprep.mubr.msk.f32.mxu0 %vm7221_vm1, %v7220_v11 }
0x176e   :  { %v3107_v21 = vmul.f32 %v6791_v18, %v6787_v7  ;;  %6460 = vmatprep.subr.mxu0 %v7220_v11 }
0x1770   :  { %6448 = vmatmul.mubr.msk.f32.vlgmr.msra.gmra.mxu1 %vm428_vm2, %v3107_v21  ;;  %6453 = vmatmul.mubr.msk.f32.vlgmr.msra.gmra.mxu0 %vm428_vm2, %v3261_v22 }
0x1771   :  { %6456 = vmatpush3.xpose.msk.msra.mxu1 %vm428_vm2, %v3341_v19  ;;  %6457 = vmatprep.mubr.msk.f32.mxu1 %vm7221_vm1, %v7220_v11 }
0x1772   :  { %6465 = vmatprep.subr.mxu1 %v7220_v11  ;;  %6462 = vmatprep.mubr.msk.f32.mxu0 %vm7221_vm1, %v7220_v11 }
0x1774   :  { %6458 = vmatmul.mubr.msk.f32.vlgmr.msra.gmra.mxu1 %vm428_vm2, %v3339_v23 }
0x1775   :  { %6467 = vmatprep.mubr.msk.f32.mxu1 %vm7221_vm1, %v7220_v11 }
0x182c   :  { %v3180_v24 = vpop.f32.mrf.mxu0 }
0x182e   :  { %v6444_v25 = vpop.f32.mrf.mxu0 }
0x1830   :  { %v3256_v26 = vpop.f32.mrf.mxu1  ;;  %v3334_v27 = vpop.f32.mrf.mxu0 }
0x1831   :  { %v3416_v28 = vmul.f32 0.35355338, %v3334_v27 }
0x1832   :  { %v6449_v15 = vpop.f32.mrf.mxu1  ;;  %v6454_v33 = vpop.f32.mrf.mxu0 }
0x1833   :  { %v3418_v32 = vadd.f32 %v7744_v13, %v3416_v28 }
0x1834   :  { %v3412_v35 = vpop.f32.mrf.mxu1 }
0x1835   :  { %v3417_v36 = vmul.f32 0.35355338, %v3412_v35  ;;  %v3420_v37 = vsel %vm428_vm2, %v3418_v32, -inf  ;;  %v3760_v35 = vld [vmem:[%s8147_s8 + $0x18] sm:$0xff] }
0x1836   :  { %3421 = vmax.xlane.f32.xlu0 %v3420_v37  ;;  %v6459_v38 = vpop.f32.mrf.mxu1  ;;  %v3758_v37 = vld [vmem:[%s8147_s8 + $0x8] sm:$0xff] }
0x1837   :  { %v3419_v39 = vadd.f32 %v7744_v13, %v3417_v36  ;;  %v3759_v36 = vld [vmem:[%s8147_s8 + $0x10] sm:$0xff]  ;;  %v3757_v38 = vld [vmem:[%s8147_s8] sm:$0xff]  ;;  %s8159_s8 = sld [smem:[#allocation53_spill]] }
0x1839   :  { %v3423_v40 = vsel %vm428_vm2, %v3419_v39, -inf }
0x183a   :  { %3424 = vmax.xlane.f32.xlu1 %v3423_v40  ;;  %v3857_v40 = vld [vmem:[%s8148_s1 + $0x30] sm:$0xff] }
0x184b   :  { %3442 = vrot.lane.b32.xlu1 %v7686_v34, %s7232_s13 }
0x184f   :  { %3596 = vrot.lane.b32.xlu1 %v7782_v46, %s7212_s26 }
0x1853   :  { %3598 = vrot.lane.b32.xlu1 %v7784_v48, %s7212_s26 }
0x1857   :  { %3606 = vrot.lane.b32.xlu1 %v3256_v26, %s7233_s3 }
0x18bf   :  { %v3422_v41 = vpop.xlane.xlu0 %3421 }
0x18c0   :  { %v3426_v16 = vsub.f32 %v3418_v32, %v3422_v41  ;;  %v3856_v41 = vld [vmem:[%s8148_s1 + $0x28] sm:$0xff] }
0x18c2   :  { %v3428_v42 = vmul.f32 1.442695, %v3426_v16  ;;  %v3855_v16 = vld [vmem:[%s8148_s1 + $0x20] sm:$0xff] }
0x18c3   :  { %v3425_v43 = vpop.xlane.xlu1 %3424 }
0x18c4   :  { %6792 = vpow2.f32 %v3428_v42  ;;  %v3427_v13 = vsub.f32 %v3419_v39, %v3425_v43  ;;  %v3858_v39 = vld [vmem:[%s8148_s1 + $0x38] sm:$0xff] }
0x18c6   :  { %v3430_v44 = vmul.f32 1.442695, %v3427_v13 }
0x18c7   :  { %v3443_v45 = vpop.permute.xlu1 %3442 }
0x18c8   :  { %6794 = vpow2.f32 %v3430_v44  ;;  %6461 = vmatpush3.msra.mxu0 %v3443_v45 }
0x18c9   :  { %6470 = vmatprep.subr.mxu0 %v2171_v57 }
0x18cb   :  { %v3597_v63 = vpop.permute.xlu1 %3596 }
0x18cc   :  { %v3618_v2 = vsel %vm428_vm2, %v7740_v4, %v3597_v63 }
0x18cf   :  { %v3599_v0 = vpop.permute.xlu1 %3598 }
0x18d0   :  { %v3619_v8 = vsel %vm428_vm2, %v7742_v5, %v3599_v0 }
0x18d1   :  { %v6793_v47 = vpop.eup %6792 }
0x18d2   :  { %v3432_v34 = vsel %vm428_vm2, %v6793_v47, 0.0 }
0x18d3   :  { %3433 = vadd.xlane.f32.xlu0 %v3432_v34  ;;  %v3607_v3 = vpop.permute.xlu1 %3606 }
0x18d4   :  { %v3621_v12 = vsel %vm1786_vm4, %v3619_v8, %v3607_v3 }
0x18d5   :  { %v6795_v46 = vpop.eup %6794 }
0x18d6   :  { %v3435_v49 = vsel %vm428_vm2, %v6795_v46, 0.0 }
0x18d7   :  { %3436 = vadd.xlane.f32.xlu0 %v3435_v49 }
0x18ed   :  { %3518 = vrot.lane.b32.xlu0 %v7684_v30, %s7232_s13  ;;  %v2170_v30 = vld [vmem:[%s8146_s28 + $0x10] sm:$0xff]  ;;  %s8158_s28 = sld [smem:[#allocation51_spill]] }
0x18f1   :  { %3604 = vrot.lane.b32.xlu0 %v3180_v24, %s7233_s3 }
0x195c   :  { %v3434_v48 = vpop.xlane.xlu0 %3433 }
0x195d   :  { %6796 = vrcp.f32 %v3434_v48  ;;  %v6012_v48 = vld [vmem:[%s8149_s30] ss:$0 sm:$0xff] }
0x1960   :  { %v3437_v20 = vpop.xlane.xlu0 %3436 }
0x1961   :  { %6798 = vrcp.f32 %v3437_v20 }
0x1964   :  { %v3519_v50 = vpop.permute.xlu0 %3518 }
0x1965   :  { %6466 = vmatpush3.msra.mxu1 %v3519_v50 }
0x1966   :  { %6481 = vmatprep.subr.mxu1 %v3760_v35 }
0x1968   :  { %v3605_v1 = vpop.permute.xlu0 %3604 }
0x1969   :  { %v3620_v54 = vsel %vm1786_vm4, %v3618_v2, %v3605_v1  ;;  %v6016_v2 = vld [vmem:[%s8151_s2] ss:$0 sm:$0xff] }
0x196a   :  { %v6797_v51 = vpop.eup %6796 }
0x196b   :  { %v3439_v53 = vmul.f32 %v6797_v51, %v6793_v47 }
0x196d   :  { %6463 = vmatmul.mubr.msk.f32.vlgmr.msra.gmra.mxu0 %vm428_vm2, %v3439_v53 }
0x196e   :  { %v6799_v55 = vpop.eup %6798  ;;  %6471 = vmatpush3.msra.mxu0 %v2171_v57  ;;  %v3854_v57 = vld [vmem:[%s8148_s1 + $0x18] sm:$0xff] }
0x196f   :  { %v3441_v56 = vmul.f32 %v6799_v55, %v6795_v46  ;;  %6472 = vmatprep.subr.mxu0 %v2170_v30  ;;  %v6011_v46 = vld [vmem:[#allocation23] ss:$0 sm:$0xff] }
0x1970   :  { %6473 = vmatpush3.msra.mxu0 %v2170_v30  ;;  %v3853_v30 = vld [vmem:[%s8148_s1 + $0x10] sm:$0xff] }
0x1971   :  { %6468 = vmatmul.mubr.msk.f32.vlgmr.msra.gmra.mxu1 %vm428_vm2, %v3441_v56  ;;  %6474 = vmatprep.subr.mxu0 %v2169_v58 }
0x1972   :  { %6475 = vmatpush3.msra.mxu0 %v2169_v58  ;;  %6482 = vmatpush3.msra.mxu1 %v3760_v35  ;;  %v3852_v58 = vld [vmem:[%s8148_s1 + $0x8] sm:$0xff] }
0x1973   :  { %6476 = vmatprep.subr.mxu0 %v2168_v59  ;;  %6483 = vmatprep.subr.mxu1 %v3759_v36 }
0x1974   :  { %6477 = vmatpush3.msra.mxu0 %v2168_v59  ;;  %6484 = vmatpush3.msra.mxu1 %v3759_v36  ;;  %v3851_v59 = vld [vmem:[%s8148_s1] sm:$0xff] }
0x1975   :  { %6485 = vmatprep.subr.mxu1 %v3758_v37  ;;  %6492 = vmatprep.subr.mxu0 %v3858_v39 }
0x1976   :  { %6486 = vmatpush3.msra.mxu1 %v3758_v37  ;;  %v6019_v37 = vld [vmem:[%s8153_s24] ss:$0 sm:$0xff] }
0x1977   :  { %6487 = vmatprep.subr.mxu1 %v3757_v38 }
0x1978   :  { %6488 = vmatpush3.msra.mxu1 %v3757_v38 }
0x1a2d   :  { %v3514_v60 = vpop.f32.mrf.mxu0 }
0x1a2e   :  { %3612 = vrot.lane.b32.xlu0 %v3514_v60, %s7234_s18  ;;  %v6013_v60 = vld [vmem:[%s8150_s27] ss:$0 sm:$0xff] }
0x1a2f   :  { %v6464_v61 = vpop.f32.mrf.mxu0 }
0x1a31   :  { %v3590_v52 = vpop.f32.mrf.mxu1 }
0x1a32   :  { %3614 = vrot.lane.b32.xlu1 %v3590_v52, %s7234_s18 }
0x1a33   :  { %v6469_v62 = vpop.f32.mrf.mxu1 }
0x1aa0   :  { %v3613_v6 = vpop.permute.xlu0 %3612 }
0x1aa1   :  { %v3622_v7 = vsel %vm1789_vm3, %v3620_v54, %v3613_v6 }
0x1aa2   :  { %6478 = vmatprep.mubr.msk.f32.mxu0 %vm343_vm0, %v3622_v7 }
0x1aa4   :  { %v3615_v14 = vpop.permute.xlu1 %3614 }
0x1aa5   :  { %v3623_v10 = vsel %vm1789_vm3, %v3621_v12, %v3615_v14 }
0x1aa6   :  { %6479 = vmatmul.mubr.msk.f32.vlgmr.msra.gmra.mxu0 %vm343_vm0, %v3623_v10 }
0x1aa7   :  { %6493 = vmatpush3.msra.mxu0 %v3858_v39 }
0x1aa8   :  { %6494 = vmatprep.subr.mxu0 %v3857_v40 }
0x1aa9   :  { %6495 = vmatpush3.msra.mxu0 %v3857_v40 }
0x1aaa   :  { %6496 = vmatprep.subr.mxu0 %v3856_v41 }
0x1aab   :  { %6497 = vmatpush3.msra.mxu0 %v3856_v41 }
0x1aac   :  { %6498 = vmatprep.subr.mxu0 %v3855_v16 }
0x1aad   :  { %6499 = vmatpush3.msra.mxu0 %v3855_v16  ;;  %v6020_v16 = vld [vmem:[%s8154_s29] ss:$0 sm:$0xff] }
0x1aae   :  { %6500 = vmatprep.subr.mxu0 %v3854_v57 }
0x1aaf   :  { %6501 = vmatpush3.msra.mxu0 %v3854_v57 }
0x1ab0   :  { %6502 = vmatprep.subr.mxu0 %v3853_v30 }
0x1ab1   :  { %6503 = vmatpush3.msra.mxu0 %v3853_v30 }
0x1ab2   :  { %6504 = vmatprep.subr.mxu0 %v3852_v58 }
0x1ab3   :  { %6505 = vmatpush3.msra.mxu0 %v3852_v58 }
0x1ab4   :  { %6506 = vmatprep.subr.mxu0 %v3851_v59 }
0x1ab5   :  { %6507 = vmatpush3.msra.mxu0 %v3851_v59 }
0x1b66   :  { %v6480_v4 = vpop.f32.mrf.mxu0 }
0x1b67   :  { %v3708_v9 = vadd.f32 %v6480_v4, %v6008_v17 }
0x1b68   :  { %v3702_v18 = vpop.f32.mrf.mxu0 }
0x1b69   :  { %v3712_v19 = vadd.f32 %v3708_v9, %v7676_v31  ;;  %v3703_v21 = vadd.f32 %v6008_v17, %v3702_v18 }
0x1b6b   :  { %v3718_v22 = vsel %vm343_vm0, %v3712_v19, 0.0  ;;  %v3711_v23 = vadd.f32 %v3703_v21, %v7674_v29 }
0x1b6c   :  { %3719 = vadd.xlane.f32.xlu1 %v3718_v22 }
0x1b6d   :  { %v3715_v5 = vsel %vm343_vm0, %v3711_v23, 0.0 }
0x1b6e   :  { %3716 = vadd.xlane.f32.xlu0 %v3715_v5 }
0x1bf5   :  { %v3720_v24 = vpop.xlane.xlu1 %3719 }
0x1bf6   :  { %v3722_v25 = vmul.f32 0.03125, %v3720_v24 }
0x1bf7   :  { %v3717_v26 = vpop.xlane.xlu0 %3716 }
0x1bf8   :  { %v3721_v27 = vmul.f32 0.03125, %v3717_v26  ;;  %v3724_v28 = vsub.f32 %v3712_v19, %v3722_v25  ;;  %v3996_v25 = vld [vmem:[%s8152_s9 + $0x18] sm:$0xff]  ;;  %v3995_v26 = vld [vmem:[%s8152_s9 + $0x10] sm:$0xff] }
0x1bf9   :  { %6511 = vmatprep.subr.mxu1 %v3996_v25 }
0x1bfa   :  { %v3723_v15 = vsub.f32 %v3711_v23, %v3721_v27  ;;  %v3726_v32 = vmul.f32 %v3724_v28, %v3724_v28  ;;  %v3994_v27 = vld [vmem:[%s8152_s9 + $0x8] sm:$0xff] }
0x1bfc   :  { %v3725_v31 = vmul.f32 %v3723_v15, %v3723_v15  ;;  %v3730_v29 = vsel %vm343_vm0, %v3726_v32, 0.0 }
0x1bfe   :  { %v3727_v33 = vsel %vm343_vm0, %v3725_v31, 0.0 }
0x1bff   :  { %3728 = vadd.xlane.f32.xlu0 %v3727_v33 }
0x1c03   :  { %3731 = vadd.xlane.f32.xlu0 %v3730_v29 }
0x1c88   :  { %v3729_v42 = vpop.xlane.xlu0 %3728 }
0x1c89   :  { %v3733_v43 = vmul.f32 0.03125, %v3729_v42 }
0x1c8b   :  { %v3735_v13 = vadd.f32 1e-05, %v3733_v43 }
0x1c8c   :  { %v3732_v44 = vpop.xlane.xlu0 %3731 }
0x1c8d   :  { %6800 = vrsqrt.f32 %v3735_v13  ;;  %v3734_v45 = vmul.f32 0.03125, %v3732_v44  ;;  %v6021_v44 = vld [vmem:[%s8155_s19] ss:$0 sm:$0xff] }
0x1c8f   :  { %v3736_v47 = vadd.f32 1e-05, %v3734_v45 }
0x1c91   :  { %6802 = vrsqrt.f32 %v3736_v47 }
0x1c9a   :  { %v6801_v34 = vpop.eup %6800 }
0x1c9b   :  { %v3739_v49 = vmul.f32 %v6801_v34, %v3723_v15 }
0x1c9d   :  { %v3747_v20 = vmul.f32 %v6011_v46, %v3739_v49 }
0x1c9e   :  { %v6803_v50 = vpop.eup %6802 }
0x1c9f   :  { %v3740_v51 = vmul.f32 %v6803_v50, %v3724_v28  ;;  %v3755_v53 = vadd.f32 %v6012_v48, %v3747_v20  ;;  %v3993_v28 = vld [vmem:[%s8152_s9] sm:$0xff] }
0x1ca1   :  { %v3748_v55 = vmul.f32 %v6011_v46, %v3740_v51  ;;  %6489 = vmatprep.mubr.msk.f32.mxu1 %vm343_vm0, %v3755_v53 }
0x1ca3   :  { %v3756_v56 = vadd.f32 %v6012_v48, %v3748_v55 }
0x1ca5   :  { %6490 = vmatmul.mubr.msk.f32.vlgmr.msra.gmra.mxu1 %vm343_vm0, %v3756_v56 }
0x1ca6   :  { %6512 = vmatpush3.msra.mxu1 %v3996_v25 }
0x1ca7   :  { %6513 = vmatprep.subr.mxu1 %v3995_v26 }
0x1ca8   :  { %6514 = vmatpush3.msra.mxu1 %v3995_v26 }
0x1ca9   :  { %6515 = vmatprep.subr.mxu1 %v3994_v27 }
0x1caa   :  { %6516 = vmatpush3.msra.mxu1 %v3994_v27 }
0x1cab   :  { %6517 = vmatprep.subr.mxu1 %v3993_v28 }
0x1cac   :  { %6518 = vmatpush3.msra.mxu1 %v3993_v28  ;;  %v4248_v28 = vld [vmem:[%s8157_s23 + $0x10] sm:$0xff] }
0x1d65   :  { %v6491_v61 = vpop.f32.mrf.mxu1 }
0x1d66   :  { %v3846_v52 = vadd.f32 %v6491_v61, %v6013_v60 }
0x1d67   :  { %v3840_v62 = vpop.f32.mrf.mxu1 }
0x1d68   :  { %v3841_v63 = vadd.f32 %v6013_v60, %v3840_v62  ;;  %v3850_v1 = vmax.f32 %v3846_v52, 0.0  ;;  %v7235_v52 = vmov 65   ;;  %v7236_v62 = vmov 64  }
0x1d69   :  { %6726 = vset.pattern.permute.xlu0 %v7235_v52  ;;  %6725 = vset.pattern.permute.xlu1 %v7236_v62 }
0x1d6a   :  { %v3849_v0 = vmax.f32 %v3841_v63, 0.0  ;;  %v4148_v63 = vld [vmem:[%s8156_s22 + $0x38] sm:$0xff] }
0x1d6b   :  { %6522 = vmatprep.subr.mxu1 %v4148_v63 }
0x1d6c   :  { %6508 = vmatprep.mubr.msk.f32.mxu0 %vm2035_vm5, %v3849_v0  ;;  %v4147_v0 = vld [vmem:[%s8156_s22 + $0x30] sm:$0xff] }
0x1d6d   :  { %6509 = vmatmul.mubr.msk.f32.vlgmr.msra.gmra.mxu0 %vm2035_vm5, %v3850_v1 }
0x1e2d   :  { %v6510_v3 = vpop.f32.mrf.mxu0 }
0x1e2e   :  { %v3944_v54 = vadd.f32 %v6510_v3, %v6016_v2  ;;  %v4146_v3 = vld [vmem:[%s8156_s22 + $0x28] sm:$0xff] }
0x1e2f   :  { %v3938_v6 = vpop.f32.mrf.mxu0 }
0x1e30   :  { %v3939_v7 = vadd.f32 %v6016_v2, %v3938_v6  ;;  %v3948_v8 = vadd.f32 %v3944_v54, %v3756_v56  ;;  %v4145_v6 = vld [vmem:[%s8156_s22 + $0x20] sm:$0xff] }
0x1e32   :  { %v3947_v12 = vadd.f32 %v3939_v7, %v3755_v53  ;;  %v3954_v14 = vsel %vm343_vm0, %v3948_v8, 0.0 }
0x1e33   :  { %3955 = vadd.xlane.f32.xlu0 %v3954_v14  ;;  %v4143_v14 = vld [vmem:[%s8156_s22 + $0x10] sm:$0xff] }
0x1e34   :  { %v3951_v10 = vsel %vm343_vm0, %v3947_v12, 0.0 }
0x1e35   :  { %3952 = vadd.xlane.f32.xlu1 %v3951_v10 }
0x1ebc   :  { %v3956_v17 = vpop.xlane.xlu0 %3955 }
0x1ebd   :  { %v3958_v4 = vmul.f32 0.03125, %v3956_v17  ;;  %v4142_v17 = vld [vmem:[%s8156_s22 + $0x8] sm:$0xff] }
0x1ebe   :  { %v3953_v9 = vpop.xlane.xlu1 %3952 }
0x1ebf   :  { %v3960_v18 = vsub.f32 %v3948_v8, %v3958_v4  ;;  %v3957_v19 = vmul.f32 0.03125, %v3953_v9  ;;  %v4141_v4 = vld [vmem:[%s8156_s22] sm:$0xff]  ;;  %v4249_v9 = vld [vmem:[%s8157_s23 + $0x18] sm:$0xff] }
0x1ec0   :  { %6541 = vmatprep.subr.mxu0 %v4249_v9 }
0x1ec1   :  { %v3959_v21 = vsub.f32 %v3947_v12, %v3957_v19  ;;  %v3962_v22 = vmul.f32 %v3960_v18, %v3960_v18  ;;  %v4144_v12 = vld [vmem:[%s8156_s22 + $0x18] sm:$0xff]  ;;  %6542 = vmatpush3.msra.mxu0 %v4249_v9 }
0x1ec2   :  { %6543 = vmatprep.subr.mxu0 %v4248_v28 }
0x1ec3   :  { %v3966_v23 = vsel %vm343_vm0, %v3962_v22, 0.0  ;;  %v3961_v5 = vmul.f32 %v3959_v21, %v3959_v21  ;;  %6544 = vmatpush3.msra.mxu0 %v4248_v28 }
0x1ec4   :  { %3967 = vadd.xlane.f32.xlu0 %v3966_v23 }
0x1ec5   :  { %v3963_v24 = vsel %vm343_vm0, %v3961_v5, 0.0 }
0x1ec6   :  { %3964 = vadd.xlane.f32.xlu1 %v3963_v24 }
0x1f4d   :  { %v3968_v15 = vpop.xlane.xlu0 %3967 }
0x1f4e   :  { %v3970_v31 = vmul.f32 0.03125, %v3968_v15  ;;  %v4247_v15 = vld [vmem:[%s8157_s23 + $0x8] sm:$0xff] }
0x1f4f   :  { %v3965_v33 = vpop.xlane.xlu1 %3964  ;;  %6545 = vmatprep.subr.mxu0 %v4247_v15 }
0x1f50   :  { %v3972_v32 = vadd.f32 1e-05, %v3970_v31  ;;  %v3969_v29 = vmul.f32 0.03125, %v3965_v33  ;;  %v4246_v31 = vld [vmem:[%s8157_s23] sm:$0xff]  ;;  %6546 = vmatpush3.msra.mxu0 %v4247_v15 }
0x1f51   :  { %6547 = vmatprep.subr.mxu0 %v4246_v31  ;;  %v6025_v33 = vld [vmem:[%s8158_s28 + $0x1] ss:$0 sm:$0xff] }
0x1f52   :  { %6804 = vrsqrt.f32 %v3972_v32  ;;  %v3971_v35 = vadd.f32 1e-05, %v3969_v29  ;;  %6548 = vmatpush3.msra.mxu0 %v4246_v31  ;;  %v6024_v32 = vld [vmem:[%s8158_s28] ss:$0 sm:$0xff] }
0x1f53   :  { %6552 = vmatprep.subr.mxu0 %v7220_v11 }
0x1f54   :  { %6806 = vrsqrt.f32 %v3971_v35 }
0x1f5f   :  { %v6805_v36 = vpop.eup %6804 }
0x1f60   :  { %v3976_v38 = vmul.f32 %v6805_v36, %v3960_v18 }
0x1f61   :  { %v6807_v39 = vpop.eup %6806 }
0x1f62   :  { %v3975_v40 = vmul.f32 %v6807_v39, %v3959_v21  ;;  %v3984_v41 = vmul.f32 %v6019_v37, %v3976_v38 }
0x1f64   :  { %v3983_v42 = vmul.f32 %v6019_v37, %v3975_v40  ;;  %v3992_v13 = vadd.f32 %v6020_v16, %v3984_v41 }
0x1f66   :  { %v3991_v43 = vadd.f32 %v6020_v16, %v3983_v42 }
0x1f68   :  { %6519 = vmatprep.mubr.msk.f32.mxu1 %vm343_vm0, %v3991_v43 }
0x1f69   :  { %6520 = vmatmul.mubr.msk.f32.vlgmr.msra.gmra.mxu1 %vm343_vm0, %v3992_v13  ;;  %v6028_v13 = vld [vmem:[%s8159_s8] ss:$0 sm:$0xff] }
0x1f6a   :  { %6523 = vmatpush3.msra.mxu1 %v4148_v63 }
0x1f6b   :  { %6524 = vmatprep.subr.mxu1 %v4147_v0 }
0x1f6c   :  { %6525 = vmatpush3.msra.mxu1 %v4147_v0 }
0x1f6d   :  { %6526 = vmatprep.subr.mxu1 %v4146_v3 }
0x1f6e   :  { %6527 = vmatpush3.msra.mxu1 %v4146_v3 }
0x1f6f   :  { %6528 = vmatprep.subr.mxu1 %v4145_v6 }
0x1f70   :  { %6529 = vmatpush3.msra.mxu1 %v4145_v6 }
0x1f71   :  { %6530 = vmatprep.subr.mxu1 %v4144_v12 }
0x1f72   :  { %6531 = vmatpush3.msra.mxu1 %v4144_v12 }
0x1f73   :  { %6532 = vmatprep.subr.mxu1 %v4143_v14 }
0x1f74   :  { %6533 = vmatpush3.msra.mxu1 %v4143_v14 }
0x1f75   :  { %6534 = vmatprep.subr.mxu1 %v4142_v17 }
0x1f76   :  { %6535 = vmatpush3.msra.mxu1 %v4142_v17 }
0x1f77   :  { %6536 = vmatprep.subr.mxu1 %v4141_v4 }
0x1f78   :  { %6537 = vmatpush3.msra.mxu1 %v4141_v4 }
0x1f79   :  { %6557 = vmatprep.subr.mxu1 %v7220_v11 }
0x2029   :  { %v6521_v45 = vpop.f32.mrf.mxu1 }
0x202a   :  { %v7894_v47 = vadd.f32 %v6521_v45, %v6021_v44 }
0x202b   :  { %v4076_v34 = vpop.f32.mrf.mxu1 }
0x202c   :  { %v7896_v46 = vadd.f32 %v6021_v44, %v4076_v34  ;;  %v4091_v49 = vsel %vm4087_vm6, %v7894_v47, -inf  ;;  %v4086_v24 = vmax.f32 %v7894_v47, 0.0 }
0x202d   :  { %4092 = vmax.xlane.f32.xlu0 %v4091_v49 }
0x202e   :  { %v4088_v48 = vsel %vm4087_vm6, %v7896_v46, -inf  ;;  %v4085_v21 = vmax.f32 %v7896_v46, 0.0 }
0x202f   :  { %4089 = vmax.xlane.f32.xlu1 %v4088_v48 }
0x20b6   :  { %v4093_v20 = vpop.xlane.xlu0 %4092 }
0x20b7   :  { %v4095_v50 = vsub.f32 %v7894_v47, %v4093_v20 }
0x20b8   :  { %v4090_v51 = vpop.xlane.xlu1 %4089 }
0x20b9   :  { %v4098_v53 = vmul.f32 1.442695, %v4095_v50  ;;  %v4094_v55 = vsub.f32 %v7896_v46, %v4090_v51 }
0x20bb   :  { %6808 = vpow2.f32 %v4098_v53  ;;  %v4096_v56 = vmul.f32 1.442695, %v4094_v55 }
0x20bd   :  { %6810 = vpow2.f32 %v4096_v56 }
0x20c8   :  { %v6809_v57 = vpop.eup %6808 }
0x20c9   :  { %4104 = vrot.lane.b32.xlu0 %v6809_v57, %s7223_s20 }
0x20ca   :  { %v6811_v30 = vpop.eup %6810 }
0x20cb   :  { %4102 = vrot.lane.b32.xlu1 %v6811_v30, %s7223_s20 }
0x213b   :  { %v4105_v58 = vpop.permute.xlu0 %4104 }
0x213c   :  { %v4112_v59 = vsel %vm4108_vm7, %v4105_v58, 0.0 }
0x213d   :  { %4113 = vadd.xlane.f32.xlu0 %v4112_v59  ;;  %v4103_v60 = vpop.permute.xlu1 %4102 }
0x213e   :  { %v4109_v61 = vsel %vm4108_vm7, %v4103_v60, 0.0 }
0x213f   :  { %4110 = vadd.xlane.f32.xlu1 %v4109_v61 }
0x21c6   :  { %v4114_v1 = vpop.xlane.xlu0 %4113 }
0x21c8   :  { %v4111_v2 = vpop.xlane.xlu1 %4110 }
0x21c9   :  { %6812 = vrcp.f32 %v4111_v2 }
0x21ca   :  { %6814 = vrcp.f32 %v4114_v1 }
0x21d6   :  { %v6813_v54 = vpop.eup %6812 }
0x21d7   :  { %v4116_v7 = vmul.f32 %v6813_v54, %v6811_v30  ;;  %v6815_v8 = vpop.eup %6814 }
0x21d8   :  { %v4118_v10 = vmul.f32 %v6815_v8, %v6809_v57 }
0x21d9   :  { %4130 = vperm.xlu0 %6726, %v4116_v7   ;;  %4121 = vperm.xlu1 %6725, %v4116_v7  }
0x21dd   :  { %4126 = vperm.xlu1 %6725, %v4118_v10  }
0x21e1   :  { %6727 = vset.pattern.permute.xlu1 %v7235_v52 }
0x21e2   :  { %4134 = vperm.xlu1 %6727, %v4118_v10  }
0x2254   :  { %v4131_v18 = vpop.permute.xlu0 %4130  ;;  %v4122_v19 = vpop.permute.xlu1 %4121 }
0x2255   :  { %v4137_v22 = vsel %vm343_vm0, %v4122_v19, %v4131_v18  ;;  %v4161_v29 = vmul.f32 %v6025_v33, %v4131_v18  ;;  %v4154_v35 = vmul.f32 %v6024_v32, %v4122_v19 }
0x2256   :  { %v4139_v23 = vmul.f32 %v4137_v22, %v4085_v21 }
0x2257   :  { %v4163_v39 = vadd.f32 %v4161_v29, %v4154_v35 }
0x2258   :  { %v4127_v5 = vpop.permute.xlu1 %4126  ;;  %6538 = vmatprep.mubr.msk.f32.mxu1 %vm2035_vm5, %v4139_v23 }
0x2259   :  { %v4155_v37 = vmul.f32 %v6024_v32, %v4127_v5 }
0x225d   :  { %v4135_v25 = vpop.permute.xlu1 %4134 }
0x225e   :  { %v4138_v26 = vsel %vm343_vm0, %v4127_v5, %v4135_v25  ;;  %v4162_v36 = vmul.f32 %v6025_v33, %v4135_v25 }
0x225f   :  { %v4140_v27 = vmul.f32 %v4138_v26, %v4086_v24 }
0x2260   :  { %v4164_v40 = vadd.f32 %v4162_v36, %v4155_v37 }
0x2261   :  { %6539 = vmatmul.mubr.msk.f32.vlgmr.msra.gmra.mxu1 %vm2035_vm5, %v4140_v27 }
0x2262   :  { %6559 = vmatprep.mubr.msk.f32.mxu1 %vm7221_vm1, %v7220_v11 }
0x2321   :  { %v6540_v38 = vpop.f32.mrf.mxu1 }
0x2322   :  { %v4243_v42 = vadd.f32 %v6540_v38, %v4164_v40 }
0x2323   :  { %v4237_v41 = vpop.f32.mrf.mxu1 }
0x2324   :  { %v4238_v16 = vadd.f32 %v4237_v41, %v4163_v39 }
0x2326   :  { %6549 = vmatprep.mubr.msk.f32.mxu0 %vm343_vm0, %v4238_v16 }
0x2327   :  { %6550 = vmatmul.mubr.msk.f32.vlgmr.msra.gmra.mxu0 %vm343_vm0, %v4243_v42 }
0x2328   :  { %6554 = vmatprep.mubr.msk.f32.mxu0 %vm7221_vm1, %v7220_v11 }
0x23e7   :  { %v6551_v43 = vpop.f32.mrf.mxu0 }
0x23e8   :  { %v7937_v47 = vadd.f32 %v6551_v43, %v6028_v13 }
0x23e9   :  { %v4334_v44 = vpop.f32.mrf.mxu0 }
0x23ea   :  { %v7933_v45 = vadd.f32 %v6028_v13, %v4334_v44 }
0x23ec   :  { %4344 = vrot.lane.b32.xlu1 %v7933_v45, %s7222_s12 }
0x23f0   :  { %4421 = vrot.lane.b32.xlu1 %v7937_v47, %s7222_s12  ;;  %s8160_s12 = sld [smem:[#allocation54_spill]] }
0x245e   :  { %v4345_v34 = vpop.permute.xlu1 %4344 }
0x245f   :  { %6553 = vmatpush3.xpose.msk.msra.mxu0 %vm428_vm2, %v4345_v34 }
0x2460   :  { %6562 = vmatprep.subr.mxu0 %v7220_v11 }
0x2462   :  { %6555 = vmatmul.mubr.msk.f32.vlgmr.msra.gmra.mxu0 %vm428_vm2, %v7933_v45  ;;  %v4422_v46 = vpop.permute.xlu1 %4421 }
0x2463   :  { %6558 = vmatpush3.xpose.msk.msra.mxu1 %vm428_vm2, %v4422_v46  ;;  %6564 = vmatprep.mubr.msk.f32.mxu0 %vm7221_vm1, %v7220_v11 }
0x2464   :  { %6567 = vmatprep.subr.mxu1 %v7220_v11 }
0x2466   :  { %6560 = vmatmul.mubr.msk.f32.vlgmr.msra.gmra.mxu1 %vm428_vm2, %v7937_v47 }
0x2467   :  { %6569 = vmatprep.mubr.msk.f32.mxu1 %vm7221_vm1, %v7220_v11 }
0x2522   :  { %v4416_v49 = vpop.f32.mrf.mxu0 }
0x2523   :  { %v4497_v48 = vmul.f32 0.35355338, %v4416_v49 }
0x2524   :  { %v6556_v20 = vpop.f32.mrf.mxu0 }
0x2525   :  { %v4499_v50 = vsel %vm428_vm2, %v4497_v48, -inf }
0x2526   :  { %4500 = vmax.xlane.f32.xlu1 %v4499_v50  ;;  %v4493_v51 = vpop.f32.mrf.mxu1 }
0x2527   :  { %v4498_v53 = vmul.f32 0.35355338, %v4493_v51 }
0x2528   :  { %v6561_v55 = vpop.f32.mrf.mxu1 }
0x2529   :  { %v4502_v56 = vsel %vm428_vm2, %v4498_v53, -inf }
0x252a   :  { %4503 = vmax.xlane.f32.xlu0 %v4502_v56 }
0x2537   :  { %4521 = vrot.lane.b32.xlu1 %v7933_v45, %s7223_s20 }
0x253b   :  { %4675 = vrot.lane.b32.xlu1 %v7933_v45, %s7224_s7 }
0x253f   :  { %4753 = vrot.lane.b32.xlu1 %v7937_v47, %s7224_s7 }
0x2540   :  { %4597 = vrot.lane.b32.xlu0 %v7937_v47, %s7223_s20  ;;  %s7237_s20 = smov [#allocation25]  }
0x2541   :  { %s5885_s7 = sshll.u32 %s7237_s20, 4  ;;  %s5886_s7 = int_to_ptr.vmem [resolvable:$true] %s5885_s7 }
0x2542   :  { %p7134_p1 = scmp.lt.s32.totalorder %s5886_s7, %s5886_s7 }
0x2544   :  { %4673 = vrot.lane.b32.xlu0 %v7933_v45, %s7225_s21 }
0x25af   :  { %v4501_v57 = vpop.xlane.xlu1 %4500 }
0x25b0   :  { %v4505_v30 = vsub.f32 %v4497_v48, %v4501_v57 }
0x25b2   :  { %v4507_v61 = vmul.f32 1.442695, %v4505_v30 }
0x25b3   :  { %v4504_v58 = vpop.xlane.xlu0 %4503  ;;  %v4522_v59 = vpop.permute.xlu1 %4521 }
0x25b4   :  { %v4506_v60 = vsub.f32 %v4498_v53, %v4504_v58  ;;  %6563 = vmatpush3.msra.mxu0 %v4522_v59 }
0x25b5   :  { %6572 = vmatprep.subr.mxu0 %v7220_v11 }
0x25b6   :  { %v4509_v52 = vmul.f32 1.442695, %v4506_v60 }
0x25b7   :  { %v4598_v62 = vpop.permute.xlu0 %4597  ;;  %v4676_v3 = vpop.permute.xlu1 %4675 }
0x25b8   :  { %6816 = vpow2.f32 %v4509_v52  ;;  %6568 = vmatpush3.msra.mxu1 %v4598_v62 }
0x25b9   :  { %6577 = vmatprep.subr.mxu1 %v7220_v11  ;;  %6818 = vpow2.f32 %v4507_v61 }
0x25bb   :  { %v4754_v54 = vpop.permute.xlu1 %4753  ;;  %v4674_v4 = vpop.permute.xlu0 %4673 }
0x25c5   :  { %v6817_v63 = vpop.eup %6816 }
0x25c6   :  { %v4514_v0 = vsel %vm428_vm2, %v6817_v63, 0.0  ;;  %v6819_v1 = vpop.eup %6818 }
0x25c7   :  { %4515 = vadd.xlane.f32.xlu1 %v4514_v0  ;;  %v4511_v2 = vsel %vm428_vm2, %v6819_v1, 0.0 }
0x25cb   :  { %4512 = vadd.xlane.f32.xlu1 %v4511_v2 }
0x25dc   :  { %4751 = vrot.lane.b32.xlu1 %v7937_v47, %s7225_s21 }
0x2650   :  { %v4516_v6 = vpop.xlane.xlu1 %4515 }
0x2651   :  { %6820 = vrcp.f32 %v4516_v6 }
0x2654   :  { %v4513_v7 = vpop.xlane.xlu1 %4512 }
0x2655   :  { %6822 = vrcp.f32 %v4513_v7 }
0x2658   :  { %v4752_v17 = vpop.permute.xlu1 %4751 }
0x265e   :  { %v6821_v8 = vpop.eup %6820 }
0x265f   :  { %v4520_v12 = vmul.f32 %v6821_v8, %v6817_v63 }
0x2661   :  { %6570 = vmatmul.mubr.msk.f32.vlgmr.msra.gmra.mxu1 %vm428_vm2, %v4520_v12 }
0x2662   :  { %v6823_v14 = vpop.eup %6822  ;;  %6578 = vmatpush3.xpose.msk.msra.mxu1 %vm428_vm2, %v4754_v54  ;;  %6579 = vmatprep.mubr.msk.f32.mxu1 %vm7221_vm1, %v7220_v11 }
0x2663   :  { %v4518_v10 = vmul.f32 %v6823_v14, %v6819_v1  ;;  %6587 = vmatprep.subr.mxu1 %v7220_v11 }
0x2665   :  { %6565 = vmatmul.mubr.msk.f32.vlgmr.msra.gmra.mxu0 %vm428_vm2, %v4518_v10  ;;  %6580 = vmatmul.mubr.msk.f32.vlgmr.msra.gmra.mxu1 %vm428_vm2, %v4752_v17 }
0x2666   :  { %6573 = vmatpush3.xpose.msk.msra.mxu0 %vm428_vm2, %v4676_v3  ;;  %6574 = vmatprep.mubr.msk.f32.mxu0 %vm7221_vm1, %v7220_v11 }
0x2667   :  { %6582 = vmatprep.subr.mxu0 %v7220_v11  ;;  %6589 = vmatprep.mubr.msk.f32.mxu1 %vm7221_vm1, %v7220_v11 }
0x2669   :  { %6575 = vmatmul.mubr.msk.f32.vlgmr.msra.gmra.mxu0 %vm428_vm2, %v4674_v4 }
0x266a   :  { %6584 = vmatprep.mubr.msk.f32.mxu0 %vm7221_vm1, %v7220_v11 }
0x2721   :  { %v7987_v9 = vpop.f32.mrf.mxu1 }
0x2723   :  { %v6571_v18 = vpop.f32.mrf.mxu1 }
0x2725   :  { %v7989_v19 = vpop.f32.mrf.mxu0  ;;  %v4825_v21 = vpop.f32.mrf.mxu1 }
0x2726   :  { %v4830_v22 = vmul.f32 0.35355338, %v4825_v21 }
0x2727   :  { %v6566_v23 = vpop.f32.mrf.mxu0  ;;  %v6581_v5 = vpop.f32.mrf.mxu1 }
0x2728   :  { %v4834_v24 = vsel %vm428_vm2, %v4830_v22, -inf }
0x2729   :  { %v4747_v25 = vpop.f32.mrf.mxu0  ;;  %4835 = vmax.xlane.f32.xlu1 %v4834_v24 }
0x272a   :  { %v4829_v26 = vmul.f32 0.35355338, %v4747_v25 }
0x272b   :  { %v6576_v27 = vpop.f32.mrf.mxu0 }
0x272c   :  { %v4831_v28 = vsel %vm428_vm2, %v4829_v26, -inf }
0x272d   :  { %4832 = vmax.xlane.f32.xlu0 %v4831_v28 }
0x273a   :  { %4853 = vrot.lane.b32.xlu1 %v7933_v45, %s7226_s5 }
0x273e   :  { %5007 = vrot.lane.b32.xlu1 %v7933_v45, %s7227_s10 }
0x2742   :  { %5085 = vrot.lane.b32.xlu1 %v7937_v47, %s7227_s10 }
0x2746   :  { %5083 = vrot.lane.b32.xlu1 %v7937_v47, %s7228_s11 }
0x27b2   :  { %v4836_v15 = vpop.xlane.xlu1 %4835 }
0x27b3   :  { %v4838_v31 = vsub.f32 %v4830_v22, %v4836_v15 }
0x27b5   :  { %v4841_v33 = vmul.f32 1.442695, %v4838_v31 }
0x27b6   :  { %v4833_v32 = vpop.xlane.xlu0 %4832  ;;  %v4854_v29 = vpop.permute.xlu1 %4853 }
0x27b7   :  { %6824 = vpow2.f32 %v4841_v33  ;;  %v4837_v35 = vsub.f32 %v4829_v26, %v4833_v32  ;;  %6583 = vmatpush3.msra.mxu0 %v4854_v29 }
0x27b8   :  { %6592 = vmatprep.subr.mxu0 %v7220_v11 }
0x27b9   :  { %v4839_v36 = vmul.f32 1.442695, %v4837_v35 }
0x27ba   :  { %v5008_v42 = vpop.permute.xlu1 %5007 }
0x27bb   :  { %6826 = vpow2.f32 %v4839_v36 }
0x27be   :  { %v5086_v44 = vpop.permute.xlu1 %5085 }
0x27c2   :  { %v5084_v48 = vpop.permute.xlu1 %5083 }
0x27c4   :  { %v6825_v37 = vpop.eup %6824 }
0x27c5   :  { %v4846_v38 = vsel %vm428_vm2, %v6825_v37, 0.0 }
0x27c6   :  { %4847 = vadd.xlane.f32.xlu0 %v4846_v38 }
0x27c8   :  { %v6827_v39 = vpop.eup %6826 }
0x27c9   :  { %v4843_v40 = vsel %vm428_vm2, %v6827_v39, 0.0 }
0x27ca   :  { %4844 = vadd.xlane.f32.xlu0 %v4843_v40 }
0x27e0   :  { %4929 = vrot.lane.b32.xlu0 %v7937_v47, %s7226_s5 }
0x27e4   :  { %5005 = vrot.lane.b32.xlu0 %v7933_v45, %s7228_s11 }
0x284f   :  { %v4848_v41 = vpop.xlane.xlu0 %4847 }
0x2850   :  { %6828 = vrcp.f32 %v4848_v41 }
0x2853   :  { %v4845_v16 = vpop.xlane.xlu0 %4844 }
0x2854   :  { %6830 = vrcp.f32 %v4845_v16 }
0x2857   :  { %v4930_v43 = vpop.permute.xlu0 %4929 }
0x2858   :  { %6588 = vmatpush3.msra.mxu1 %v4930_v43 }
0x2859   :  { %6597 = vmatprep.subr.mxu1 %v7220_v11 }
0x285b   :  { %v5006_v20 = vpop.permute.xlu0 %5005 }
0x285d   :  { %v6829_v13 = vpop.eup %6828 }
0x285e   :  { %v4852_v34 = vmul.f32 %v6829_v13, %v6825_v37 }
0x2860   :  { %6590 = vmatmul.mubr.msk.f32.vlgmr.msra.gmra.mxu1 %vm428_vm2, %v4852_v34 }
0x2861   :  { %v6831_v46 = vpop.eup %6830  ;;  %6598 = vmatpush3.xpose.msk.msra.mxu1 %vm428_vm2, %v5086_v44  ;;  %6599 = vmatprep.mubr.msk.f32.mxu1 %vm7221_vm1, %v7220_v11 }
0x2862   :  { %v4850_v49 = vmul.f32 %v6831_v46, %v6827_v39  ;;  %6607 = vmatprep.subr.mxu1 %v7220_v11 }
0x2864   :  { %6585 = vmatmul.mubr.msk.f32.vlgmr.msra.gmra.mxu0 %vm428_vm2, %v4850_v49  ;;  %6600 = vmatmul.mubr.msk.f32.vlgmr.msra.gmra.mxu1 %vm428_vm2, %v5084_v48 }
0x2865   :  { %6593 = vmatpush3.xpose.msk.msra.mxu0 %vm428_vm2, %v5008_v42  ;;  %6594 = vmatprep.mubr.msk.f32.mxu0 %vm7221_vm1, %v7220_v11 }
0x2866   :  { %6602 = vmatprep.subr.mxu0 %v7220_v11  ;;  %6609 = vmatprep.mubr.msk.f32.mxu1 %vm7221_vm1, %v7220_v11 }
0x2868   :  { %6595 = vmatmul.mubr.msk.f32.vlgmr.msra.gmra.mxu0 %vm428_vm2, %v5006_v20 }
0x2869   :  { %6604 = vmatprep.mubr.msk.f32.mxu0 %vm7221_vm1, %v7220_v11 }
0x2920   :  { %v8025_v50 = vpop.f32.mrf.mxu1 }
0x2922   :  { %v6591_v51 = vpop.f32.mrf.mxu1 }
0x2924   :  { %v8027_v53 = vpop.f32.mrf.mxu0  ;;  %v5157_v55 = vpop.f32.mrf.mxu1 }
0x2925   :  { %v5162_v56 = vmul.f32 0.35355338, %v5157_v55  ;;  %v4253_v55 = vld [vmem:[%s8160_s12 + $0x10] sm:$0xff] }
0x2926   :  { %v6586_v57 = vpop.f32.mrf.mxu0  ;;  %v6601_v30 = vpop.f32.mrf.mxu1 }
0x2927   :  { %v5166_v58 = vsel %vm428_vm2, %v5162_v56, -inf  ;;  %v4251_v57 = vld [vmem:[%s8160_s12] sm:$0xff]  ;;  %v5789_v30 = vld [vmem:[%s7421_s17 + $0x18] sm:$0xff] }
0x2928   :  { %v5079_v59 = vpop.f32.mrf.mxu0  ;;  %5167 = vmax.xlane.f32.xlu1 %v5166_v58 }
0x2929   :  { %v5161_v60 = vmul.f32 0.35355338, %v5079_v59 }
0x292a   :  { %v6596_v61 = vpop.f32.mrf.mxu0 }
0x292b   :  { %v5163_v52 = vsel %vm428_vm2, %v5161_v60, -inf }
0x292c   :  { %5164 = vmax.xlane.f32.xlu0 %v5163_v52 }
0x2939   :  { %5185 = vrot.lane.b32.xlu1 %v7933_v45, %s7229_s15 }
0x293d   :  { %5339 = vrot.lane.b32.xlu1 %v7933_v45, %s7230_s16 }
0x2941   :  { %5417 = vrot.lane.b32.xlu1 %v7937_v47, %s7230_s16 }
0x2945   :  { %5415 = vrot.lane.b32.xlu1 %v7937_v47, %s7231_s0 }
0x29b1   :  { %v5168_v62 = vpop.xlane.xlu1 %5167 }
0x29b2   :  { %v5170_v63 = vsub.f32 %v5162_v56, %v5168_v62  ;;  %v4252_v56 = vld [vmem:[%s8160_s12 + $0x8] sm:$0xff] }
0x29b4   :  { %v5173_v0 = vmul.f32 1.442695, %v5170_v63 }
0x29b5   :  { %v5165_v1 = vpop.xlane.xlu0 %5164  ;;  %v5186_v2 = vpop.permute.xlu1 %5185 }
0x29b6   :  { %6832 = vpow2.f32 %v5173_v0  ;;  %v5169_v3 = vsub.f32 %v5161_v60, %v5165_v1  ;;  %6603 = vmatpush3.msra.mxu0 %v5186_v2 }
0x29b7   :  { %6612 = vmatprep.subr.mxu0 %v7220_v11 }
0x29b8   :  { %v5171_v54 = vmul.f32 1.442695, %v5169_v3 }
0x29b9   :  { %v5340_v17 = vpop.permute.xlu1 %5339 }
0x29ba   :  { %6834 = vpow2.f32 %v5171_v54 }
0x29bd   :  { %v5418_v21 = vpop.permute.xlu1 %5417 }
0x29c1   :  { %v5416_v24 = vpop.permute.xlu1 %5415 }
0x29c3   :  { %v6833_v6 = vpop.eup %6832 }
0x29c4   :  { %v5178_v7 = vsel %vm428_vm2, %v6833_v6, 0.0 }
0x29c5   :  { %5179 = vadd.xlane.f32.xlu0 %v5178_v7 }
0x29c7   :  { %v6835_v8 = vpop.eup %6834 }
0x29c8   :  { %v5175_v12 = vsel %vm428_vm2, %v6835_v8, 0.0 }
0x29c9   :  { %5176 = vadd.xlane.f32.xlu0 %v5175_v12 }
0x29df   :  { %5261 = vrot.lane.b32.xlu0 %v7937_v47, %s7229_s15 }
0x29e3   :  { %5337 = vrot.lane.b32.xlu0 %v7933_v45, %s7231_s0 }
0x2a4e   :  { %v5180_v14 = vpop.xlane.xlu0 %5179 }
0x2a4f   :  { %6836 = vrcp.f32 %v5180_v14  ;;  %v5788_v14 = vld [vmem:[%s7421_s17 + $0x10] sm:$0xff] }
0x2a52   :  { %v5177_v10 = vpop.xlane.xlu0 %5176 }
0x2a53   :  { %6838 = vrcp.f32 %v5177_v10 }
0x2a56   :  { %v5262_v4 = vpop.permute.xlu0 %5261 }
0x2a57   :  { %6608 = vmatpush3.msra.mxu1 %v5262_v4 }
0x2a58   :  { %6617 = vmatprep.subr.mxu1 %v7220_v11 }
0x2a5a   :  { %v5338_v25 = vpop.permute.xlu0 %5337 }
0x2a5c   :  { %v6837_v18 = vpop.eup %6836 }
0x2a5d   :  { %v5184_v22 = vmul.f32 %v6837_v18, %v6833_v6 }
0x2a5f   :  { %6610 = vmatmul.mubr.msk.f32.vlgmr.msra.gmra.mxu1 %vm428_vm2, %v5184_v22  ;;  %v6058_v22 = vld [vmem:[%s7426_s14] ss:$0 sm:$0xff] }
0x2a60   :  { %v6839_v23 = vpop.eup %6838  ;;  %6618 = vmatpush3.xpose.msk.msra.mxu1 %vm428_vm2, %v5418_v21  ;;  %6619 = vmatprep.mubr.msk.f32.mxu1 %vm7221_vm1, %v7220_v11 }
0x2a61   :  { %v5182_v5 = vmul.f32 %v6839_v23, %v6835_v8  ;;  %6627 = vmatprep.subr.mxu1 %v7220_v11 }
0x2a63   :  { %6605 = vmatmul.mubr.msk.f32.vlgmr.msra.gmra.mxu0 %vm428_vm2, %v5182_v5  ;;  %6620 = vmatmul.mubr.msk.f32.vlgmr.msra.gmra.mxu1 %vm428_vm2, %v5416_v24 }
0x2a64   :  { %6613 = vmatpush3.xpose.msk.msra.mxu0 %vm428_vm2, %v5340_v17  ;;  %6614 = vmatprep.mubr.msk.f32.mxu0 %vm7221_vm1, %v7220_v11  ;;  %v6055_v17 = vld [vmem:[%s7416_s25] ss:$0 sm:$0xff] }
0x2a65   :  { %6622 = vmatprep.subr.mxu0 %v7220_v11  ;;  %6629 = vmatprep.mubr.msk.f32.mxu1 %vm7221_vm1, %v7220_v11 }
0x2a67   :  { %6615 = vmatmul.mubr.msk.f32.vlgmr.msra.gmra.mxu0 %vm428_vm2, %v5338_v25 }
0x2a68   :  { %6624 = vmatprep.mubr.msk.f32.mxu0 %vm7221_vm1, %v7220_v11 }
0x2b1f   :  { %v5333_v26 = vpop.f32.mrf.mxu1 }
0x2b21   :  { %v6611_v27 = vpop.f32.mrf.mxu1 }
0x2b23   :  { %v5257_v28 = vpop.f32.mrf.mxu0  ;;  %v5489_v15 = vpop.f32.mrf.mxu1 }
0x2b24   :  { %v5494_v31 = vmul.f32 0.35355338, %v5489_v15 }
0x2b25   :  { %v6606_v33 = vpop.f32.mrf.mxu0  ;;  %v6621_v32 = vpop.f32.mrf.mxu1 }
0x2b26   :  { %v5498_v29 = vsel %vm428_vm2, %v5494_v31, -inf }
0x2b27   :  { %v5411_v35 = vpop.f32.mrf.mxu0  ;;  %5499 = vmax.xlane.f32.xlu1 %v5498_v29 }
0x2b28   :  { %v5493_v36 = vmul.f32 0.35355338, %v5411_v35 }
0x2b29   :  { %v6616_v37 = vpop.f32.mrf.mxu0 }
0x2b2a   :  { %v5495_v38 = vsel %vm428_vm2, %v5493_v36, -inf }
0x2b2b   :  { %5496 = vmax.xlane.f32.xlu0 %v5495_v38 }
0x2b38   :  { %5517 = vrot.lane.b32.xlu1 %v7933_v45, %s7232_s13 }
0x2b3c   :  { %5671 = vrot.lane.b32.xlu1 %v8027_v53, %s7212_s26 }
0x2b40   :  { %5673 = vrot.lane.b32.xlu1 %v8025_v50, %s7212_s26 }
0x2b44   :  { %5681 = vrot.lane.b32.xlu1 %v5333_v26, %s7233_s3 }
0x2bb0   :  { %v5500_v11 = vpop.xlane.xlu1 %5499 }
0x2bb1   :  { %v5502_v39 = vsub.f32 %v5494_v31, %v5500_v11 }
0x2bb3   :  { %v5505_v40 = vmul.f32 1.442695, %v5502_v39 }
0x2bb4   :  { %v5497_v41 = vpop.xlane.xlu0 %5496  ;;  %v5518_v16 = vpop.permute.xlu1 %5517 }
0x2bb5   :  { %6840 = vpow2.f32 %v5505_v40  ;;  %v5501_v42 = vsub.f32 %v5493_v36, %v5497_v41  ;;  %6623 = vmatpush3.msra.mxu0 %v5518_v16 }
0x2bb7   :  { %v5503_v43 = vmul.f32 1.442695, %v5501_v42 }
0x2bb8   :  { %v5672_v52 = vpop.permute.xlu1 %5671 }
0x2bb9   :  { %6842 = vpow2.f32 %v5503_v43  ;;  %v5693_v1 = vsel %vm428_vm2, %v7989_v19, %v5672_v52  ;;  %v5787_v19 = vld [vmem:[%s7421_s17 + $0x8] sm:$0xff] }
0x2bbc   :  { %v5674_v62 = vpop.permute.xlu1 %5673 }
0x2bbd   :  { %v5694_v3 = vsel %vm428_vm2, %v7987_v9, %v5674_v62  ;;  %v5786_v9 = vld [vmem:[%s7421_s17] sm:$0xff]  ;;  %s7129_s17 = scalar_lea.vmem %s5886_s7, 256 }
0x2bbe   :  { %p7130_p0 = scmp.ne.s32.totalorder %s5886_s7, %s7129_s17  ;;  %p7135_p2 = scmp.lt.s32.totalorder %s7129_s17, %s7129_s17 }
0x2bc0   :  { %v5682_v63 = vpop.permute.xlu1 %5681  ;;  %p7136_p3 = por %p7135_p2, %p7134_p1 }
0x2bc1   :  { %v5696_v7 = vsel %vm1786_vm4, %v5694_v3, %v5682_v63 }
0x2bc2   :  { %v6841_v13 = vpop.eup %6840  ;;  %p7137_p4 = pnand %p7136_p3, %p7130_p0 }
0x2bc3   :  { %v5510_v45 = vsel %vm428_vm2, %v6841_v13, 0.0 }
0x2bc4   :  { %5511 = vadd.xlane.f32.xlu0 %v5510_v45 }
0x2bc6   :  { %v6843_v44 = vpop.eup %6842 }
0x2bc7   :  { %v5507_v34 = vsel %vm428_vm2, %v6843_v44, 0.0 }
0x2bc8   :  { %5508 = vadd.xlane.f32.xlu0 %v5507_v34 }
0x2bde   :  { %5593 = vrot.lane.b32.xlu0 %v7937_v47, %s7232_s13  ;;  %v4254_v47 = vld [vmem:[%s8160_s12 + $0x18] sm:$0xff] }
0x2bdf   :  { %6632 = vmatprep.subr.mxu0 %v4254_v47 }
0x2be2   :  { %5679 = vrot.lane.b32.xlu0 %v5257_v28, %s7233_s3 }
0x2c4d   :  { %v5512_v46 = vpop.xlane.xlu0 %5511 }
0x2c4e   :  { %6844 = vrcp.f32 %v5512_v46 }
0x2c51   :  { %v5509_v49 = vpop.xlane.xlu0 %5508 }
0x2c52   :  { %6846 = vrcp.f32 %v5509_v49 }
0x2c55   :  { %v5594_v48 = vpop.permute.xlu0 %5593 }
0x2c56   :  { %6628 = vmatpush3.msra.mxu1 %v5594_v48 }
0x2c57   :  { %6643 = vmatprep.subr.mxu1 %v5789_v30 }
0x2c59   :  { %v5680_v0 = vpop.permute.xlu0 %5679 }
0x2c5a   :  { %v5695_v54 = vsel %vm1786_vm4, %v5693_v1, %v5680_v0 }
0x2c5b   :  { %v6845_v20 = vpop.eup %6844 }
0x2c5c   :  { %v5516_v50 = vmul.f32 %v6845_v20, %v6841_v13 }
0x2c5e   :  { %6630 = vmatmul.mubr.msk.f32.vlgmr.msra.gmra.mxu1 %vm428_vm2, %v5516_v50 }
0x2c5f   :  { %v6847_v51 = vpop.eup %6846  ;;  %6644 = vmatpush3.msra.mxu1 %v5789_v30 }
0x2c60   :  { %v5514_v53 = vmul.f32 %v6847_v51, %v6843_v44  ;;  %6645 = vmatprep.subr.mxu1 %v5788_v14 }
0x2c61   :  { %6646 = vmatpush3.msra.mxu1 %v5788_v14 }
0x2c62   :  { %6625 = vmatmul.mubr.msk.f32.vlgmr.msra.gmra.mxu0 %vm428_vm2, %v5514_v53  ;;  %6647 = vmatprep.subr.mxu1 %v5787_v19 }
0x2c63   :  { %6633 = vmatpush3.msra.mxu0 %v4254_v47  ;;  %6648 = vmatpush3.msra.mxu1 %v5787_v19 }
0x2c64   :  { %6634 = vmatprep.subr.mxu0 %v4253_v55  ;;  %6649 = vmatprep.subr.mxu1 %v5786_v9 }
0x2c65   :  { %6635 = vmatpush3.msra.mxu0 %v4253_v55  ;;  %6650 = vmatpush3.msra.mxu1 %v5786_v9 }
0x2c66   :  { %6636 = vmatprep.subr.mxu0 %v4252_v56 }
0x2c67   :  { %6637 = vmatpush3.msra.mxu0 %v4252_v56 }
0x2c68   :  { %6638 = vmatprep.subr.mxu0 %v4251_v57 }
0x2c69   :  { %6639 = vmatpush3.msra.mxu0 %v4251_v57 }
0x2d1e   :  { %v5665_v58 = vpop.f32.mrf.mxu1 }
0x2d1f   :  { %5689 = vrot.lane.b32.xlu1 %v5665_v58, %s7234_s18 }
0x2d20   :  { %v6631_v59 = vpop.f32.mrf.mxu1 }
0x2d22   :  { %v5589_v60 = vpop.f32.mrf.mxu0 }
0x2d23   :  { %5687 = vrot.lane.b32.xlu0 %v5589_v60, %s7234_s18 }
0x2d24   :  { %v6626_v61 = vpop.f32.mrf.mxu0 }
0x2d91   :  { %v5690_v2 = vpop.permute.xlu1 %5689 }
0x2d92   :  { %v5698_v12 = vsel %vm1789_vm3, %v5696_v7, %v5690_v2 }
0x2d95   :  { %v5688_v6 = vpop.permute.xlu0 %5687 }
0x2d96   :  { %v5697_v8 = vsel %vm1789_vm3, %v5695_v54, %v5688_v6 }
0x2d97   :  { %6640 = vmatprep.mubr.msk.f32.mxu0 %vm343_vm0, %v5697_v8 }
0x2d98   :  { %6641 = vmatmul.mubr.msk.f32.vlgmr.msra.gmra.mxu0 %vm343_vm0, %v5698_v12 }
0x2e58   :  { %v6642_v10 = vpop.f32.mrf.mxu0 }
0x2e59   :  { %v5783_v21 = vadd.f32 %v6642_v10, %v6055_v17 }
0x2e5a   :  { %v5777_v4 = vpop.f32.mrf.mxu0 }
0x2e5b   :  { %v5778_v18 = vadd.f32 %v6055_v17, %v5777_v4 }
0x2e5d   :  { %6651 = vmatprep.mubr.msk.f32.mxu1 %vm343_vm0, %v5778_v18 }
0x2e5e   :  { %6652 = vmatmul.mubr.msk.f32.vlgmr.msra.gmra.mxu1 %vm343_vm0, %v5783_v21 }
0x2f1e   :  { %v6653_v23 = vpop.f32.mrf.mxu1 }
0x2f1f   :  { %v5875_v5 = vadd.f32 %v6653_v23, %v6058_v22 }
0x2f20   :  { %v5869_v24 = vpop.f32.mrf.mxu1 }
0x2f21   :  { %5879 = vst [vmem:[#allocation25 + $0x8] sm:$0xff] %v5875_v5  ;;  %v5870_v25 = vadd.f32 %v6058_v22, %v5869_v24 }
0x2f23   :  { %5878 = vst [vmem:[#allocation25] sm:$0xff] %v5870_v25 }
0x2f24   :  { %7140 = shalt.err (!%p7137_p4)
}
0x2f25   :  { %5891 = dma.vmem_to_hbm [thread:$0]  %s5886_s7, 256, %s7431_s4, [#allocation4], %s7211_s6, %s7211_s6, %s7212_s26  }
0x2f26   :  { %7165 = dma.done.wait [#allocation4], 256  }
0x2f27   :  { %7166 = vsyncadd [#allocation4], 4294967040 }
0x2f28   :  { %5895 = vsyncpa [#allocation3], 1 }
0x2f29   :  { %5896 = vsyncpa [#allocation6], 1 }
0x2f2a   :  { %5897 = vsyncpa [#allocation9], 1 }
0x2f2b   :  { %5898 = vsyncpa [#allocation12], 1 }
0x2f2c   :  { %5899 = vsyncpa [#allocation15], 1 }
0x2f2d   :  { %5900 = vsyncpa [#allocation18], 1 }
0x2f2e   :  { %5901 = vsyncpa [#allocation21], 1 }
0x2f2f   :  { %5902 = vsyncpa [#allocation24], 1 }
0x2f30   :  { %5903 = vsyncpa [#allocation4], 1 }

</bundles_post_ra>
